<compile_context>
chip_gen: v7x
topology: tpu7x:2x2x1
jax: 0.10.0
libtpu: 0.0.40
codegen_flags: <defaults>
</compile_context>

<pallas_src>
import functools

import jax
import jax.numpy as jnp
from jax import lax
from jax.experimental import pallas as pl
from jax.experimental.pallas import tpu as pltpu

BN_EPS = 1e-5
ROW_BLOCK = 512                      # row tile for large node/edge row counts
ROW_ALIGN = 64                       # padding granularity for small row counts


def _pick_vmem_limit():
    """Per-generation scoped-VMEM budget (<= 48 MiB on 64 MiB parts)."""
    try:
        info = pltpu.get_tpu_info()
        cap = getattr(info, "vmem_capacity_bytes", None)
        if cap is None:
            return 48 * 1024 * 1024
        if cap >= 112 * 1024 * 1024:          # v5e / v6e: 128 MiB per core
            return 96 * 1024 * 1024
        return 48 * 1024 * 1024               # v7x: 64 MiB per core
    except Exception:
        return 48 * 1024 * 1024


VMEM_LIMIT = _pick_vmem_limit()


def round_up(x, m):
    return ((x + m - 1) // m) * m


def pad_rows(n):
    n = max(n, 1)
    if n <= ROW_BLOCK:
        return round_up(n, ROW_ALIGN)
    return round_up(n, ROW_BLOCK)


def row_tile(m):
    return m if m <= ROW_BLOCK else ROW_BLOCK


def _row(b):
    return b.reshape(1, -1).astype(jnp.float32)


def _elu(z):
    # exp only on the clamped (non-positive) branch -> no inf generated
    return jnp.where(z > 0.0, z, jnp.exp(jnp.minimum(z, 0.0)) - 1.0)


# ----------------------------------------------------------------------------
# Fused multi-operand Linear (+bias) (+residual) (+activation) kernel
#   y = act( sum_i x_i @ w_i + b [+ residual] )
# Used for the encoders and the ResBlock down/up projections.
# ----------------------------------------------------------------------------
def _fused_linear_kernel(*refs, n_in, act, has_res):
    xs = refs[:n_in]
    ws = refs[n_in:2 * n_in]
    b_ref = refs[2 * n_in]
    r_ref = refs[2 * n_in + 1] if has_res else None
    o_ref = refs[-1]

    z = jnp.dot(xs[0][...], ws[0][...], preferred_element_type=jnp.float32)
    for x_ref, w_ref in zip(xs[1:], ws[1:]):
        z = z + jnp.dot(x_ref[...], w_ref[...], preferred_element_type=jnp.float32)
    z = z + b_ref[...]
    if has_res:
        z = z + r_ref[...].astype(jnp.float32)
    if act == "elu":
        z = _elu(z)
    elif act == "relu":
        z = jnp.maximum(z, 0.0)
    o_ref[...] = z.astype(o_ref.dtype)


def linear_act(xs, ws, b, act="none", residual=None, out_dtype=jnp.bfloat16):
    """Fused y = act(sum_i x_i @ w_i + b [+ residual]); bf16 in, f32 accumulate."""
    if not isinstance(xs, (list, tuple)):
        xs, ws = [xs], [ws]
    xs = [x.astype(w.dtype) for x, w in zip(xs, ws)]
    ws = list(ws)
    M = xs[0].shape[0]
    tm = row_tile(M)
    assert M % tm == 0, (M, tm)
    Nout = ws[0].shape[1]
    n_in = len(xs)

    in_specs = []
    for x, w in zip(xs, ws):
        K = x.shape[1]
        assert w.shape[0] == K, (x.shape, w.shape)
        in_specs.append(pl.BlockSpec((tm, K), lambda i: (i, 0)))
    for w in ws:
        in_specs.append(pl.BlockSpec((w.shape[0], Nout), lambda i: (0, 0)))
    operands = xs + ws + [_row(b)]
    in_specs.append(pl.BlockSpec((1, Nout), lambda i: (0, 0)))

    has_res = residual is not None
    if has_res:
        operands.append(residual)
        in_specs.append(pl.BlockSpec((tm, Nout), lambda i: (i, 0)))

    return pl.pallas_call(
        functools.partial(_fused_linear_kernel, n_in=n_in, act=act, has_res=has_res),
        out_shape=jax.ShapeDtypeStruct((M, Nout), out_dtype),
        grid=(M // tm,),
        in_specs=in_specs,
        out_specs=pl.BlockSpec((tm, Nout), lambda i: (i, 0)),
        compiler_params=pltpu.CompilerParams(
            dimension_semantics=("parallel",), vmem_limit_bytes=VMEM_LIMIT),
    )(*operands)


# ----------------------------------------------------------------------------
# Fully fused MetaLayer kernel (one pallas_call per MetaLayer):
#   per edge tile:  src = x[row], dest = x[col]            (one-hot @ x, MXU)
#                   e_new = ELU(Lin([src,dest,e]))          (EdgeModel, BN folded)
#                   h     = ELU(Lin([src,e_new]))           (NodeModel mlp1)
#                   acc  += onehot(col)^T @ h               (scatter-add, MXU)
#   at last tile :  agg   = acc * inv_deg                   (scatter_mean finalize)
#                   x_new = ELU(Lin([x, agg]))              (NodeModel mlp2)
# x, inv_deg, weights and the node accumulator stay resident in VMEM; only the
# edge-attr tiles stream, and only e_new / x_new are written back to HBM.
# Padded edges carry index == Npad (gathers read zeros, scatter hits nothing).
# ----------------------------------------------------------------------------
def _meta_layer_kernel(row_ref, colg_ref, cols_ref, x_ref, e_ref, invdeg_ref,
                       we_s_ref, we_d_ref, we_e_ref, eb_ref,
                       w1_s_ref, w1_e_ref, b1_ref,
                       w2_x_ref, w2_a_ref, b2_ref,
                       e_out_ref, x_out_ref, acc_ref, *, npad):
    t = pl.program_id(0)

    @pl.when(t == 0)
    def _():
        acc_ref[...] = jnp.zeros_like(acc_ref)

    x = x_ref[...]                                            # (Npad, C) bf16
    e_in = e_ref[...]                                         # (te, C)   bf16
    te = e_in.shape[0]

    # --- in-kernel gathers: one-hot (te, Npad) @ x ------------------------
    node_ids_g = lax.broadcasted_iota(jnp.int32, (te, npad), 1)
    oh_src = (row_ref[...] == node_ids_g).astype(x.dtype)     # row_ref: (te,1)
    oh_dst = (colg_ref[...] == node_ids_g).astype(x.dtype)
    src = jnp.dot(oh_src, x, preferred_element_type=jnp.float32).astype(x.dtype)
    dst = jnp.dot(oh_dst, x, preferred_element_type=jnp.float32).astype(x.dtype)

    # --- EdgeModel: ELU(Linear([src, dest, edge_attr])) (BN folded) -------
    z_e = (jnp.dot(src, we_s_ref[...], preferred_element_type=jnp.float32)
           + jnp.dot(dst, we_d_ref[...], preferred_element_type=jnp.float32)
           + jnp.dot(e_in, we_e_ref[...], preferred_element_type=jnp.float32)
           + eb_ref[...])
    e_new = _elu(z_e).astype(e_out_ref.dtype)                 # (te, C) bf16
    e_out_ref[...] = e_new

    # --- NodeModel mlp1: ELU(Linear([src, e_new])) -------------------------
    z_h = (jnp.dot(src, w1_s_ref[...], preferred_element_type=jnp.float32)
           + jnp.dot(e_new, w1_e_ref[...], preferred_element_type=jnp.float32)
           + b1_ref[...])
    h = _elu(z_h).astype(x.dtype)                             # (te, C) bf16

    # --- scatter-add h into the node accumulator: onehot (Npad, te) @ h ---
    node_ids_s = lax.broadcasted_iota(jnp.int32, (npad, te), 0)
    oh_scatter = (cols_ref[...] == node_ids_s).astype(h.dtype)  # cols_ref: (1,te)
    acc_ref[...] += jnp.dot(oh_scatter, h, preferred_element_type=jnp.float32)

    # --- finalize: scatter_mean + NodeModel mlp2 ---------------------------
    @pl.when(t == pl.num_programs(0) - 1)
    def _():
        agg = (acc_ref[...] * invdeg_ref[...]).astype(x.dtype)   # (Npad, C)
        z_x = (jnp.dot(x, w2_x_ref[...], preferred_element_type=jnp.float32)
               + jnp.dot(agg, w2_a_ref[...], preferred_element_type=jnp.float32)
               + b2_ref[...])
        x_out_ref[...] = _elu(z_x).astype(x_out_ref.dtype)


def meta_layer(x, edge_attr, row_g, col_g, col_s, inv_deg, p):
    Npad, C = x.shape
    Epad = edge_attr.shape[0]
    te = row_tile(Epad)
    assert Epad % te == 0

    e_new, x_new = pl.pallas_call(
        functools.partial(_meta_layer_kernel, npad=Npad),
        out_shape=(jax.ShapeDtypeStruct((Epad, C), jnp.bfloat16),
                   jax.ShapeDtypeStruct((Npad, C), jnp.bfloat16)),
        grid=(Epad // te,),
        in_specs=[
            pl.BlockSpec((te, 1), lambda i: (i, 0)),       # row (gather)
            pl.BlockSpec((te, 1), lambda i: (i, 0)),       # col (gather)
            pl.BlockSpec((1, te), lambda i: (0, i)),       # col (scatter)
            pl.BlockSpec((Npad, C), lambda i: (0, 0)),     # x (resident)
            pl.BlockSpec((te, C), lambda i: (i, 0)),       # edge_attr tile
            pl.BlockSpec((Npad, 1), lambda i: (0, 0)),     # inv in-degree
            pl.BlockSpec((C, C), lambda i: (0, 0)),        # edge W (src slice)
            pl.BlockSpec((C, C), lambda i: (0, 0)),        # edge W (dest slice)
            pl.BlockSpec((C, C), lambda i: (0, 0)),        # edge W (edge slice)
            pl.BlockSpec((1, C), lambda i: (0, 0)),        # edge b
            pl.BlockSpec((C, C), lambda i: (0, 0)),        # n1 W (src slice)
            pl.BlockSpec((C, C), lambda i: (0, 0)),        # n1 W (edge slice)
            pl.BlockSpec((1, C), lambda i: (0, 0)),        # n1 b
            pl.BlockSpec((C, C), lambda i: (0, 0)),        # n2 W (x slice)
            pl.BlockSpec((C, C), lambda i: (0, 0)),        # n2 W (agg slice)
            pl.BlockSpec((1, C), lambda i: (0, 0)),        # n2 b
        ],
        out_specs=(pl.BlockSpec((te, C), lambda i: (i, 0)),
                   pl.BlockSpec((Npad, C), lambda i: (0, 0))),
        scratch_shapes=[pltpu.VMEM((Npad, C), jnp.float32)],
        compiler_params=pltpu.CompilerParams(
            dimension_semantics=("arbitrary",), vmem_limit_bytes=VMEM_LIMIT),
    )(row_g, col_g, col_s, x, edge_attr, inv_deg,
      p["edge_w"][0], p["edge_w"][1], p["edge_w"][2], _row(p["edge_b"]),
      p["n1_w"][0], p["n1_w"][1], _row(p["n1_b"]),
      p["n2_w"][0], p["n2_w"][1], _row(p["n2_b"]))
    return x_new, e_new


# ----------------------------------------------------------------------------
# Fused readout kernel: 3-step Set2Set (LSTM cell + masked segment attention)
# + kpool + pool3, all in one pallas_call.  q/r/h/c live as in-kernel values
# (steps unrolled); matmul operands are bf16, gate/softmax math is f32.
# ----------------------------------------------------------------------------
def _readout_kernel(batch_ref, x_ref, u_ref,
                    wih_q_ref, wih_r_ref, whh_ref, lb_ref,
                    kw_ref, kb_ref,
                    p3q_ref, p3r_ref, p3k_ref, p3b_ref,
                    out_ref, *, H, steps, bp):
    x = x_ref[...]                                            # (Npad, H) bf16
    npad = x.shape[0]
    batch = batch_ref[...]                                    # (1, Npad) int32
    gid = lax.broadcasted_iota(jnp.int32, (bp, npad), 0)
    mask = batch == gid                                       # (bp, Npad)
    maskf = mask.astype(jnp.float32)
    neg = jnp.float32(-1e30)

    q = jnp.zeros((bp, H), jnp.float32)
    r = jnp.zeros((bp, H), jnp.float32)
    h = jnp.zeros((bp, H), jnp.float32)
    c = jnp.zeros((bp, H), jnp.float32)
    for _ in range(steps):
        gates = (jnp.dot(q.astype(jnp.bfloat16), wih_q_ref[...],
                         preferred_element_type=jnp.float32)
                 + jnp.dot(r.astype(jnp.bfloat16), wih_r_ref[...],
                           preferred_element_type=jnp.float32)
                 + jnp.dot(h.astype(jnp.bfloat16), whh_ref[...],
                           preferred_element_type=jnp.float32)
                 + lb_ref[...])
        i_g = jax.nn.sigmoid(gates[:, 0 * H:1 * H])
        f_g = jax.nn.sigmoid(gates[:, 1 * H:2 * H])
        g_g = jnp.tanh(gates[:, 2 * H:3 * H])
        o_g = jax.nn.sigmoid(gates[:, 3 * H:4 * H])
        c = f_g * c + i_g * g_g
        h = o_g * jnp.tanh(c)
        q = h
        scores = lax.dot_general(q.astype(jnp.bfloat16), x, (((1,), (1,)), ((), ())),
                                 preferred_element_type=jnp.float32)  # (bp, Npad)
        scores = jnp.where(mask, scores, neg)
        m = jnp.max(scores, axis=1, keepdims=True)
        p = jnp.exp(scores - m) * maskf
        l = jnp.sum(p, axis=1, keepdims=True)
        r = jnp.dot(p.astype(jnp.bfloat16), x, preferred_element_type=jnp.float32)
        # epsilon guards padded (empty) graph rows -> r = 0 instead of NaN
        r = r / jnp.maximum(l, 1e-20)

    kout = (jnp.dot(u_ref[...], kw_ref[...], preferred_element_type=jnp.float32)
            + kb_ref[...])
    out = (jnp.dot(q.astype(jnp.bfloat16), p3q_ref[...], preferred_element_type=jnp.float32)
           + jnp.dot(r.astype(jnp.bfloat16), p3r_ref[...], preferred_element_type=jnp.float32)
           + jnp.dot(kout.astype(jnp.bfloat16), p3k_ref[...], preferred_element_type=jnp.float32)
           + p3b_ref[...])
    out_ref[...] = out


def readout(x, batch2d, u, p, bp, steps=3):
    Npad, H = x.shape
    return pl.pallas_call(
        functools.partial(_readout_kernel, H=H, steps=steps, bp=bp),
        out_shape=jax.ShapeDtypeStruct((bp, H), jnp.float32),
        compiler_params=pltpu.CompilerParams(vmem_limit_bytes=VMEM_LIMIT),
    )(batch2d, x, u,
      p["lstm_wih_q"], p["lstm_wih_r"], p["lstm_whh"], _row(p["lstm_b"]),
      p["kpool_w"], _row(p["kpool_b"]),
      p["pool3_w"][0], p["pool3_w"][1], p["pool3_w"][2], _row(p["pool3_b"]))


# ----------------------------------------------------------------------------
# Parameter construction (deterministic, synthetic).  Weights built at true
# PyTorch shapes, BN folded (eval mode), then padded to lane-dense widths and
# cast to bf16.  Padded channels provably stay exactly 0.
# ----------------------------------------------------------------------------
def init_linear(key, k, n, scale=0.1):
    kw, kb = jax.random.split(key)
    w = jax.random.normal(kw, (k, n), jnp.float32) * scale
    b = jax.random.normal(kb, (n,), jnp.float32) * scale
    return w, b


def fold_bn(w, b, gamma, beta):
    # eval-mode BatchNorm1d at init: running_mean = 0, running_var = 1
    s = gamma / jnp.sqrt(1.0 + BN_EPS)
    return w * s[None, :], b * s + beta


def pad_weight(w, k_to=None, n_to=None):
    k, n = w.shape
    k_to = k if k_to is None else k_to
    n_to = n if n_to is None else n_to
    return jnp.pad(w, ((0, k_to - k), (0, n_to - n)))


def pad_bias(b, n_to):
    return jnp.pad(b, (0, n_to - b.shape[0]))


def init_meta(key, C, CP):
    """MetaLayer (EdgeModel + NodeModel) at true width C, padded to CP."""
    k1, k2, k3 = jax.random.split(key, 3)
    ew, eb = fold_bn(*init_linear(k1, 3 * C, C), jnp.ones(C), jnp.zeros(C))
    n1w, n1b = fold_bn(*init_linear(k2, 2 * C, C), jnp.ones(C), jnp.zeros(C))
    n2w, n2b = fold_bn(*init_linear(k3, 2 * C, C), jnp.ones(C), jnp.zeros(C))

    def split_pad(w, parts):
        return [pad_weight(p, CP, CP).astype(jnp.bfloat16)
                for p in jnp.split(w, parts, axis=0)]

    return dict(edge_w=split_pad(ew, 3), edge_b=pad_bias(eb, CP),
                n1_w=split_pad(n1w, 2), n1_b=pad_bias(n1b, CP),
                n2_w=split_pad(n2w, 2), n2_b=pad_bias(n2b, CP))


def init_resblock(key, C):
    ks = jax.random.split(key, 5)
    q = C // 4
    QP = round_up(q, 128)        # lane-dense bottleneck width (padded cols stay 0)
    dn_w, dn_b = fold_bn(*init_linear(ks[0], C, q), jnp.ones(q), jnp.zeros(q))
    de_w, de_b = fold_bn(*init_linear(ks[1], C, q), jnp.ones(q), jnp.zeros(q))
    conv = init_meta(ks[2], q, QP)
    # bn2_* weight is zero-initialized (nn.init.zeros_) -> folded weight/bias = 0
    un_w, un_b = fold_bn(*init_linear(ks[3], q, C), jnp.zeros(C), jnp.zeros(C))
    ue_w, ue_b = fold_bn(*init_linear(ks[4], q, C), jnp.zeros(C), jnp.zeros(C))
    return dict(
        down_node_w=pad_weight(dn_w, None, QP).astype(jnp.bfloat16),
        down_node_b=pad_bias(dn_b, QP),
        down_edge_w=pad_weight(de_w, None, QP).astype(jnp.bfloat16),
        down_edge_b=pad_bias(de_b, QP),
        conv=conv,
        up_node_w=pad_weight(un_w, QP, None).astype(jnp.bfloat16),
        up_node_b=un_b,
        up_edge_w=pad_weight(ue_w, QP, None).astype(jnp.bfloat16),
        up_edge_b=ue_b)


def init_ligandnet(key, in_ch, edge_f, H, res_layers):
    assert H % 128 == 0, "hidden_dim should be a multiple of 128 (module default is 128)"
    keys = jax.random.split(key, 8 + res_layers)
    p = {}
    w, b = init_linear(keys[0], in_ch, H)
    p["node_enc_w"], p["node_enc_b"] = w.astype(jnp.bfloat16), b
    w, b = init_linear(keys[1], edge_f, H)
    p["edge_enc_w"], p["edge_enc_b"] = w.astype(jnp.bfloat16), b
    p["conv1"] = init_meta(keys[2], H, H)
    p["conv2"] = init_meta(keys[3], H, H)
    p["conv3"] = init_meta(keys[4], H, H)
    p["resnet"] = [init_resblock(keys[8 + i], H) for i in range(res_layers)]
    w, b = init_linear(keys[5], 512, H)
    p["kpool_w"], p["kpool_b"] = w.astype(jnp.bfloat16), b
    w, b = init_linear(keys[6], 3 * H, H)      # pool3 on [q_star(2H), kout(H)]
    p["pool3_w"] = [w[:H].astype(jnp.bfloat16),
                    w[H:2 * H].astype(jnp.bfloat16),
                    w[2 * H:].astype(jnp.bfloat16)]
    p["pool3_b"] = b
    # NOTE: pool1 / pool2 from __init__ are never used in forward -> omitted.
    k1, k2, k3 = jax.random.split(keys[7], 3)
    wih = jax.random.normal(k1, (2 * H, 4 * H), jnp.float32) * 0.1
    p["lstm_wih_q"] = wih[:H].astype(jnp.bfloat16)
    p["lstm_wih_r"] = wih[H:].astype(jnp.bfloat16)
    p["lstm_whh"] = (jax.random.normal(k2, (H, 4 * H), jnp.float32) * 0.1).astype(jnp.bfloat16)
    p["lstm_b"] = jax.random.normal(k3, (4 * H,), jnp.float32) * 0.1
    return p


# ----------------------------------------------------------------------------
# Forward pass (thin glue around the fused Pallas kernels)
# ----------------------------------------------------------------------------
def res_block(x, edge_attr, row_g, col_g, col_s, inv_deg, p):
    h_node = linear_act(x, p["down_node_w"], p["down_node_b"], act="elu")
    h_edge = linear_act(edge_attr, p["down_edge_w"], p["down_edge_b"], act="elu")
    h_node, h_edge = meta_layer(h_node, h_edge, row_g, col_g, col_s, inv_deg, p["conv"])
    # projectUp + folded bn2 (+dropout = identity) + residual add + ELU, fused
    x_new = linear_act(h_node, p["up_node_w"], p["up_node_b"], act="elu", residual=x)
    e_new = linear_act(h_edge, p["up_edge_w"], p["up_edge_b"], act="elu", residual=edge_attr)
    return x_new, e_new


def ligandnet_forward(params, x, edge_index, edge_attr, batch, U_pre, num_graphs):
    N = x.shape[0]
    E = edge_attr.shape[0]
    Npad = pad_rows(N)
    Epad = pad_rows(E)
    Bpad = round_up(max(num_graphs, 1), 8)

    row = edge_index[0].astype(jnp.int32)
    col = edge_index[1].astype(jnp.int32)
    # padded edges use the sentinel Npad: gathers read zeros, scatter hits nothing
    row_g = jnp.concatenate([row, jnp.full((Epad - E,), Npad, jnp.int32)]).reshape(Epad, 1)
    col_g = jnp.concatenate([col, jnp.full((Epad - E,), Npad, jnp.int32)]).reshape(Epad, 1)
    col_s = jnp.concatenate([col, jnp.full((Epad - E,), Npad, jnp.int32)]).reshape(1, Epad)
    batch2d = jnp.concatenate([batch.astype(jnp.int32),
                               jnp.full((Npad - N,), Bpad, jnp.int32)]).reshape(1, Npad)

    # inverse in-degree computed ONCE (col is identical for every MetaLayer)
    deg = jnp.zeros((Npad,), jnp.float32).at[col].add(1.0)
    inv_deg = (1.0 / jnp.maximum(deg, 1.0)).reshape(Npad, 1)

    # pad rows ONCE (kept padded through every layer) and cast to bf16
    xh = jnp.pad(x.astype(jnp.bfloat16), ((0, Npad - N), (0, 0)))
    eh = jnp.pad(edge_attr.astype(jnp.bfloat16), ((0, Epad - E), (0, 0)))
    ub = jnp.pad(U_pre.astype(jnp.bfloat16), ((0, Bpad - num_graphs), (0, 0)))

    xh = linear_act(xh, params["node_enc_w"], params["node_enc_b"], act="none")
    eh = linear_act(eh, params["edge_enc_w"], params["edge_enc_b"], act="none")
    for name in ("conv1", "conv2", "conv3"):
        xh, eh = meta_layer(xh, eh, row_g, col_g, col_s, inv_deg, params[name])
    for rp in params["resnet"]:
        xh, eh = res_block(xh, eh, row_g, col_g, col_s, inv_deg, rp)

    # fused Set2Set (3 steps) + kpool + pool3, one kernel; squeeze(-1) is a no-op
    output_graph3 = readout(xh, batch2d, ub, params, Bpad)
    return (xh[:N].astype(jnp.float32),
            eh[:E].astype(jnp.float32),
            output_graph3[:num_graphs])


# ----------------------------------------------------------------------------
if __name__ == "__main__":
    IN_CH, EDGE_F, HID, RES_LAYERS = 8, 6, 128, 2     # HID=128 = module default
    N, E, B = 16, 32, 2

    key = jax.random.PRNGKey(0)
    kp, kx, ke, ku, kr1, kc1, kr2, kc2 = jax.random.split(key, 8)
    params = init_ligandnet(kp, IN_CH, EDGE_F, HID, RES_LAYERS)

    x = jax.random.normal(kx, (N, IN_CH), jnp.float32)
    edge_attr = jax.random.normal(ke, (E, EDGE_F), jnp.float32)
    U_pre = jax.random.normal(ku, (B, 512), jnp.float32)
    batch = jnp.concatenate([jnp.zeros(N // 2, jnp.int32),
                             jnp.ones(N // 2, jnp.int32)])
    row = jnp.concatenate([jax.random.randint(kr1, (E // 2,), 0, N // 2),
                           jax.random.randint(kr2, (E // 2,), N // 2, N)]).astype(jnp.int32)
    col = jnp.concatenate([jax.random.randint(kc1, (E // 2,), 0, N // 2),
                           jax.random.randint(kc2, (E // 2,), N // 2, N)]).astype(jnp.int32)
    edge_index = jnp.stack([row, col])

    fwd = jax.jit(functools.partial(ligandnet_forward, num_graphs=B))
    x_out, e_out, g_out = fwd(params, x, edge_index, edge_attr, batch, U_pre)
    jax.block_until_ready((x_out, e_out, g_out))

    assert x_out.shape == (N, HID)
    assert e_out.shape == (E, HID)
    assert g_out.shape == (B, HID)
    assert bool(jnp.all(jnp.isfinite(x_out)))
    assert bool(jnp.all(jnp.isfinite(e_out)))
    assert bool(jnp.all(jnp.isfinite(g_out)))
    print("KERNEL_OK")
</pallas_src>

<mosaic_0001>
module attributes {stable_mosaic.version = 11 : i64} {
  func.func private @main(%arg0: i32) attributes {dimension_semantics = [#tpu.dimension_semantics<core_parallel>], iteration_bounds = array<i64: 2>, tpu.core_type = #tpu.core_type<sc_scalar_subcore>, window_params = []} {
    return
  }
}

module attributes {stable_mosaic.version = 11 : i64} {
  func.func private @main(%arg0: i32) attributes {dimension_semantics = [#tpu.dimension_semantics<core_parallel>], iteration_bounds = array<i64: 2>, tpu.core_type = #tpu.core_type<sc_scalar_subcore>, window_params = []} {
    return
  }
}

module attributes {stable_mosaic.version = 11 : i64} {
  func.func @_fused_linear_kernel(%arg0: i32, %arg1: memref<64x8xbf16, #tpu.memory_space<vmem>>, %arg2: memref<8x128xbf16, #tpu.memory_space<vmem>>, %arg3: memref<1x128xf32, #tpu.memory_space<vmem>>, %arg4: memref<64x128xbf16, #tpu.memory_space<vmem>>) attributes {dimension_semantics = [#tpu.dimension_semantics<parallel>], iteration_bounds = array<i64: 1>, scalar_prefetch = 0 : i64, scratch_operands = 0 : i64, tpu.core_type = #tpu.core_type<tc>, window_params = [{transform_indices = @transform_0, window_bounds = array<i64: 64, 8>}, {pipeline_mode = #tpu.pipeline_mode<synchronous>, transform_indices = @transform_1, window_bounds = array<i64: 8, 128>}, {pipeline_mode = #tpu.pipeline_mode<synchronous>, transform_indices = @transform_2, window_bounds = array<i64: 1, 128>}, {transform_indices = @transform_3, window_bounds = array<i64: 64, 128>}]} {
    %c0 = arith.constant 0 : index
    %c0_0 = arith.constant 0 : index
    %0 = vector.load %arg1[%c0, %c0_0] : memref<64x8xbf16, #tpu.memory_space<vmem>>, vector<64x8xbf16>
    %c0_1 = arith.constant 0 : index
    %c0_2 = arith.constant 0 : index
    %1 = vector.load %arg2[%c0_1, %c0_2] : memref<8x128xbf16, #tpu.memory_space<vmem>>, vector<8x128xbf16>
    %cst = arith.constant dense<0.000000e+00> : vector<64x128xf32>
    %2 = tpu.matmul %0, %1, %cst {dimension_numbers = #tpu.dot_dimension_numbers<[1], [0], [0], [1], [0, 0, 1, 1], [], []>} : vector<64x8xbf16>, vector<8x128xbf16>, vector<64x128xf32> -> vector<64x128xf32>
    %c0_3 = arith.constant 0 : index
    %c0_4 = arith.constant 0 : index
    %3 = vector.load %arg3[%c0_3, %c0_4] : memref<1x128xf32, #tpu.memory_space<vmem>>, vector<1x128xf32>
    %4 = vector.broadcast %3 : vector<1x128xf32> to vector<64x128xf32>
    %5 = arith.addf %2, %4 : vector<64x128xf32>
    %6 = arith.truncf %5 : vector<64x128xf32> to vector<64x128xbf16>
    %c0_5 = arith.constant 0 : index
    %c0_6 = arith.constant 0 : index
    %7 = vector.load %arg4[%c0_5, %c0_6] : memref<64x128xbf16, #tpu.memory_space<vmem>>, vector<64x128xbf16>
    tpu.vector_store %arg4[%c0_5, %c0_6], %6 {strides = array<i32>} : memref<64x128xbf16, #tpu.memory_space<vmem>>, vector<64x128xbf16>,
    return
  }
  func.func @transform_0(%arg0: i32) -> (i32, i32) {
    %c0_i32 = arith.constant 0 : i32
    %c0_i32_0 = arith.constant 0 : i32
    return %arg0, %c0_i32 : i32, i32
  }
  func.func @transform_1(%arg0: i32) -> (i32, i32) {
    %c0_i32 = arith.constant 0 : i32
    %c0_i32_0 = arith.constant 0 : i32
    %c0_i32_1 = arith.constant 0 : i32
    return %c0_i32, %c0_i32_0 : i32, i32
  }
  func.func @transform_2(%arg0: i32) -> (i32, i32) {
    %c0_i32 = arith.constant 0 : i32
    %c0_i32_0 = arith.constant 0 : i32
    %c0_i32_1 = arith.constant 0 : i32
    return %c0_i32, %c0_i32_0 : i32, i32
  }
  func.func @transform_3(%arg0: i32) -> (i32, i32) {
    %c0_i32 = arith.constant 0 : i32
    %c0_i32_0 = arith.constant 0 : i32
    return %arg0, %c0_i32 : i32, i32
  }
}

module attributes {stable_mosaic.version = 11 : i64} {
  func.func @_fused_linear_kernel(%arg0: i32, %arg1: memref<64x6xbf16, #tpu.memory_space<vmem>>, %arg2: memref<6x128xbf16, #tpu.memory_space<vmem>>, %arg3: memref<1x128xf32, #tpu.memory_space<vmem>>, %arg4: memref<64x128xbf16, #tpu.memory_space<vmem>>) attributes {dimension_semantics = [#tpu.dimension_semantics<parallel>], iteration_bounds = array<i64: 1>, scalar_prefetch = 0 : i64, scratch_operands = 0 : i64, tpu.core_type = #tpu.core_type<tc>, window_params = [{transform_indices = @transform_0, window_bounds = array<i64: 64, 6>}, {pipeline_mode = #tpu.pipeline_mode<synchronous>, transform_indices = @transform_1, window_bounds = array<i64: 6, 128>}, {pipeline_mode = #tpu.pipeline_mode<synchronous>, transform_indices = @transform_2, window_bounds = array<i64: 1, 128>}, {transform_indices = @transform_3, window_bounds = array<i64: 64, 128>}]} {
    %c0 = arith.constant 0 : index
    %c0_0 = arith.constant 0 : index
    %0 = vector.load %arg1[%c0, %c0_0] : memref<64x6xbf16, #tpu.memory_space<vmem>>, vector<64x6xbf16>
    %c0_1 = arith.constant 0 : index
    %c0_2 = arith.constant 0 : index
    %1 = vector.load %arg2[%c0_1, %c0_2] : memref<6x128xbf16, #tpu.memory_space<vmem>>, vector<6x128xbf16>
    %cst = arith.constant dense<0.000000e+00> : vector<64x128xf32>
    %2 = tpu.matmul %0, %1, %cst {dimension_numbers = #tpu.dot_dimension_numbers<[1], [0], [0], [1], [0, 0, 1, 1], [], []>} : vector<64x6xbf16>, vector<6x128xbf16>, vector<64x128xf32> -> vector<64x128xf32>
    %c0_3 = arith.constant 0 : index
    %c0_4 = arith.constant 0 : index
    %3 = vector.load %arg3[%c0_3, %c0_4] : memref<1x128xf32, #tpu.memory_space<vmem>>, vector<1x128xf32>
    %4 = vector.broadcast %3 : vector<1x128xf32> to vector<64x128xf32>
    %5 = arith.addf %2, %4 : vector<64x128xf32>
    %6 = arith.truncf %5 : vector<64x128xf32> to vector<64x128xbf16>
    %c0_5 = arith.constant 0 : index
    %c0_6 = arith.constant 0 : index
    %7 = vector.load %arg4[%c0_5, %c0_6] : memref<64x128xbf16, #tpu.memory_space<vmem>>, vector<64x128xbf16>
    tpu.vector_store %arg4[%c0_5, %c0_6], %6 {strides = array<i32>} : memref<64x128xbf16, #tpu.memory_space<vmem>>, vector<64x128xbf16>,
    return
  }
  func.func @transform_0(%arg0: i32) -> (i32, i32) {
    %c0_i32 = arith.constant 0 : i32
    %c0_i32_0 = arith.constant 0 : i32
    return %arg0, %c0_i32 : i32, i32
  }
  func.func @transform_1(%arg0: i32) -> (i32, i32) {
    %c0_i32 = arith.constant 0 : i32
    %c0_i32_0 = arith.constant 0 : i32
    %c0_i32_1 = arith.constant 0 : i32
    return %c0_i32, %c0_i32_0 : i32, i32
  }
  func.func @transform_2(%arg0: i32) -> (i32, i32) {
    %c0_i32 = arith.constant 0 : i32
    %c0_i32_0 = arith.constant 0 : i32
    %c0_i32_1 = arith.constant 0 : i32
    return %c0_i32, %c0_i32_0 : i32, i32
  }
  func.func @transform_3(%arg0: i32) -> (i32, i32) {
    %c0_i32 = arith.constant 0 : i32
    %c0_i32_0 = arith.constant 0 : i32
    return %arg0, %c0_i32 : i32, i32
  }
}

module attributes {stable_mosaic.version = 11 : i64} {
  func.func @_fused_linear_kernel(%arg0: i32, %arg1: memref<64x128xbf16, #tpu.memory_space<vmem>>, %arg2: memref<128x128xbf16, #tpu.memory_space<vmem>>, %arg3: memref<1x128xf32, #tpu.memory_space<vmem>>, %arg4: memref<64x128xbf16, #tpu.memory_space<vmem>>, %arg5: memref<64x128xbf16, #tpu.memory_space<vmem>>) attributes {dimension_semantics = [#tpu.dimension_semantics<parallel>], iteration_bounds = array<i64: 1>, scalar_prefetch = 0 : i64, scratch_operands = 0 : i64, tpu.core_type = #tpu.core_type<tc>, window_params = [{transform_indices = @transform_0, window_bounds = array<i64: 64, 128>}, {pipeline_mode = #tpu.pipeline_mode<synchronous>, transform_indices = @transform_1, window_bounds = array<i64: 128, 128>}, {pipeline_mode = #tpu.pipeline_mode<synchronous>, transform_indices = @transform_2, window_bounds = array<i64: 1, 128>}, {transform_indices = @transform_3, window_bounds = array<i64: 64, 128>}, {transform_indices = @transform_4, window_bounds = array<i64: 64, 128>}]} {
    %c0 = arith.constant 0 : index
    %c0_0 = arith.constant 0 : index
    %0 = vector.load %arg1[%c0, %c0_0] : memref<64x128xbf16, #tpu.memory_space<vmem>>, vector<64x128xbf16>
    %c0_1 = arith.constant 0 : index
    %c0_2 = arith.constant 0 : index
    %1 = vector.load %arg2[%c0_1, %c0_2] : memref<128x128xbf16, #tpu.memory_space<vmem>>, vector<128x128xbf16>
    %cst = arith.constant dense<0.000000e+00> : vector<64x128xf32>
    %2 = tpu.matmul %0, %1, %cst {dimension_numbers = #tpu.dot_dimension_numbers<[1], [0], [0], [1], [0, 0, 1, 1], [], []>} : vector<64x128xbf16>, vector<128x128xbf16>, vector<64x128xf32> -> vector<64x128xf32>
    %c0_3 = arith.constant 0 : index
    %c0_4 = arith.constant 0 : index
    %3 = vector.load %arg3[%c0_3, %c0_4] : memref<1x128xf32, #tpu.memory_space<vmem>>, vector<1x128xf32>
    %4 = vector.broadcast %3 : vector<1x128xf32> to vector<64x128xf32>
    %5 = arith.addf %2, %4 : vector<64x128xf32>
    %c0_5 = arith.constant 0 : index
    %c0_6 = arith.constant 0 : index
    %6 = vector.load %arg4[%c0_5, %c0_6] : memref<64x128xbf16, #tpu.memory_space<vmem>>, vector<64x128xbf16>
    %7 = arith.extf %6 : vector<64x128xbf16> to vector<64x128xf32>
    %8 = arith.addf %5, %7 : vector<64x128xf32>
    %cst_7 = arith.constant 0.000000e+00 : f32
    %9 = vector.broadcast %cst_7 : f32 to vector<64x128xf32>
    %10 = arith.cmpf ogt, %8, %9 : vector<64x128xf32>
    %cst_8 = arith.constant 0.000000e+00 : f32
    %11 = vector.broadcast %cst_8 : f32 to vector<64x128xf32>
    %12 = arith.minimumf %8, %11 : vector<64x128xf32>
    %13 = math.exp %12 : vector<64x128xf32>
    %cst_9 = arith.constant 1.000000e+00 : f32
    %14 = vector.broadcast %cst_9 : f32 to vector<64x128xf32>
    %15 = arith.subf %13, %14 : vector<64x128xf32>
    %16 = arith.select %10, %8, %15 : vector<64x128xi1>, vector<64x128xf32>
    %17 = arith.truncf %16 : vector<64x128xf32> to vector<64x128xbf16>
    %c0_10 = arith.constant 0 : index
    %c0_11 = arith.constant 0 : index
    %18 = vector.load %arg5[%c0_10, %c0_11] : memref<64x128xbf16, #tpu.memory_space<vmem>>, vector<64x128xbf16>
    tpu.vector_store %arg5[%c0_10, %c0_11], %17 {strides = array<i32>} : memref<64x128xbf16, #tpu.memory_space<vmem>>, vector<64x128xbf16>,
    return
  }
  func.func @transform_0(%arg0: i32) -> (i32, i32) {
    %c0_i32 = arith.constant 0 : i32
    %c0_i32_0 = arith.constant 0 : i32
    return %arg0, %c0_i32 : i32, i32
  }
  func.func @transform_1(%arg0: i32) -> (i32, i32) {
    %c0_i32 = arith.constant 0 : i32
    %c0_i32_0 = arith.constant 0 : i32
    %c0_i32_1 = arith.constant 0 : i32
    return %c0_i32, %c0_i32_0 : i32, i32
  }
  func.func @transform_2(%arg0: i32) -> (i32, i32) {
    %c0_i32 = arith.constant 0 : i32
    %c0_i32_0 = arith.constant 0 : i32
    %c0_i32_1 = arith.constant 0 : i32
    return %c0_i32, %c0_i32_0 : i32, i32
  }
  func.func @transform_3(%arg0: i32) -> (i32, i32) {
    %c0_i32 = arith.constant 0 : i32
    %c0_i32_0 = arith.constant 0 : i32
    return %arg0, %c0_i32 : i32, i32
  }
  func.func @transform_4(%arg0: i32) -> (i32, i32) {
    %c0_i32 = arith.constant 0 : i32
    %c0_i32_0 = arith.constant 0 : i32
    return %arg0, %c0_i32 : i32, i32
  }
}

module attributes {stable_mosaic.version = 11 : i64} {
  func.func @_fused_linear_kernel(%arg0: i32, %arg1: memref<64x128xbf16, #tpu.memory_space<vmem>>, %arg2: memref<128x128xbf16, #tpu.memory_space<vmem>>, %arg3: memref<1x128xf32, #tpu.memory_space<vmem>>, %arg4: memref<64x128xbf16, #tpu.memory_space<vmem>>) attributes {dimension_semantics = [#tpu.dimension_semantics<parallel>], iteration_bounds = array<i64: 1>, scalar_prefetch = 0 : i64, scratch_operands = 0 : i64, tpu.core_type = #tpu.core_type<tc>, window_params = [{transform_indices = @transform_0, window_bounds = array<i64: 64, 128>}, {pipeline_mode = #tpu.pipeline_mode<synchronous>, transform_indices = @transform_1, window_bounds = array<i64: 128, 128>}, {pipeline_mode = #tpu.pipeline_mode<synchronous>, transform_indices = @transform_2, window_bounds = array<i64: 1, 128>}, {transform_indices = @transform_3, window_bounds = array<i64: 64, 128>}]} {
    %c0 = arith.constant 0 : index
    %c0_0 = arith.constant 0 : index
    %0 = vector.load %arg1[%c0, %c0_0] : memref<64x128xbf16, #tpu.memory_space<vmem>>, vector<64x128xbf16>
    %c0_1 = arith.constant 0 : index
    %c0_2 = arith.constant 0 : index
    %1 = vector.load %arg2[%c0_1, %c0_2] : memref<128x128xbf16, #tpu.memory_space<vmem>>, vector<128x128xbf16>
    %cst = arith.constant dense<0.000000e+00> : vector<64x128xf32>
    %2 = tpu.matmul %0, %1, %cst {dimension_numbers = #tpu.dot_dimension_numbers<[1], [0], [0], [1], [0, 0, 1, 1], [], []>} : vector<64x128xbf16>, vector<128x128xbf16>, vector<64x128xf32> -> vector<64x128xf32>
    %c0_3 = arith.constant 0 : index
    %c0_4 = arith.constant 0 : index
    %3 = vector.load %arg3[%c0_3, %c0_4] : memref<1x128xf32, #tpu.memory_space<vmem>>, vector<1x128xf32>
    %4 = vector.broadcast %3 : vector<1x128xf32> to vector<64x128xf32>
    %5 = arith.addf %2, %4 : vector<64x128xf32>
    %cst_5 = arith.constant 0.000000e+00 : f32
    %6 = vector.broadcast %cst_5 : f32 to vector<64x128xf32>
    %7 = arith.cmpf ogt, %5, %6 : vector<64x128xf32>
    %cst_6 = arith.constant 0.000000e+00 : f32
    %8 = vector.broadcast %cst_6 : f32 to vector<64x128xf32>
    %9 = arith.minimumf %5, %8 : vector<64x128xf32>
    %10 = math.exp %9 : vector<64x128xf32>
    %cst_7 = arith.constant 1.000000e+00 : f32
    %11 = vector.broadcast %cst_7 : f32 to vector<64x128xf32>
    %12 = arith.subf %10, %11 : vector<64x128xf32>
    %13 = arith.select %7, %5, %12 : vector<64x128xi1>, vector<64x128xf32>
    %14 = arith.truncf %13 : vector<64x128xf32> to vector<64x128xbf16>
    %c0_8 = arith.constant 0 : index
    %c0_9 = arith.constant 0 : index
    %15 = vector.load %arg4[%c0_8, %c0_9] : memref<64x128xbf16, #tpu.memory_space<vmem>>, vector<64x128xbf16>
    tpu.vector_store %arg4[%c0_8, %c0_9], %14 {strides = array<i32>} : memref<64x128xbf16, #tpu.memory_space<vmem>>, vector<64x128xbf16>,
    return
  }
  func.func @transform_0(%arg0: i32) -> (i32, i32) {
    %c0_i32 = arith.constant 0 : i32
    %c0_i32_0 = arith.constant 0 : i32
    return %arg0, %c0_i32 : i32, i32
  }
  func.func @transform_1(%arg0: i32) -> (i32, i32) {
    %c0_i32 = arith.constant 0 : i32
    %c0_i32_0 = arith.constant 0 : i32
    %c0_i32_1 = arith.constant 0 : i32
    return %c0_i32, %c0_i32_0 : i32, i32
  }
  func.func @transform_2(%arg0: i32) -> (i32, i32) {
    %c0_i32 = arith.constant 0 : i32
    %c0_i32_0 = arith.constant 0 : i32
    %c0_i32_1 = arith.constant 0 : i32
    return %c0_i32, %c0_i32_0 : i32, i32
  }
  func.func @transform_3(%arg0: i32) -> (i32, i32) {
    %c0_i32 = arith.constant 0 : i32
    %c0_i32_0 = arith.constant 0 : i32
    return %arg0, %c0_i32 : i32, i32
  }
}

module attributes {stable_mosaic.version = 11 : i64} {
  func.func @_meta_layer_kernel(%arg0: i32, %arg1: memref<64x1xi32, #tpu.memory_space<vmem>>, %arg2: memref<64x1xi32, #tpu.memory_space<vmem>>, %arg3: memref<1x64xi32, #tpu.memory_space<vmem>>, %arg4: memref<64x128xbf16, #tpu.memory_space<vmem>>, %arg5: memref<64x128xbf16, #tpu.memory_space<vmem>>, %arg6: memref<64x1xf32, #tpu.memory_space<vmem>>, %arg7: memref<128x128xbf16, #tpu.memory_space<vmem>>, %arg8: memref<128x128xbf16, #tpu.memory_space<vmem>>, %arg9: memref<128x128xbf16, #tpu.memory_space<vmem>>, %arg10: memref<1x128xf32, #tpu.memory_space<vmem>>, %arg11: memref<128x128xbf16, #tpu.memory_space<vmem>>, %arg12: memref<128x128xbf16, #tpu.memory_space<vmem>>, %arg13: memref<1x128xf32, #tpu.memory_space<vmem>>, %arg14: memref<128x128xbf16, #tpu.memory_space<vmem>>, %arg15: memref<128x128xbf16, #tpu.memory_space<vmem>>, %arg16: memref<1x128xf32, #tpu.memory_space<vmem>>, %arg17: memref<64x128xbf16, #tpu.memory_space<vmem>>, %arg18: memref<64x128xbf16, #tpu.memory_space<vmem>>, %arg19: memref<64x128xf32, #tpu.memory_space<vmem>>) attributes {dimension_semantics = [#tpu.dimension_semantics<arbitrary>], iteration_bounds = array<i64: 1>, scalar_prefetch = 0 : i64, scratch_operands = 1 : i64, tpu.core_type = #tpu.core_type<tc>, window_params = [{transform_indices = @transform_0, window_bounds = array<i64: 64, 1>}, {transform_indices = @transform_1, window_bounds = array<i64: 64, 1>}, {transform_indices = @transform_2, window_bounds = array<i64: 1, 64>}, {pipeline_mode = #tpu.pipeline_mode<synchronous>, transform_indices = @transform_3, window_bounds = array<i64: 64, 128>}, {transform_indices = @transform_4, window_bounds = array<i64: 64, 128>}, {pipeline_mode = #tpu.pipeline_mode<synchronous>, transform_indices = @transform_5, window_bounds = array<i64: 64, 1>}, {pipeline_mode = #tpu.pipeline_mode<synchronous>, transform_indices = @transform_6, window_bounds = array<i64: 128, 128>}, {pipeline_mode = #tpu.pipeline_mode<synchronous>, transform_indices = @transform_7, window_bounds = array<i64: 128, 128>}, {pipeline_mode = #tpu.pipeline_mode<synchronous>, transform_indices = @transform_8, window_bounds = array<i64: 128, 128>}, {pipeline_mode = #tpu.pipeline_mode<synchronous>, transform_indices = @transform_9, window_bounds = array<i64: 1, 128>}, {pipeline_mode = #tpu.pipeline_mode<synchronous>, transform_indices = @transform_10, window_bounds = array<i64: 128, 128>}, {pipeline_mode = #tpu.pipeline_mode<synchronous>, transform_indices = @transform_11, window_bounds = array<i64: 128, 128>}, {pipeline_mode = #tpu.pipeline_mode<synchronous>, transform_indices = @transform_12, window_bounds = array<i64: 1, 128>}, {pipeline_mode = #tpu.pipeline_mode<synchronous>, transform_indices = @transform_13, window_bounds = array<i64: 128, 128>}, {pipeline_mode = #tpu.pipeline_mode<synchronous>, transform_indices = @transform_14, window_bounds = array<i64: 128, 128>}, {pipeline_mode = #tpu.pipeline_mode<synchronous>, transform_indices = @transform_15, window_bounds = array<i64: 1, 128>}, {transform_indices = @transform_16, window_bounds = array<i64: 64, 128>}, {pipeline_mode = #tpu.pipeline_mode<synchronous>, transform_indices = @transform_17, window_bounds = array<i64: 64, 128>}]} {
    %c0_i32 = arith.constant 0 : i32
    %0 = arith.cmpi eq, %arg0, %c0_i32 : i32
    %1 = arith.extui %0 : i1 to i32
    %c0_i32_0 = arith.constant 0 : i32
    %2 = arith.cmpi ne, %1, %c0_i32_0 : i32
    scf.if %2 {
      %cst_45 = arith.constant 0.000000e+00 : f32
      %74 = vector.broadcast %cst_45 : f32 to vector<64x128xf32>
      %c0_46 = arith.constant 0 : index
      %c0_47 = arith.constant 0 : index
      %75 = vector.load %arg19[%c0_46, %c0_47] : memref<64x128xf32, #tpu.memory_space<vmem>>, vector<64x128xf32>
      tpu.vector_store %arg19[%c0_46, %c0_47], %74 {strides = array<i32>} : memref<64x128xf32, #tpu.memory_space<vmem>>, vector<64x128xf32>,
    } else {
    }
    %c0 = arith.constant 0 : index
    %c0_1 = arith.constant 0 : index
    %3 = vector.load %arg4[%c0, %c0_1] : memref<64x128xbf16, #tpu.memory_space<vmem>>, vector<64x128xbf16>
    %c0_2 = arith.constant 0 : index
    %c0_3 = arith.constant 0 : index
    %4 = vector.load %arg5[%c0_2, %c0_3] : memref<64x128xbf16, #tpu.memory_space<vmem>>, vector<64x128xbf16>
    %5 = tpu.iota {dimensions = array<i32: 1>} : vector<64x64xi32>
    %c0_4 = arith.constant 0 : index
    %c0_5 = arith.constant 0 : index
    %6 = vector.load %arg1[%c0_4, %c0_5] : memref<64x1xi32, #tpu.memory_space<vmem>>, vector<64x1xi32>
    %7 = vector.broadcast %6 : vector<64x1xi32> to vector<64x64xi32>
    %8 = arith.cmpi eq, %7, %5 : vector<64x64xi32>
    %9 = arith.extui %8 : vector<64x64xi1> to vector<64x64xi32>
    %10 = arith.sitofp %9 : vector<64x64xi32> to vector<64x64xf32>
    %11 = arith.truncf %10 : vector<64x64xf32> to vector<64x64xbf16>
    %c0_6 = arith.constant 0 : index
    %c0_7 = arith.constant 0 : index
    %12 = vector.load %arg2[%c0_6, %c0_7] : memref<64x1xi32, #tpu.memory_space<vmem>>, vector<64x1xi32>
    %13 = vector.broadcast %12 : vector<64x1xi32> to vector<64x64xi32>
    %14 = arith.cmpi eq, %13, %5 : vector<64x64xi32>
    %15 = arith.extui %14 : vector<64x64xi1> to vector<64x64xi32>
    %16 = arith.sitofp %15 : vector<64x64xi32> to vector<64x64xf32>
    %17 = arith.truncf %16 : vector<64x64xf32> to vector<64x64xbf16>
    %cst = arith.constant dense<0.000000e+00> : vector<64x128xf32>
    %18 = tpu.matmul %11, %3, %cst {dimension_numbers = #tpu.dot_dimension_numbers<[1], [0], [0], [1], [0, 0, 1, 1], [], []>} : vector<64x64xbf16>, vector<64x128xbf16>, vector<64x128xf32> -> vector<64x128xf32>
    %19 = arith.truncf %18 : vector<64x128xf32> to vector<64x128xbf16>
    %cst_8 = arith.constant dense<0.000000e+00> : vector<64x128xf32>
    %20 = tpu.matmul %17, %3, %cst_8 {dimension_numbers = #tpu.dot_dimension_numbers<[1], [0], [0], [1], [0, 0, 1, 1], [], []>} : vector<64x64xbf16>, vector<64x128xbf16>, vector<64x128xf32> -> vector<64x128xf32>
    %21 = arith.truncf %20 : vector<64x128xf32> to vector<64x128xbf16>
    %c0_9 = arith.constant 0 : index
    %c0_10 = arith.constant 0 : index
    %22 = vector.load %arg7[%c0_9, %c0_10] : memref<128x128xbf16, #tpu.memory_space<vmem>>, vector<128x128xbf16>
    %cst_11 = arith.constant dense<0.000000e+00> : vector<64x128xf32>
    %23 = tpu.matmul %19, %22, %cst_11 {dimension_numbers = #tpu.dot_dimension_numbers<[1], [0], [0], [1], [0, 0, 1, 1], [], []>} : vector<64x128xbf16>, vector<128x128xbf16>, vector<64x128xf32> -> vector<64x128xf32>
    %c0_12 = arith.constant 0 : index
    %c0_13 = arith.constant 0 : index
    %24 = vector.load %arg8[%c0_12, %c0_13] : memref<128x128xbf16, #tpu.memory_space<vmem>>, vector<128x128xbf16>
    %cst_14 = arith.constant dense<0.000000e+00> : vector<64x128xf32>
    %25 = tpu.matmul %21, %24, %cst_14 {dimension_numbers = #tpu.dot_dimension_numbers<[1], [0], [0], [1], [0, 0, 1, 1], [], []>} : vector<64x128xbf16>, vector<128x128xbf16>, vector<64x128xf32> -> vector<64x128xf32>
    %26 = arith.addf %23, %25 : vector<64x128xf32>
    %c0_15 = arith.constant 0 : index
    %c0_16 = arith.constant 0 : index
    %27 = vector.load %arg9[%c0_15, %c0_16] : memref<128x128xbf16, #tpu.memory_space<vmem>>, vector<128x128xbf16>
    %cst_17 = arith.constant dense<0.000000e+00> : vector<64x128xf32>
    %28 = tpu.matmul %4, %27, %cst_17 {dimension_numbers = #tpu.dot_dimension_numbers<[1], [0], [0], [1], [0, 0, 1, 1], [], []>} : vector<64x128xbf16>, vector<128x128xbf16>, vector<64x128xf32> -> vector<64x128xf32>
    %29 = arith.addf %26, %28 : vector<64x128xf32>
    %c0_18 = arith.constant 0 : index
    %c0_19 = arith.constant 0 : index
    %30 = vector.load %arg10[%c0_18, %c0_19] : memref<1x128xf32, #tpu.memory_space<vmem>>, vector<1x128xf32>
    %31 = vector.broadcast %30 : vector<1x128xf32> to vector<64x128xf32>
    %32 = arith.addf %29, %31 : vector<64x128xf32>
    %cst_20 = arith.constant 0.000000e+00 : f32
    %33 = vector.broadcast %cst_20 : f32 to vector<64x128xf32>
    %34 = arith.cmpf ogt, %32, %33 : vector<64x128xf32>
    %cst_21 = arith.constant 0.000000e+00 : f32
    %35 = vector.broadcast %cst_21 : f32 to vector<64x128xf32>
    %36 = arith.minimumf %32, %35 : vector<64x128xf32>
    %37 = math.exp %36 : vector<64x128xf32>
    %cst_22 = arith.constant 1.000000e+00 : f32
    %38 = vector.broadcast %cst_22 : f32 to vector<64x128xf32>
    %39 = arith.subf %37, %38 : vector<64x128xf32>
    %40 = arith.select %34, %32, %39 : vector<64x128xi1>, vector<64x128xf32>
    %41 = arith.truncf %40 : vector<64x128xf32> to vector<64x128xbf16>
    %c0_23 = arith.constant 0 : index
    %c0_24 = arith.constant 0 : index
    %42 = vector.load %arg17[%c0_23, %c0_24] : memref<64x128xbf16, #tpu.memory_space<vmem>>, vector<64x128xbf16>
    tpu.vector_store %arg17[%c0_23, %c0_24], %41 {strides = array<i32>} : memref<64x128xbf16, #tpu.memory_space<vmem>>, vector<64x128xbf16>,
    %c0_25 = arith.constant 0 : index
    %c0_26 = arith.constant 0 : index
    %43 = vector.load %arg11[%c0_25, %c0_26] : memref<128x128xbf16, #tpu.memory_space<vmem>>, vector<128x128xbf16>
    %cst_27 = arith.constant dense<0.000000e+00> : vector<64x128xf32>
    %44 = tpu.matmul %19, %43, %cst_27 {dimension_numbers = #tpu.dot_dimension_numbers<[1], [0], [0], [1], [0, 0, 1, 1], [], []>} : vector<64x128xbf16>, vector<128x128xbf16>, vector<64x128xf32> -> vector<64x128xf32>
    %c0_28 = arith.constant 0 : index
    %c0_29 = arith.constant 0 : index
    %45 = vector.load %arg12[%c0_28, %c0_29] : memref<128x128xbf16, #tpu.memory_space<vmem>>, vector<128x128xbf16>
    %cst_30 = arith.constant dense<0.000000e+00> : vector<64x128xf32>
    %46 = tpu.matmul %41, %45, %cst_30 {dimension_numbers = #tpu.dot_dimension_numbers<[1], [0], [0], [1], [0, 0, 1, 1], [], []>} : vector<64x128xbf16>, vector<128x128xbf16>, vector<64x128xf32> -> vector<64x128xf32>
    %47 = arith.addf %44, %46 : vector<64x128xf32>
    %c0_31 = arith.constant 0 : index
    %c0_32 = arith.constant 0 : index
    %48 = vector.load %arg13[%c0_31, %c0_32] : memref<1x128xf32, #tpu.memory_space<vmem>>, vector<1x128xf32>
    %49 = vector.broadcast %48 : vector<1x128xf32> to vector<64x128xf32>
    %50 = arith.addf %47, %49 : vector<64x128xf32>
    %cst_33 = arith.constant 0.000000e+00 : f32
    %51 = vector.broadcast %cst_33 : f32 to vector<64x128xf32>
    %52 = arith.cmpf ogt, %50, %51 : vector<64x128xf32>
    %cst_34 = arith.constant 0.000000e+00 : f32
    %53 = vector.broadcast %cst_34 : f32 to vector<64x128xf32>
    %54 = arith.minimumf %50, %53 : vector<64x128xf32>
    %55 = math.exp %54 : vector<64x128xf32>
    %cst_35 = arith.constant 1.000000e+00 : f32
    %56 = vector.broadcast %cst_35 : f32 to vector<64x128xf32>
    %57 = arith.subf %55, %56 : vector<64x128xf32>
    %58 = arith.select %52, %50, %57 : vector<64x128xi1>, vector<64x128xf32>
    %59 = arith.truncf %58 : vector<64x128xf32> to vector<64x128xbf16>
    %60 = tpu.iota {dimensions = array<i32: 0>} : vector<64x64xi32>
    %c0_36 = arith.constant 0 : index
    %c0_37 = arith.constant 0 : index
    %61 = vector.load %arg3[%c0_36, %c0_37] : memref<1x64xi32, #tpu.memory_space<vmem>>, vector<1x64xi32>
    %62 = vector.broadcast %61 : vector<1x64xi32> to vector<64x64xi32>
    %63 = arith.cmpi eq, %62, %60 : vector<64x64xi32>
    %64 = arith.extui %63 : vector<64x64xi1> to vector<64x64xi32>
    %65 = arith.sitofp %64 : vector<64x64xi32> to vector<64x64xf32>
    %66 = arith.truncf %65 : vector<64x64xf32> to vector<64x64xbf16>
    %c0_38 = arith.constant 0 : index
    %c0_39 = arith.constant 0 : index
    %67 = vector.load %arg19[%c0_38, %c0_39] : memref<64x128xf32, #tpu.memory_space<vmem>>, vector<64x128xf32>
    %cst_40 = arith.constant dense<0.000000e+00> : vector<64x128xf32>
    %68 = tpu.matmul %66, %59, %cst_40 {dimension_numbers = #tpu.dot_dimension_numbers<[1], [0], [0], [1], [0, 0, 1, 1], [], []>} : vector<64x64xbf16>, vector<64x128xbf16>, vector<64x128xf32> -> vector<64x128xf32>
    %69 = arith.addf %67, %68 : vector<64x128xf32>
    %c0_41 = arith.constant 0 : index
    %c0_42 = arith.constant 0 : index
    %70 = vector.load %arg19[%c0_41, %c0_42] : memref<64x128xf32, #tpu.memory_space<vmem>>, vector<64x128xf32>
    tpu.vector_store %arg19[%c0_41, %c0_42], %69 {strides = array<i32>} : memref<64x128xf32, #tpu.memory_space<vmem>>, vector<64x128xf32>,
    %c0_i32_43 = arith.constant 0 : i32
    %71 = arith.cmpi eq, %arg0, %c0_i32_43 : i32
    %72 = arith.extui %71 : i1 to i32
    %c0_i32_44 = arith.constant 0 : i32
    %73 = arith.cmpi ne, %72, %c0_i32_44 : i32
    scf.if %73 {
      %c0_45 = arith.constant 0 : index
      %c0_46 = arith.constant 0 : index
      %74 = vector.load %arg19[%c0_45, %c0_46] : memref<64x128xf32, #tpu.memory_space<vmem>>, vector<64x128xf32>
      %c0_47 = arith.constant 0 : index
      %c0_48 = arith.constant 0 : index
      %75 = vector.load %arg6[%c0_47, %c0_48] : memref<64x1xf32, #tpu.memory_space<vmem>>, vector<64x1xf32>
      %76 = vector.broadcast %75 : vector<64x1xf32> to vector<64x128xf32>
      %77 = arith.mulf %74, %76 : vector<64x128xf32>
      %78 = arith.truncf %77 : vector<64x128xf32> to vector<64x128xbf16>
      %c0_49 = arith.constant 0 : index
      %c0_50 = arith.constant 0 : index
      %79 = vector.load %arg14[%c0_49, %c0_50] : memref<128x128xbf16, #tpu.memory_space<vmem>>, vector<128x128xbf16>
      %cst_51 = arith.constant dense<0.000000e+00> : vector<64x128xf32>
      %80 = tpu.matmul %3, %79, %cst_51 {dimension_numbers = #tpu.dot_dimension_numbers<[1], [0], [0], [1], [0, 0, 1, 1], [], []>} : vector<64x128xbf16>, vector<128x128xbf16>, vector<64x128xf32> -> vector<64x128xf32>
      %c0_52 = arith.constant 0 : index
      %c0_53 = arith.constant 0 : index
      %81 = vector.load %arg15[%c0_52, %c0_53] : memref<128x128xbf16, #tpu.memory_space<vmem>>, vector<128x128xbf16>
      %cst_54 = arith.constant dense<0.000000e+00> : vector<64x128xf32>
      %82 = tpu.matmul %78, %81, %cst_54 {dimension_numbers = #tpu.dot_dimension_numbers<[1], [0], [0], [1], [0, 0, 1, 1], [], []>} : vector<64x128xbf16>, vector<128x128xbf16>, vector<64x128xf32> -> vector<64x128xf32>
      %83 = arith.addf %80, %82 : vector<64x128xf32>
      %c0_55 = arith.constant 0 : index
      %c0_56 = arith.constant 0 : index
      %84 = vector.load %arg16[%c0_55, %c0_56] : memref<1x128xf32, #tpu.memory_space<vmem>>, vector<1x128xf32>
      %85 = vector.broadcast %84 : vector<1x128xf32> to vector<64x128xf32>
      %86 = arith.addf %83, %85 : vector<64x128xf32>
      %cst_57 = arith.constant 0.000000e+00 : f32
      %87 = vector.broadcast %cst_57 : f32 to vector<64x128xf32>
      %88 = arith.cmpf ogt, %86, %87 : vector<64x128xf32>
      %cst_58 = arith.constant 0.000000e+00 : f32
      %89 = vector.broadcast %cst_58 : f32 to vector<64x128xf32>
      %90 = arith.minimumf %86, %89 : vector<64x128xf32>
      %91 = math.exp %90 : vector<64x128xf32>
      %cst_59 = arith.constant 1.000000e+00 : f32
      %92 = vector.broadcast %cst_59 : f32 to vector<64x128xf32>
      %93 = arith.subf %91, %92 : vector<64x128xf32>
      %94 = arith.select %88, %86, %93 : vector<64x128xi1>, vector<64x128xf32>
      %95 = arith.truncf %94 : vector<64x128xf32> to vector<64x128xbf16>
      %c0_60 = arith.constant 0 : index
      %c0_61 = arith.constant 0 : index
      %96 = vector.load %arg18[%c0_60, %c0_61] : memref<64x128xbf16, #tpu.memory_space<vmem>>, vector<64x128xbf16>
      tpu.vector_store %arg18[%c0_60, %c0_61], %95 {strides = array<i32>} : memref<64x128xbf16, #tpu.memory_space<vmem>>, vector<64x128xbf16>,
    } else {
    }
    return
  }
  func.func @transform_0(%arg0: i32) -> (i32, i32) {
    %c0_i32 = arith.constant 0 : i32
    %c0_i32_0 = arith.constant 0 : i32
    return %arg0, %c0_i32 : i32, i32
  }
  func.func @transform_1(%arg0: i32) -> (i32, i32) {
    %c0_i32 = arith.constant 0 : i32
    %c0_i32_0 = arith.constant 0 : i32
    return %arg0, %c0_i32 : i32, i32
  }
  func.func @transform_2(%arg0: i32) -> (i32, i32) {
    %c0_i32 = arith.constant 0 : i32
    %c0_i32_0 = arith.constant 0 : i32
    return %c0_i32, %arg0 : i32, i32
  }
  func.func @transform_3(%arg0: i32) -> (i32, i32) {
    %c0_i32 = arith.constant 0 : i32
    %c0_i32_0 = arith.constant 0 : i32
    %c0_i32_1 = arith.constant 0 : i32
    return %c0_i32, %c0_i32_0 : i32, i32
  }
  func.func @transform_4(%arg0: i32) -> (i32, i32) {
    %c0_i32 = arith.constant 0 : i32
    %c0_i32_0 = arith.constant 0 : i32
    return %arg0, %c0_i32 : i32, i32
  }
  func.func @transform_5(%arg0: i32) -> (i32, i32) {
    %c0_i32 = arith.constant 0 : i32
    %c0_i32_0 = arith.constant 0 : i32
    %c0_i32_1 = arith.constant 0 : i32
    return %c0_i32, %c0_i32_0 : i32, i32
  }
  func.func @transform_6(%arg0: i32) -> (i32, i32) {
    %c0_i32 = arith.constant 0 : i32
    %c0_i32_0 = arith.constant 0 : i32
    %c0_i32_1 = arith.constant 0 : i32
    return %c0_i32, %c0_i32_0 : i32, i32
  }
  func.func @transform_7(%arg0: i32) -> (i32, i32) {
    %c0_i32 = arith.constant 0 : i32
    %c0_i32_0 = arith.constant 0 : i32
    %c0_i32_1 = arith.constant 0 : i32
    return %c0_i32, %c0_i32_0 : i32, i32
  }
  func.func @transform_8(%arg0: i32) -> (i32, i32) {
    %c0_i32 = arith.constant 0 : i32
    %c0_i32_0 = arith.constant 0 : i32
    %c0_i32_1 = arith.constant 0 : i32
    return %c0_i32, %c0_i32_0 : i32, i32
  }
  func.func @transform_9(%arg0: i32) -> (i32, i32) {
    %c0_i32 = arith.constant 0 : i32
    %c0_i32_0 = arith.constant 0 : i32
    %c0_i32_1 = arith.constant 0 : i32
    return %c0_i32, %c0_i32_0 : i32, i32
  }
  func.func @transform_10(%arg0: i32) -> (i32, i32) {
    %c0_i32 = arith.constant 0 : i32
    %c0_i32_0 = arith.constant 0 : i32
    %c0_i32_1 = arith.constant 0 : i32
    return %c0_i32, %c0_i32_0 : i32, i32
  }
  func.func @transform_11(%arg0: i32) -> (i32, i32) {
    %c0_i32 = arith.constant 0 : i32
    %c0_i32_0 = arith.constant 0 : i32
    %c0_i32_1 = arith.constant 0 : i32
    return %c0_i32, %c0_i32_0 : i32, i32
  }
  func.func @transform_12(%arg0: i32) -> (i32, i32) {
    %c0_i32 = arith.constant 0 : i32
    %c0_i32_0 = arith.constant 0 : i32
    %c0_i32_1 = arith.constant 0 : i32
    return %c0_i32, %c0_i32_0 : i32, i32
  }
  func.func @transform_13(%arg0: i32) -> (i32, i32) {
    %c0_i32 = arith.constant 0 : i32
    %c0_i32_0 = arith.constant 0 : i32
    %c0_i32_1 = arith.constant 0 : i32
    return %c0_i32, %c0_i32_0 : i32, i32
  }
  func.func @transform_14(%arg0: i32) -> (i32, i32) {
    %c0_i32 = arith.constant 0 : i32
    %c0_i32_0 = arith.constant 0 : i32
    %c0_i32_1 = arith.constant 0 : i32
    return %c0_i32, %c0_i32_0 : i32, i32
  }
  func.func @transform_15(%arg0: i32) -> (i32, i32) {
    %c0_i32 = arith.constant 0 : i32
    %c0_i32_0 = arith.constant 0 : i32
    %c0_i32_1 = arith.constant 0 : i32
    return %c0_i32, %c0_i32_0 : i32, i32
  }
  func.func @transform_16(%arg0: i32) -> (i32, i32) {
    %c0_i32 = arith.constant 0 : i32
    %c0_i32_0 = arith.constant 0 : i32
    return %arg0, %c0_i32 : i32, i32
  }
  func.func @transform_17(%arg0: i32) -> (i32, i32) {
    %c0_i32 = arith.constant 0 : i32
    %c0_i32_0 = arith.constant 0 : i32
    %c0_i32_1 = arith.constant 0 : i32
    return %c0_i32, %c0_i32_0 : i32, i32
  }
}

module attributes {stable_mosaic.version = 11 : i64} {
  func.func @_readout_kernel(%arg0: memref<1x64xi32, #tpu.memory_space<vmem>>, %arg1: memref<64x128xbf16, #tpu.memory_space<vmem>>, %arg2: memref<8x512xbf16, #tpu.memory_space<vmem>>, %arg3: memref<128x512xbf16, #tpu.memory_space<vmem>>, %arg4: memref<128x512xbf16, #tpu.memory_space<vmem>>, %arg5: memref<128x512xbf16, #tpu.memory_space<vmem>>, %arg6: memref<1x512xf32, #tpu.memory_space<vmem>>, %arg7: memref<512x128xbf16, #tpu.memory_space<vmem>>, %arg8: memref<1x128xf32, #tpu.memory_space<vmem>>, %arg9: memref<128x128xbf16, #tpu.memory_space<vmem>>, %arg10: memref<128x128xbf16, #tpu.memory_space<vmem>>, %arg11: memref<128x128xbf16, #tpu.memory_space<vmem>>, %arg12: memref<1x128xf32, #tpu.memory_space<vmem>>, %arg13: memref<8x128xf32, #tpu.memory_space<vmem>>) attributes {dimension_semantics = [], scalar_prefetch = 0 : i64, scratch_operands = 0 : i64, tpu.core_type = #tpu.core_type<tc>} {
    %c0 = arith.constant 0 : index
    %c0_0 = arith.constant 0 : index
    %0 = vector.load %arg1[%c0, %c0_0] : memref<64x128xbf16, #tpu.memory_space<vmem>>, vector<64x128xbf16>
    %c0_1 = arith.constant 0 : index
    %c0_2 = arith.constant 0 : index
    %1 = vector.load %arg0[%c0_1, %c0_2] : memref<1x64xi32, #tpu.memory_space<vmem>>, vector<1x64xi32>
    %2 = tpu.iota {dimensions = array<i32: 0>} : vector<8x64xi32>
    %3 = vector.broadcast %1 : vector<1x64xi32> to vector<8x64xi32>
    %4 = arith.cmpi eq, %3, %2 : vector<8x64xi32>
    %5 = arith.extui %4 : vector<8x64xi1> to vector<8x64xi32>
    %6 = arith.sitofp %5 : vector<8x64xi32> to vector<8x64xf32>
    %cst = arith.constant 0.000000e+00 : f32
    %7 = vector.broadcast %cst : f32 to vector<8x128xf32>
    %cst_3 = arith.constant 0.000000e+00 : f32
    %8 = vector.broadcast %cst_3 : f32 to vector<8x128xf32>
    %cst_4 = arith.constant 0.000000e+00 : f32
    %9 = vector.broadcast %cst_4 : f32 to vector<8x128xf32>
    %cst_5 = arith.constant 0.000000e+00 : f32
    %10 = vector.broadcast %cst_5 : f32 to vector<8x128xf32>
    %11 = arith.truncf %7 : vector<8x128xf32> to vector<8x128xbf16>
    %c0_6 = arith.constant 0 : index
    %c0_7 = arith.constant 0 : index
    %12 = vector.load %arg3[%c0_6, %c0_7] : memref<128x512xbf16, #tpu.memory_space<vmem>>, vector<128x512xbf16>
    %cst_8 = arith.constant dense<0.000000e+00> : vector<8x512xf32>
    %13 = tpu.matmul %11, %12, %cst_8 {dimension_numbers = #tpu.dot_dimension_numbers<[1], [0], [0], [1], [0, 0, 1, 1], [], []>} : vector<8x128xbf16>, vector<128x512xbf16>, vector<8x512xf32> -> vector<8x512xf32>
    %14 = arith.truncf %8 : vector<8x128xf32> to vector<8x128xbf16>
    %c0_9 = arith.constant 0 : index
    %c0_10 = arith.constant 0 : index
    %15 = vector.load %arg4[%c0_9, %c0_10] : memref<128x512xbf16, #tpu.memory_space<vmem>>, vector<128x512xbf16>
    %cst_11 = arith.constant dense<0.000000e+00> : vector<8x512xf32>
    %16 = tpu.matmul %14, %15, %cst_11 {dimension_numbers = #tpu.dot_dimension_numbers<[1], [0], [0], [1], [0, 0, 1, 1], [], []>} : vector<8x128xbf16>, vector<128x512xbf16>, vector<8x512xf32> -> vector<8x512xf32>
    %17 = arith.addf %13, %16 : vector<8x512xf32>
    %18 = arith.truncf %9 : vector<8x128xf32> to vector<8x128xbf16>
    %c0_12 = arith.constant 0 : index
    %c0_13 = arith.constant 0 : index
    %19 = vector.load %arg5[%c0_12, %c0_13] : memref<128x512xbf16, #tpu.memory_space<vmem>>, vector<128x512xbf16>
    %cst_14 = arith.constant dense<0.000000e+00> : vector<8x512xf32>
    %20 = tpu.matmul %18, %19, %cst_14 {dimension_numbers = #tpu.dot_dimension_numbers<[1], [0], [0], [1], [0, 0, 1, 1], [], []>} : vector<8x128xbf16>, vector<128x512xbf16>, vector<8x512xf32> -> vector<8x512xf32>
    %21 = arith.addf %17, %20 : vector<8x512xf32>
    %c0_15 = arith.constant 0 : index
    %c0_16 = arith.constant 0 : index
    %22 = vector.load %arg6[%c0_15, %c0_16] : memref<1x512xf32, #tpu.memory_space<vmem>>, vector<1x512xf32>
    %23 = vector.broadcast %22 : vector<1x512xf32> to vector<8x512xf32>
    %24 = arith.addf %21, %23 : vector<8x512xf32>
    %25 = vector.extract_strided_slice %24 {offsets = [0, 0], sizes = [8, 128], strides = [1, 1]} : vector<8x512xf32> to vector<8x128xf32>
    %26 = arith.negf %25 : vector<8x128xf32>
    %27 = math.exp %26 : vector<8x128xf32>
    %cst_17 = arith.constant 1.000000e+00 : f32
    %28 = vector.broadcast %cst_17 : f32 to vector<8x128xf32>
    %29 = arith.addf %28, %27 : vector<8x128xf32>
    %30 = arith.divf %28, %29 : vector<8x128xf32>
    %31 = vector.extract_strided_slice %24 {offsets = [0, 128], sizes = [8, 128], strides = [1, 1]} : vector<8x512xf32> to vector<8x128xf32>
    %32 = arith.negf %31 : vector<8x128xf32>
    %33 = math.exp %32 : vector<8x128xf32>
    %cst_18 = arith.constant 1.000000e+00 : f32
    %34 = vector.broadcast %cst_18 : f32 to vector<8x128xf32>
    %35 = arith.addf %34, %33 : vector<8x128xf32>
    %36 = arith.divf %34, %35 : vector<8x128xf32>
    %37 = vector.extract_strided_slice %24 {offsets = [0, 256], sizes = [8, 128], strides = [1, 1]} : vector<8x512xf32> to vector<8x128xf32>
    %38 = math.tanh %37 : vector<8x128xf32>
    %39 = vector.extract_strided_slice %24 {offsets = [0, 384], sizes = [8, 128], strides = [1, 1]} : vector<8x512xf32> to vector<8x128xf32>
    %40 = arith.negf %39 : vector<8x128xf32>
    %41 = math.exp %40 : vector<8x128xf32>
    %cst_19 = arith.constant 1.000000e+00 : f32
    %42 = vector.broadcast %cst_19 : f32 to vector<8x128xf32>
    %43 = arith.addf %42, %41 : vector<8x128xf32>
    %44 = arith.divf %42, %43 : vector<8x128xf32>
    %45 = arith.mulf %36, %10 : vector<8x128xf32>
    %46 = arith.mulf %30, %38 : vector<8x128xf32>
    %47 = arith.addf %45, %46 : vector<8x128xf32>
    %48 = math.tanh %47 : vector<8x128xf32>
    %49 = arith.mulf %44, %48 : vector<8x128xf32>
    %50 = arith.truncf %49 : vector<8x128xf32> to vector<8x128xbf16>
    %cst_20 = arith.constant dense<0.000000e+00> : vector<8x64xf32>
    %51 = tpu.matmul %50, %0, %cst_20 {dimension_numbers = #tpu.dot_dimension_numbers<[1], [1], [0], [0], [0, 0, 1, 0], [], []>} : vector<8x128xbf16>, vector<64x128xbf16>, vector<8x64xf32> -> vector<8x64xf32>
    %cst_21 = arith.constant -1.000000e+30 : f32
    %52 = vector.broadcast %cst_21 : f32 to vector<8x64xf32>
    %53 = arith.select %4, %51, %52 : vector<8x64xi1>, vector<8x64xf32>
    %cst_22 = arith.constant dense<0xFF800000> : vector<8xf32>
    %54 = vector.multi_reduction <maximumf>, %53, %cst_22 [1] : vector<8x64xf32> to vector<8xf32>
    %55 = vector.shape_cast %54 : vector<8xf32> to vector<8x1xf32>
    %56 = vector.broadcast %55 : vector<8x1xf32> to vector<8x64xf32>
    %57 = arith.subf %53, %56 : vector<8x64xf32>
    %58 = math.exp %57 : vector<8x64xf32>
    %59 = arith.mulf %58, %6 : vector<8x64xf32>
    %cst_23 = arith.constant dense<0.000000e+00> : vector<8xf32>
    %60 = vector.multi_reduction <add>, %59, %cst_23 [1] : vector<8x64xf32> to vector<8xf32>
    %61 = vector.shape_cast %60 : vector<8xf32> to vector<8x1xf32>
    %62 = arith.truncf %59 : vector<8x64xf32> to vector<8x64xbf16>
    %cst_24 = arith.constant dense<0.000000e+00> : vector<8x128xf32>
    %63 = tpu.matmul %62, %0, %cst_24 {dimension_numbers = #tpu.dot_dimension_numbers<[1], [0], [0], [1], [0, 0, 1, 1], [], []>} : vector<8x64xbf16>, vector<64x128xbf16>, vector<8x128xf32> -> vector<8x128xf32>
    %cst_25 = arith.constant 9.99999968E-21 : f32
    %64 = vector.broadcast %cst_25 : f32 to vector<8x1xf32>
    %65 = arith.maximumf %61, %64 : vector<8x1xf32>
    %66 = vector.broadcast %65 : vector<8x1xf32> to vector<8x128xf32>
    %67 = arith.divf %63, %66 : vector<8x128xf32>
    %68 = arith.truncf %49 : vector<8x128xf32> to vector<8x128xbf16>
    %c0_26 = arith.constant 0 : index
    %c0_27 = arith.constant 0 : index
    %69 = vector.load %arg3[%c0_26, %c0_27] : memref<128x512xbf16, #tpu.memory_space<vmem>>, vector<128x512xbf16>
    %cst_28 = arith.constant dense<0.000000e+00> : vector<8x512xf32>
    %70 = tpu.matmul %68, %69, %cst_28 {dimension_numbers = #tpu.dot_dimension_numbers<[1], [0], [0], [1], [0, 0, 1, 1], [], []>} : vector<8x128xbf16>, vector<128x512xbf16>, vector<8x512xf32> -> vector<8x512xf32>
    %71 = arith.truncf %67 : vector<8x128xf32> to vector<8x128xbf16>
    %c0_29 = arith.constant 0 : index
    %c0_30 = arith.constant 0 : index
    %72 = vector.load %arg4[%c0_29, %c0_30] : memref<128x512xbf16, #tpu.memory_space<vmem>>, vector<128x512xbf16>
    %cst_31 = arith.constant dense<0.000000e+00> : vector<8x512xf32>
    %73 = tpu.matmul %71, %72, %cst_31 {dimension_numbers = #tpu.dot_dimension_numbers<[1], [0], [0], [1], [0, 0, 1, 1], [], []>} : vector<8x128xbf16>, vector<128x512xbf16>, vector<8x512xf32> -> vector<8x512xf32>
    %74 = arith.addf %70, %73 : vector<8x512xf32>
    %75 = arith.truncf %49 : vector<8x128xf32> to vector<8x128xbf16>
    %c0_32 = arith.constant 0 : index
    %c0_33 = arith.constant 0 : index
    %76 = vector.load %arg5[%c0_32, %c0_33] : memref<128x512xbf16, #tpu.memory_space<vmem>>, vector<128x512xbf16>
    %cst_34 = arith.constant dense<0.000000e+00> : vector<8x512xf32>
    %77 = tpu.matmul %75, %76, %cst_34 {dimension_numbers = #tpu.dot_dimension_numbers<[1], [0], [0], [1], [0, 0, 1, 1], [], []>} : vector<8x128xbf16>, vector<128x512xbf16>, vector<8x512xf32> -> vector<8x512xf32>
    %78 = arith.addf %74, %77 : vector<8x512xf32>
    %c0_35 = arith.constant 0 : index
    %c0_36 = arith.constant 0 : index
    %79 = vector.load %arg6[%c0_35, %c0_36] : memref<1x512xf32, #tpu.memory_space<vmem>>, vector<1x512xf32>
    %80 = vector.broadcast %79 : vector<1x512xf32> to vector<8x512xf32>
    %81 = arith.addf %78, %80 : vector<8x512xf32>
    %82 = vector.extract_strided_slice %81 {offsets = [0, 0], sizes = [8, 128], strides = [1, 1]} : vector<8x512xf32> to vector<8x128xf32>
    %83 = arith.negf %82 : vector<8x128xf32>
    %84 = math.exp %83 : vector<8x128xf32>
    %cst_37 = arith.constant 1.000000e+00 : f32
    %85 = vector.broadcast %cst_37 : f32 to vector<8x128xf32>
    %86 = arith.addf %85, %84 : vector<8x128xf32>
    %87 = arith.divf %85, %86 : vector<8x128xf32>
    %88 = vector.extract_strided_slice %81 {offsets = [0, 128], sizes = [8, 128], strides = [1, 1]} : vector<8x512xf32> to vector<8x128xf32>
    %89 = arith.negf %88 : vector<8x128xf32>
    %90 = math.exp %89 : vector<8x128xf32>
    %cst_38 = arith.constant 1.000000e+00 : f32
    %91 = vector.broadcast %cst_38 : f32 to vector<8x128xf32>
    %92 = arith.addf %91, %90 : vector<8x128xf32>
    %93 = arith.divf %91, %92 : vector<8x128xf32>
    %94 = vector.extract_strided_slice %81 {offsets = [0, 256], sizes = [8, 128], strides = [1, 1]} : vector<8x512xf32> to vector<8x128xf32>
    %95 = math.tanh %94 : vector<8x128xf32>
    %96 = vector.extract_strided_slice %81 {offsets = [0, 384], sizes = [8, 128], strides = [1, 1]} : vector<8x512xf32> to vector<8x128xf32>
    %97 = arith.negf %96 : vector<8x128xf32>
    %98 = math.exp %97 : vector<8x128xf32>
    %cst_39 = arith.constant 1.000000e+00 : f32
    %99 = vector.broadcast %cst_39 : f32 to vector<8x128xf32>
    %100 = arith.addf %99, %98 : vector<8x128xf32>
    %101 = arith.divf %99, %100 : vector<8x128xf32>
    %102 = arith.mulf %93, %47 : vector<8x128xf32>
    %103 = arith.mulf %87, %95 : vector<8x128xf32>
    %104 = arith.addf %102, %103 : vector<8x128xf32>
    %105 = math.tanh %104 : vector<8x128xf32>
    %106 = arith.mulf %101, %105 : vector<8x128xf32>
    %107 = arith.truncf %106 : vector<8x128xf32> to vector<8x128xbf16>
    %cst_40 = arith.constant dense<0.000000e+00> : vector<8x64xf32>
    %108 = tpu.matmul %107, %0, %cst_40 {dimension_numbers = #tpu.dot_dimension_numbers<[1], [1], [0], [0], [0, 0, 1, 0], [], []>} : vector<8x128xbf16>, vector<64x128xbf16>, vector<8x64xf32> -> vector<8x64xf32>
    %cst_41 = arith.constant -1.000000e+30 : f32
    %109 = vector.broadcast %cst_41 : f32 to vector<8x64xf32>
    %110 = arith.select %4, %108, %109 : vector<8x64xi1>, vector<8x64xf32>
    %cst_42 = arith.constant dense<0xFF800000> : vector<8xf32>
    %111 = vector.multi_reduction <maximumf>, %110, %cst_42 [1] : vector<8x64xf32> to vector<8xf32>
    %112 = vector.shape_cast %111 : vector<8xf32> to vector<8x1xf32>
    %113 = vector.broadcast %112 : vector<8x1xf32> to vector<8x64xf32>
    %114 = arith.subf %110, %113 : vector<8x64xf32>
    %115 = math.exp %114 : vector<8x64xf32>
    %116 = arith.mulf %115, %6 : vector<8x64xf32>
    %cst_43 = arith.constant dense<0.000000e+00> : vector<8xf32>
    %117 = vector.multi_reduction <add>, %116, %cst_43 [1] : vector<8x64xf32> to vector<8xf32>
    %118 = vector.shape_cast %117 : vector<8xf32> to vector<8x1xf32>
    %119 = arith.truncf %116 : vector<8x64xf32> to vector<8x64xbf16>
    %cst_44 = arith.constant dense<0.000000e+00> : vector<8x128xf32>
    %120 = tpu.matmul %119, %0, %cst_44 {dimension_numbers = #tpu.dot_dimension_numbers<[1], [0], [0], [1], [0, 0, 1, 1], [], []>} : vector<8x64xbf16>, vector<64x128xbf16>, vector<8x128xf32> -> vector<8x128xf32>
    %cst_45 = arith.constant 9.99999968E-21 : f32
    %121 = vector.broadcast %cst_45 : f32 to vector<8x1xf32>
    %122 = arith.maximumf %118, %121 : vector<8x1xf32>
    %123 = vector.broadcast %122 : vector<8x1xf32> to vector<8x128xf32>
    %124 = arith.divf %120, %123 : vector<8x128xf32>
    %125 = arith.truncf %106 : vector<8x128xf32> to vector<8x128xbf16>
    %c0_46 = arith.constant 0 : index
    %c0_47 = arith.constant 0 : index
    %126 = vector.load %arg3[%c0_46, %c0_47] : memref<128x512xbf16, #tpu.memory_space<vmem>>, vector<128x512xbf16>
    %cst_48 = arith.constant dense<0.000000e+00> : vector<8x512xf32>
    %127 = tpu.matmul %125, %126, %cst_48 {dimension_numbers = #tpu.dot_dimension_numbers<[1], [0], [0], [1], [0, 0, 1, 1], [], []>} : vector<8x128xbf16>, vector<128x512xbf16>, vector<8x512xf32> -> vector<8x512xf32>
    %128 = arith.truncf %124 : vector<8x128xf32> to vector<8x128xbf16>
    %c0_49 = arith.constant 0 : index
    %c0_50 = arith.constant 0 : index
    %129 = vector.load %arg4[%c0_49, %c0_50] : memref<128x512xbf16, #tpu.memory_space<vmem>>, vector<128x512xbf16>
    %cst_51 = arith.constant dense<0.000000e+00> : vector<8x512xf32>
    %130 = tpu.matmul %128, %129, %cst_51 {dimension_numbers = #tpu.dot_dimension_numbers<[1], [0], [0], [1], [0, 0, 1, 1], [], []>} : vector<8x128xbf16>, vector<128x512xbf16>, vector<8x512xf32> -> vector<8x512xf32>
    %131 = arith.addf %127, %130 : vector<8x512xf32>
    %132 = arith.truncf %106 : vector<8x128xf32> to vector<8x128xbf16>
    %c0_52 = arith.constant 0 : index
    %c0_53 = arith.constant 0 : index
    %133 = vector.load %arg5[%c0_52, %c0_53] : memref<128x512xbf16, #tpu.memory_space<vmem>>, vector<128x512xbf16>
    %cst_54 = arith.constant dense<0.000000e+00> : vector<8x512xf32>
    %134 = tpu.matmul %132, %133, %cst_54 {dimension_numbers = #tpu.dot_dimension_numbers<[1], [0], [0], [1], [0, 0, 1, 1], [], []>} : vector<8x128xbf16>, vector<128x512xbf16>, vector<8x512xf32> -> vector<8x512xf32>
    %135 = arith.addf %131, %134 : vector<8x512xf32>
    %c0_55 = arith.constant 0 : index
    %c0_56 = arith.constant 0 : index
    %136 = vector.load %arg6[%c0_55, %c0_56] : memref<1x512xf32, #tpu.memory_space<vmem>>, vector<1x512xf32>
    %137 = vector.broadcast %136 : vector<1x512xf32> to vector<8x512xf32>
    %138 = arith.addf %135, %137 : vector<8x512xf32>
    %139 = vector.extract_strided_slice %138 {offsets = [0, 0], sizes = [8, 128], strides = [1, 1]} : vector<8x512xf32> to vector<8x128xf32>
    %140 = arith.negf %139 : vector<8x128xf32>
    %141 = math.exp %140 : vector<8x128xf32>
    %cst_57 = arith.constant 1.000000e+00 : f32
    %142 = vector.broadcast %cst_57 : f32 to vector<8x128xf32>
    %143 = arith.addf %142, %141 : vector<8x128xf32>
    %144 = arith.divf %142, %143 : vector<8x128xf32>
    %145 = vector.extract_strided_slice %138 {offsets = [0, 128], sizes = [8, 128], strides = [1, 1]} : vector<8x512xf32> to vector<8x128xf32>
    %146 = arith.negf %145 : vector<8x128xf32>
    %147 = math.exp %146 : vector<8x128xf32>
    %cst_58 = arith.constant 1.000000e+00 : f32
    %148 = vector.broadcast %cst_58 : f32 to vector<8x128xf32>
    %149 = arith.addf %148, %147 : vector<8x128xf32>
    %150 = arith.divf %148, %149 : vector<8x128xf32>
    %151 = vector.extract_strided_slice %138 {offsets = [0, 256], sizes = [8, 128], strides = [1, 1]} : vector<8x512xf32> to vector<8x128xf32>
    %152 = math.tanh %151 : vector<8x128xf32>
    %153 = vector.extract_strided_slice %138 {offsets = [0, 384], sizes = [8, 128], strides = [1, 1]} : vector<8x512xf32> to vector<8x128xf32>
    %154 = arith.negf %153 : vector<8x128xf32>
    %155 = math.exp %154 : vector<8x128xf32>
    %cst_59 = arith.constant 1.000000e+00 : f32
    %156 = vector.broadcast %cst_59 : f32 to vector<8x128xf32>
    %157 = arith.addf %156, %155 : vector<8x128xf32>
    %158 = arith.divf %156, %157 : vector<8x128xf32>
    %159 = arith.mulf %150, %104 : vector<8x128xf32>
    %160 = arith.mulf %144, %152 : vector<8x128xf32>
    %161 = arith.addf %159, %160 : vector<8x128xf32>
    %162 = math.tanh %161 : vector<8x128xf32>
    %163 = arith.mulf %158, %162 : vector<8x128xf32>
    %164 = arith.truncf %163 : vector<8x128xf32> to vector<8x128xbf16>
    %cst_60 = arith.constant dense<0.000000e+00> : vector<8x64xf32>
    %165 = tpu.matmul %164, %0, %cst_60 {dimension_numbers = #tpu.dot_dimension_numbers<[1], [1], [0], [0], [0, 0, 1, 0], [], []>} : vector<8x128xbf16>, vector<64x128xbf16>, vector<8x64xf32> -> vector<8x64xf32>
    %cst_61 = arith.constant -1.000000e+30 : f32
    %166 = vector.broadcast %cst_61 : f32 to vector<8x64xf32>
    %167 = arith.select %4, %165, %166 : vector<8x64xi1>, vector<8x64xf32>
    %cst_62 = arith.constant dense<0xFF800000> : vector<8xf32>
    %168 = vector.multi_reduction <maximumf>, %167, %cst_62 [1] : vector<8x64xf32> to vector<8xf32>
    %169 = vector.shape_cast %168 : vector<8xf32> to vector<8x1xf32>
    %170 = vector.broadcast %169 : vector<8x1xf32> to vector<8x64xf32>
    %171 = arith.subf %167, %170 : vector<8x64xf32>
    %172 = math.exp %171 : vector<8x64xf32>
    %173 = arith.mulf %172, %6 : vector<8x64xf32>
    %cst_63 = arith.constant dense<0.000000e+00> : vector<8xf32>
    %174 = vector.multi_reduction <add>, %173, %cst_63 [1] : vector<8x64xf32> to vector<8xf32>
    %175 = vector.shape_cast %174 : vector<8xf32> to vector<8x1xf32>
    %176 = arith.truncf %173 : vector<8x64xf32> to vector<8x64xbf16>
    %cst_64 = arith.constant dense<0.000000e+00> : vector<8x128xf32>
    %177 = tpu.matmul %176, %0, %cst_64 {dimension_numbers = #tpu.dot_dimension_numbers<[1], [0], [0], [1], [0, 0, 1, 1], [], []>} : vector<8x64xbf16>, vector<64x128xbf16>, vector<8x128xf32> -> vector<8x128xf32>
    %cst_65 = arith.constant 9.99999968E-21 : f32
    %178 = vector.broadcast %cst_65 : f32 to vector<8x1xf32>
    %179 = arith.maximumf %175, %178 : vector<8x1xf32>
    %180 = vector.broadcast %179 : vector<8x1xf32> to vector<8x128xf32>
    %181 = arith.divf %177, %180 : vector<8x128xf32>
    %c0_66 = arith.constant 0 : index
    %c0_67 = arith.constant 0 : index
    %182 = vector.load %arg2[%c0_66, %c0_67] : memref<8x512xbf16, #tpu.memory_space<vmem>>, vector<8x512xbf16>
    %c0_68 = arith.constant 0 : index
    %c0_69 = arith.constant 0 : index
    %183 = vector.load %arg7[%c0_68, %c0_69] : memref<512x128xbf16, #tpu.memory_space<vmem>>, vector<512x128xbf16>
    %cst_70 = arith.constant dense<0.000000e+00> : vector<8x128xf32>
    %184 = tpu.matmul %182, %183, %cst_70 {dimension_numbers = #tpu.dot_dimension_numbers<[1], [0], [0], [1], [0, 0, 1, 1], [], []>} : vector<8x512xbf16>, vector<512x128xbf16>, vector<8x128xf32> -> vector<8x128xf32>
    %c0_71 = arith.constant 0 : index
    %c0_72 = arith.constant 0 : index
    %185 = vector.load %arg8[%c0_71, %c0_72] : memref<1x128xf32, #tpu.memory_space<vmem>>, vector<1x128xf32>
    %186 = vector.broadcast %185 : vector<1x128xf32> to vector<8x128xf32>
    %187 = arith.addf %184, %186 : vector<8x128xf32>
    %188 = arith.truncf %163 : vector<8x128xf32> to vector<8x128xbf16>
    %c0_73 = arith.constant 0 : index
    %c0_74 = arith.constant 0 : index
    %189 = vector.load %arg9[%c0_73, %c0_74] : memref<128x128xbf16, #tpu.memory_space<vmem>>, vector<128x128xbf16>
    %cst_75 = arith.constant dense<0.000000e+00> : vector<8x128xf32>
    %190 = tpu.matmul %188, %189, %cst_75 {dimension_numbers = #tpu.dot_dimension_numbers<[1], [0], [0], [1], [0, 0, 1, 1], [], []>} : vector<8x128xbf16>, vector<128x128xbf16>, vector<8x128xf32> -> vector<8x128xf32>
    %191 = arith.truncf %181 : vector<8x128xf32> to vector<8x128xbf16>
    %c0_76 = arith.constant 0 : index
    %c0_77 = arith.constant 0 : index
    %192 = vector.load %arg10[%c0_76, %c0_77] : memref<128x128xbf16, #tpu.memory_space<vmem>>, vector<128x128xbf16>
    %cst_78 = arith.constant dense<0.000000e+00> : vector<8x128xf32>
    %193 = tpu.matmul %191, %192, %cst_78 {dimension_numbers = #tpu.dot_dimension_numbers<[1], [0], [0], [1], [0, 0, 1, 1], [], []>} : vector<8x128xbf16>, vector<128x128xbf16>, vector<8x128xf32> -> vector<8x128xf32>
    %194 = arith.addf %190, %193 : vector<8x128xf32>
    %195 = arith.truncf %187 : vector<8x128xf32> to vector<8x128xbf16>
    %c0_79 = arith.constant 0 : index
    %c0_80 = arith.constant 0 : index
    %196 = vector.load %arg11[%c0_79, %c0_80] : memref<128x128xbf16, #tpu.memory_space<vmem>>, vector<128x128xbf16>
    %cst_81 = arith.constant dense<0.000000e+00> : vector<8x128xf32>
    %197 = tpu.matmul %195, %196, %cst_81 {dimension_numbers = #tpu.dot_dimension_numbers<[1], [0], [0], [1], [0, 0, 1, 1], [], []>} : vector<8x128xbf16>, vector<128x128xbf16>, vector<8x128xf32> -> vector<8x128xf32>
    %198 = arith.addf %194, %197 : vector<8x128xf32>
    %c0_82 = arith.constant 0 : index
    %c0_83 = arith.constant 0 : index
    %199 = vector.load %arg12[%c0_82, %c0_83] : memref<1x128xf32, #tpu.memory_space<vmem>>, vector<1x128xf32>
    %200 = vector.broadcast %199 : vector<1x128xf32> to vector<8x128xf32>
    %201 = arith.addf %198, %200 : vector<8x128xf32>
    %c0_84 = arith.constant 0 : index
    %c0_85 = arith.constant 0 : index
    %202 = vector.load %arg13[%c0_84, %c0_85] : memref<8x128xf32, #tpu.memory_space<vmem>>, vector<8x128xf32>
    tpu.vector_store %arg13[%c0_84, %c0_85], %201 {strides = array<i32>} : memref<8x128xf32, #tpu.memory_space<vmem>>, vector<8x128xf32>,
    return
  }
}

</mosaic_0001>

<bundles_post_ra>
// kernel: ligandnet_forward.17
= control target key start
LH: loop header
LB: loop body
LE: loop exit
PB: predicated region body
PF: predicated region fallthrough
CT: control target
= control target key end

     0   :  { %vm64_vm0 = vcmask 1042432   ;;  %vm51_vm1 = vcmask 48128   ;;  %s298_s1 = inlined_call_operand.vmem [shape: bf16[6,128], index: 1, kind: input, shape index: {}]   ;;  %s299_s0 = inlined_call_operand.vmem [shape: bf16[64,6], index: 0, kind: input, shape index: {}]   ;;  %s300_s2 = inlined_call_operand.vmem [shape: f32[1,128], index: 2, kind: input, shape index: {}]   ;;  %s301_s3 = inlined_call_operand.vmem [shape: bf16[64,128], index: 3, kind: output, shape index: {}]  }
   0x1   :  { %v23_v0 = vld [vmem:[%s298_s1] sm:$0x7]  ;;  %v245_v3 = vld [vmem:[%s299_s0 + $0x10] sm:$0xff]   ;;  %v246_v4 = vld [vmem:[%s299_s0 + $0x8] sm:$0xff]  }
   0x2   :  { %242 = vmatprep.subr.msk.bf16.mxu0 %vm64_vm0, %v23_v0  ;;  %243 = vmatprep.subr.msk.bf16.mxu1 %vm64_vm0, %v23_v0  ;;  %v66_v1 = vsel %vm64_vm0, %v23_v0, 0  ;;  %v244_v2 = vld [vmem:[%s299_s0] sm:$0xff]   ;;  %v247_v5 = vld [vmem:[%s299_s0 + $0x18] sm:$0xff]  }
   0x3   :  { %231 = vmatpush3.bf16.msra.mxu0 %v66_v1  ;;  %241 = vmatpush3.bf16.msra.mxu1 %v66_v1  ;;  %v177_v7 = vld [vmem:[%s300_s2] ss:$0 sm:$0xff] }
   0x4   :  { %232 = vmatprep.mubr.msk.bf16.mxu0 %vm51_vm1, %v244_v2  ;;  %236 = vmatprep.mubr.msk.bf16.mxu1 %vm51_vm1, %v245_v3 }
   0x6   :  { %233 = vmatmul.mubr.msk.bf16.vlgmr.msra.gmra.mrb[0].mxu0 %vm51_vm1, %v246_v4  ;;  %237 = vmatmul.mubr.msk.bf16.vlgmr.msra.gmra.mrb[0].mxu1 %vm51_vm1, %v247_v5 }
  0xd9   :  { %v234_v6 = vpop.f32.mrb[0].mxu0  ;;  %v238_v8 = vpop.f32.mrb[0].mxu1 }
  0xda   :  { %v102_v9 = vpop.f32.mrb[1].mxu0  ;;  %v118_v10 = vpop.f32.mrb[1].mxu1  ;;  %v111_v12 = vadd.f32 %v234_v6, %v177_v7  ;;  %v127_v16 = vadd.f32 %v238_v8, %v177_v7 }
  0xdb   :  { %v235_v11 = vpop.f32.mrb[2].mxu0  ;;  %v239_v14 = vpop.f32.mrb[2].mxu1  ;;  %v103_v17 = vadd.f32 %v177_v7, %v102_v9  ;;  %v119_v21 = vadd.f32 %v177_v7, %v118_v10 }
  0xdc   :  { %v114_v13 = vadd.f32 %v235_v11, %v177_v7  ;;  %v105_v15 = vpop.f32.mrb[3].mxu0  ;;  %v130_v18 = vadd.f32 %v239_v14, %v177_v7  ;;  %v121_v20 = vpop.f32.mrb[3].mxu1 }
  0xdd   :  { %v106_v19 = vadd.f32 %v177_v7, %v105_v15  ;;  %v122_v23 = vadd.f32 %v177_v7, %v121_v20 }
  0xde   :  { %v210_v22 = vpack.c.bf16 %v114_v13, %v111_v12  ;;  %v220_v24 = vpack.c.bf16 %v130_v18, %v127_v16 }
  0xdf   :  { %v205_v25 = vpack.c.bf16 %v106_v19, %v103_v17  ;;  %v215_v26 = vpack.c.bf16 %v122_v23, %v119_v21 }
  0xe0   :  { %222 = vst [vmem:[%s301_s3 + $0x8] sm:$0xff] %v210_v22   ;;  %224 = vst [vmem:[%s301_s3 + $0x18] sm:$0xff] %v220_v24  }
  0xe1   :  { %206 = vst [vmem:[%s301_s3] sm:$0xff] %v205_v25   ;;  %223 = vst [vmem:[%s301_s3 + $0x10] sm:$0xff] %v215_v26  }

// kernel: ligandnet_forward.16
= control target key start
LH: loop header
LB: loop body
LE: loop exit
PB: predicated region body
PF: predicated region fallthrough
CT: control target
= control target key end

     0   :  { %vm64_vm0 = vcmask 1043456   ;;  %vm51_vm1 = vcmask 64512   ;;  %s298_s1 = inlined_call_operand.vmem [shape: bf16[8,128], index: 1, kind: input, shape index: {}]   ;;  %s299_s0 = inlined_call_operand.vmem [shape: bf16[64,8], index: 0, kind: input, shape index: {}]   ;;  %s300_s2 = inlined_call_operand.vmem [shape: f32[1,128], index: 2, kind: input, shape index: {}]   ;;  %s301_s3 = inlined_call_operand.vmem [shape: bf16[64,128], index: 3, kind: output, shape index: {}]  }
   0x1   :  { %v23_v0 = vld [vmem:[%s298_s1] sm:$0xf]  ;;  %v245_v3 = vld [vmem:[%s299_s0 + $0x10] sm:$0xff]   ;;  %v246_v4 = vld [vmem:[%s299_s0 + $0x8] sm:$0xff]  }
   0x2   :  { %242 = vmatprep.subr.msk.bf16.mxu0 %vm64_vm0, %v23_v0  ;;  %243 = vmatprep.subr.msk.bf16.mxu1 %vm64_vm0, %v23_v0  ;;  %v66_v1 = vsel %vm64_vm0, %v23_v0, 0  ;;  %v244_v2 = vld [vmem:[%s299_s0] sm:$0xff]   ;;  %v247_v5 = vld [vmem:[%s299_s0 + $0x18] sm:$0xff]  }
   0x3   :  { %231 = vmatpush3.bf16.msra.mxu0 %v66_v1  ;;  %241 = vmatpush3.bf16.msra.mxu1 %v66_v1  ;;  %v177_v7 = vld [vmem:[%s300_s2] ss:$0 sm:$0xff] }
   0x4   :  { %232 = vmatprep.mubr.msk.bf16.mxu0 %vm51_vm1, %v244_v2  ;;  %236 = vmatprep.mubr.msk.bf16.mxu1 %vm51_vm1, %v245_v3 }
   0x6   :  { %233 = vmatmul.mubr.msk.bf16.vlgmr.msra.gmra.mrb[0].mxu0 %vm51_vm1, %v246_v4  ;;  %237 = vmatmul.mubr.msk.bf16.vlgmr.msra.gmra.mrb[0].mxu1 %vm51_vm1, %v247_v5 }
  0xd9   :  { %v234_v6 = vpop.f32.mrb[0].mxu0  ;;  %v238_v8 = vpop.f32.mrb[0].mxu1 }
  0xda   :  { %v102_v9 = vpop.f32.mrb[1].mxu0  ;;  %v118_v10 = vpop.f32.mrb[1].mxu1  ;;  %v111_v12 = vadd.f32 %v234_v6, %v177_v7  ;;  %v127_v16 = vadd.f32 %v238_v8, %v177_v7 }
  0xdb   :  { %v235_v11 = vpop.f32.mrb[2].mxu0  ;;  %v239_v14 = vpop.f32.mrb[2].mxu1  ;;  %v103_v17 = vadd.f32 %v177_v7, %v102_v9  ;;  %v119_v21 = vadd.f32 %v177_v7, %v118_v10 }
  0xdc   :  { %v114_v13 = vadd.f32 %v235_v11, %v177_v7  ;;  %v105_v15 = vpop.f32.mrb[3].mxu0  ;;  %v130_v18 = vadd.f32 %v239_v14, %v177_v7  ;;  %v121_v20 = vpop.f32.mrb[3].mxu1 }
  0xdd   :  { %v106_v19 = vadd.f32 %v177_v7, %v105_v15  ;;  %v122_v23 = vadd.f32 %v177_v7, %v121_v20 }
  0xde   :  { %v210_v22 = vpack.c.bf16 %v114_v13, %v111_v12  ;;  %v220_v24 = vpack.c.bf16 %v130_v18, %v127_v16 }
  0xdf   :  { %v205_v25 = vpack.c.bf16 %v106_v19, %v103_v17  ;;  %v215_v26 = vpack.c.bf16 %v122_v23, %v119_v21 }
  0xe0   :  { %222 = vst [vmem:[%s301_s3 + $0x8] sm:$0xff] %v210_v22   ;;  %224 = vst [vmem:[%s301_s3 + $0x18] sm:$0xff] %v220_v24  }
  0xe1   :  { %206 = vst [vmem:[%s301_s3] sm:$0xff] %v205_v25   ;;  %223 = vst [vmem:[%s301_s3 + $0x10] sm:$0xff] %v215_v26  }

// kernel: ligandnet_forward.25
= control target key start
LH: loop header
LB: loop body
LE: loop exit
PB: predicated region body
PF: predicated region fallthrough
CT: control target
= control target key end

     0   :  { %s564_s1 = inlined_call_operand.vmem [shape: bf16[128,128], index: 1, kind: input, shape index: {}]   ;;  %s565_s0 = inlined_call_operand.vmem [shape: bf16[64,128], index: 0, kind: input, shape index: {}]   ;;  %s566_s3 = inlined_call_operand.vmem [shape: bf16[64,128], index: 3, kind: input, shape index: {}]   ;;  %s567_s2 = inlined_call_operand.vmem [shape: f32[1,128], index: 2, kind: input, shape index: {}]   ;;  %s568_s4 = inlined_call_operand.vmem [shape: bf16[64,128], index: 4, kind: output, shape index: {}]  }
   0x1   :  { %v433_v0 = vld [vmem:[%s564_s1] sm:$0xff]   ;;  %v434_v1 = vld [vmem:[%s564_s1 + $0x8] sm:$0xff]   ;;  %v435_v2 = vld [vmem:[%s564_s1 + $0x10] sm:$0xff]  }
   0x2   :  { %393 = vmatprep.subr.bf16.mxu0 %v433_v0  ;;  %417 = vmatprep.subr.bf16.mxu1 %v433_v0  ;;  %v436_v3 = vld [vmem:[%s564_s1 + $0x18] sm:$0xff]   ;;  %v441_v4 = vld [vmem:[%s565_s0] sm:$0xff]   ;;  %v442_v5 = vld [vmem:[%s565_s0 + $0x10] sm:$0xff]  }
   0x3   :  { %394 = vmatpush3.bf16.msra.mxu0 %v433_v0  ;;  %425 = vmatpush3.bf16.msra.mxu1 %v433_v0  ;;  %v437_v6 = vld [vmem:[%s564_s1 + $0x20] sm:$0xff]   ;;  %v438_v7 = vld [vmem:[%s564_s1 + $0x28] sm:$0xff]   ;;  %v439_v8 = vld [vmem:[%s564_s1 + $0x30] sm:$0xff]  }
   0x4   :  { %395 = vmatprep.subr.bf16.mxu0 %v434_v1  ;;  %418 = vmatprep.subr.bf16.mxu1 %v434_v1  ;;  %v440_v9 = vld [vmem:[%s564_s1 + $0x38] sm:$0xff]   ;;  %v443_v10 = vld [vmem:[%s565_s0 + $0x8] sm:$0xff]   ;;  %v340_v14 = vld [vmem:[%s566_s3] sm:$0xff]  }
   0x5   :  { %409 = vmatprep.mubr.bf16.mxu0 %v441_v4  ;;  %413 = vmatprep.mubr.bf16.mxu1 %v442_v5  ;;  %v444_v11 = vld [vmem:[%s565_s0 + $0x18] sm:$0xff]   ;;  %v375_v12 = vld [vmem:[%s566_s3 + $0x8] sm:$0xff]   ;;  %v376_v15 = vld [vmem:[%s566_s3 + $0x10] sm:$0xff]   ;;  %v341_v21 = vunpack.c.l.bf16 %v340_v14  ;;  %v342_v33 = vunpack.c.h.bf16 %v340_v14 }
   0x6   :  { %v377_v13 = vld [vmem:[%s566_s3 + $0x18] sm:$0xff]   ;;  %v302_v16 = vld [vmem:[%s567_s2] ss:$0 sm:$0xff]  ;;  %v345_v17 = vunpack.c.l.bf16 %v375_v12  ;;  %v349_v22 = vunpack.c.l.bf16 %v376_v15  ;;  %v346_v27 = vunpack.c.h.bf16 %v375_v12  ;;  %v350_v34 = vunpack.c.h.bf16 %v376_v15 }
   0x7   :  { %396 = vmatpush3.bf16.msra.mxu0 %v434_v1  ;;  %426 = vmatpush3.bf16.msra.mxu1 %v434_v1  ;;  %v353_v18 = vunpack.c.l.bf16 %v377_v13  ;;  %v354_v28 = vunpack.c.h.bf16 %v377_v13 }
   0x8   :  { %397 = vmatprep.subr.bf16.mxu0 %v435_v2  ;;  %419 = vmatprep.subr.bf16.mxu1 %v435_v2 }
   0xb   :  { %398 = vmatpush3.bf16.msra.mxu0 %v435_v2  ;;  %427 = vmatpush3.bf16.msra.mxu1 %v435_v2 }
   0xc   :  { %399 = vmatprep.subr.bf16.mxu0 %v436_v3  ;;  %420 = vmatprep.subr.bf16.mxu1 %v436_v3 }
   0xf   :  { %400 = vmatpush3.bf16.msra.mxu0 %v436_v3  ;;  %428 = vmatpush3.bf16.msra.mxu1 %v436_v3 }
  0x10   :  { %401 = vmatprep.subr.bf16.mxu0 %v437_v6  ;;  %421 = vmatprep.subr.bf16.mxu1 %v437_v6 }
  0x13   :  { %402 = vmatpush3.bf16.msra.mxu0 %v437_v6  ;;  %429 = vmatpush3.bf16.msra.mxu1 %v437_v6 }
  0x14   :  { %403 = vmatprep.subr.bf16.mxu0 %v438_v7  ;;  %422 = vmatprep.subr.bf16.mxu1 %v438_v7 }
  0x17   :  { %404 = vmatpush3.bf16.msra.mxu0 %v438_v7  ;;  %430 = vmatpush3.bf16.msra.mxu1 %v438_v7 }
  0x18   :  { %405 = vmatprep.subr.bf16.mxu0 %v439_v8  ;;  %423 = vmatprep.subr.bf16.mxu1 %v439_v8 }
  0x1b   :  { %406 = vmatpush3.bf16.msra.mxu0 %v439_v8  ;;  %431 = vmatpush3.bf16.msra.mxu1 %v439_v8 }
  0x1c   :  { %407 = vmatprep.subr.bf16.mxu0 %v440_v9  ;;  %424 = vmatprep.subr.bf16.mxu1 %v440_v9 }
  0x1f   :  { %408 = vmatpush3.bf16.msra.mxu0 %v440_v9  ;;  %432 = vmatpush3.bf16.msra.mxu1 %v440_v9 }
  0x22   :  { %410 = vmatmul.mubr.bf16.vlgmr.msra.gmra.mrb[0].mxu0 %v443_v10  ;;  %414 = vmatmul.mubr.bf16.vlgmr.msra.gmra.mrb[0].mxu1 %v444_v11 }
  0xf5   :  { %v411_v19 = vpop.f32.mrb[0].mxu0  ;;  %v415_v20 = vpop.f32.mrb[0].mxu1 }
  0xf6   :  { %v164_v23 = vadd.f32 %v411_v19, %v302_v16  ;;  %v180_v24 = vadd.f32 %v415_v20, %v302_v16  ;;  %v155_v25 = vpop.f32.mrb[1].mxu0  ;;  %v171_v26 = vpop.f32.mrb[1].mxu1 }
  0xf7   :  { %v156_v29 = vadd.f32 %v302_v16, %v155_v25  ;;  %v172_v30 = vadd.f32 %v302_v16, %v171_v26  ;;  %v412_v31 = vpop.f32.mrb[2].mxu0  ;;  %v416_v32 = vpop.f32.mrb[2].mxu1 }
  0xf8   :  { %v204_v35 = vadd.f32 %v345_v17, %v164_v23  ;;  %v537_v36 = vadd.f32 %v353_v18, %v180_v24  ;;  %v167_v37 = vadd.f32 %v412_v31, %v302_v16  ;;  %v183_v38 = vadd.f32 %v416_v32, %v302_v16  ;;  %v158_v39 = vpop.f32.mrb[3].mxu0  ;;  %v174_v40 = vpop.f32.mrb[3].mxu1 }
  0xf9   :  { %v202_v41 = vadd.f32 %v341_v21, %v156_v29  ;;  %v539_v42 = vadd.f32 %v349_v22, %v172_v30  ;;  %v159_v43 = vadd.f32 %v302_v16, %v158_v39  ;;  %v175_v44 = vadd.f32 %v302_v16, %v174_v40 }
  0xfa   :  { %v220_v45 = vmin.f32 %v204_v35, 0.0  ;;  %v224_v46 = vmin.f32 %v537_v36, 0.0  ;;  %v205_v51 = vadd.f32 %v346_v27, %v167_v37  ;;  %v209_v52 = vadd.f32 %v354_v28, %v183_v38 }
  0xfb   :  { %v218_v47 = vmin.f32 %v202_v41, 0.0  ;;  %v222_v48 = vmin.f32 %v539_v42, 0.0  ;;  %v203_v55 = vadd.f32 %v342_v33, %v159_v43  ;;  %v207_v56 = vadd.f32 %v350_v34, %v175_v44 }
  0xfc   :  { %v230_v49 = vmul.f32 1.442695, %v220_v45  ;;  %v238_v50 = vmul.f32 1.442695, %v224_v46  ;;  %v221_v57 = vmin.f32 %v205_v51, 0.0  ;;  %v225_v58 = vmin.f32 %v209_v52, 0.0 }
  0xfd   :  { %v226_v53 = vmul.f32 1.442695, %v218_v47  ;;  %v234_v54 = vmul.f32 1.442695, %v222_v48  ;;  %v219_v59 = vmin.f32 %v203_v55, 0.0  ;;  %v223_v61 = vmin.f32 %v207_v56, 0.0 }
  0xfe   :  { %445 = vpow2.f32 %v230_v49  ;;  %v232_v60 = vmul.f32 1.442695, %v221_v57  ;;  %v240_v62 = vmul.f32 1.442695, %v225_v58  ;;  %vm212_vm0 = vcmp.gt.f32.partialorder %v204_v35, 0.0 }
  0xff   :  { %447 = vpow2.f32 %v238_v50  ;;  %v228_v63 = vmul.f32 1.442695, %v219_v59  ;;  %v236_v0 = vmul.f32 1.442695, %v223_v61  ;;  %vm216_vm1 = vcmp.gt.f32.partialorder %v537_v36, 0.0 }
 0x100   :  { %449 = vpow2.f32 %v226_v53  ;;  %vm210_vm2 = vcmp.gt.f32.partialorder %v202_v41, 0.0  ;;  %vm214_vm3 = vcmp.gt.f32.partialorder %v539_v42, 0.0  ;;  %vm213_vm4 = vcmp.gt.f32.partialorder %v205_v51, 0.0 }
 0x101   :  { %451 = vpow2.f32 %v234_v54  ;;  %vm217_vm5 = vcmp.gt.f32.partialorder %v209_v52, 0.0  ;;  %vm211_vm6 = vcmp.gt.f32.partialorder %v203_v55, 0.0  ;;  %vm215_vm7 = vcmp.gt.f32.partialorder %v207_v56, 0.0 }
 0x102   :  { %453 = vpow2.f32 %v232_v60 }
 0x103   :  { %455 = vpow2.f32 %v240_v62 }
 0x104   :  { %457 = vpow2.f32 %v228_v63 }
 0x105   :  { %459 = vpow2.f32 %v236_v0 }
 0x108   :  { %v446_v1 = vpop.eup %445 }
 0x109   :  { %v448_v2 = vpop.eup %447  ;;  %v317_v5 = vadd.f32 -1.0, %v446_v1 }
 0x10a   :  { %v450_v3 = vpop.eup %449  ;;  %v321_v7 = vadd.f32 -1.0, %v448_v2 }
 0x10b   :  { %v452_v4 = vpop.eup %451  ;;  %v315_v9 = vadd.f32 -1.0, %v450_v3  ;;  %v252_v15 = vsel %vm212_vm0, %v204_v35, %v317_v5 }
 0x10c   :  { %v454_v6 = vpop.eup %453  ;;  %v319_v12 = vadd.f32 -1.0, %v452_v4  ;;  %v256_v18 = vsel %vm216_vm1, %v537_v36, %v321_v7 }
 0x10d   :  { %v456_v8 = vpop.eup %455  ;;  %v318_v10 = vadd.f32 -1.0, %v454_v6  ;;  %v250_v22 = vsel %vm210_vm2, %v202_v41, %v315_v9 }
 0x10e   :  { %v458_v11 = vpop.eup %457  ;;  %v322_v13 = vadd.f32 -1.0, %v456_v8  ;;  %v254_v25 = vsel %vm214_vm3, %v539_v42, %v319_v12 }
 0x10f   :  { %v460_v14 = vpop.eup %459  ;;  %v253_v16 = vsel %vm213_vm4, %v205_v51, %v318_v10  ;;  %v316_v17 = vadd.f32 -1.0, %v458_v11 }
 0x110   :  { %v363_v19 = vpack.c.bf16 %v253_v16, %v252_v15  ;;  %v257_v20 = vsel %vm217_vm5, %v209_v52, %v322_v13  ;;  %v320_v21 = vadd.f32 -1.0, %v460_v14 }
 0x111   :  { %v373_v23 = vpack.c.bf16 %v257_v20, %v256_v18  ;;  %v251_v24 = vsel %vm211_vm6, %v203_v55, %v316_v17 }
 0x112   :  { %378 = vst [vmem:[%s568_s4 + $0x8] sm:$0xff] %v363_v19   ;;  %v358_v26 = vpack.c.bf16 %v251_v24, %v250_v22  ;;  %v255_v27 = vsel %vm215_vm7, %v207_v56, %v320_v21 }
 0x113   :  { %380 = vst [vmem:[%s568_s4 + $0x18] sm:$0xff] %v373_v23   ;;  %v368_v28 = vpack.c.bf16 %v255_v27, %v254_v25 }
 0x114   :  { %359 = vst [vmem:[%s568_s4] sm:$0xff] %v358_v26  }
 0x115   :  { %379 = vst [vmem:[%s568_s4 + $0x10] sm:$0xff] %v368_v28  }

// kernel: ligandnet_forward.21
= control target key start
LH: loop header
LB: loop body
LE: loop exit
PB: predicated region body
PF: predicated region fallthrough
CT: control target
= control target key end

     0   :  { %s507_s1 = inlined_call_operand.vmem [shape: bf16[128,128], index: 1, kind: input, shape index: {}]   ;;  %s508_s0 = inlined_call_operand.vmem [shape: bf16[64,128], index: 0, kind: input, shape index: {}]   ;;  %s509_s2 = inlined_call_operand.vmem [shape: f32[1,128], index: 2, kind: input, shape index: {}]   ;;  %s510_s3 = inlined_call_operand.vmem [shape: bf16[64,128], index: 3, kind: output, shape index: {}]  }
   0x1   :  { %v387_v0 = vld [vmem:[%s507_s1] sm:$0xff]   ;;  %v388_v1 = vld [vmem:[%s507_s1 + $0x8] sm:$0xff]   ;;  %v389_v2 = vld [vmem:[%s507_s1 + $0x10] sm:$0xff]  }
   0x2   :  { %347 = vmatprep.subr.bf16.mxu0 %v387_v0  ;;  %371 = vmatprep.subr.bf16.mxu1 %v387_v0  ;;  %v390_v3 = vld [vmem:[%s507_s1 + $0x18] sm:$0xff]   ;;  %v395_v4 = vld [vmem:[%s508_s0] sm:$0xff]   ;;  %v396_v5 = vld [vmem:[%s508_s0 + $0x10] sm:$0xff]  }
   0x3   :  { %348 = vmatpush3.bf16.msra.mxu0 %v387_v0  ;;  %379 = vmatpush3.bf16.msra.mxu1 %v387_v0  ;;  %v391_v6 = vld [vmem:[%s507_s1 + $0x20] sm:$0xff]   ;;  %v392_v7 = vld [vmem:[%s507_s1 + $0x28] sm:$0xff]   ;;  %v393_v8 = vld [vmem:[%s507_s1 + $0x30] sm:$0xff]  }
   0x4   :  { %349 = vmatprep.subr.bf16.mxu0 %v388_v1  ;;  %372 = vmatprep.subr.bf16.mxu1 %v388_v1  ;;  %v394_v9 = vld [vmem:[%s507_s1 + $0x38] sm:$0xff]   ;;  %v397_v10 = vld [vmem:[%s508_s0 + $0x8] sm:$0xff]   ;;  %v275_v12 = vld [vmem:[%s509_s2] ss:$0 sm:$0xff] }
   0x5   :  { %363 = vmatprep.mubr.bf16.mxu0 %v395_v4  ;;  %367 = vmatprep.mubr.bf16.mxu1 %v396_v5  ;;  %v398_v11 = vld [vmem:[%s508_s0 + $0x18] sm:$0xff]  }
   0x7   :  { %350 = vmatpush3.bf16.msra.mxu0 %v388_v1  ;;  %380 = vmatpush3.bf16.msra.mxu1 %v388_v1 }
   0x8   :  { %351 = vmatprep.subr.bf16.mxu0 %v389_v2  ;;  %373 = vmatprep.subr.bf16.mxu1 %v389_v2 }
   0xb   :  { %352 = vmatpush3.bf16.msra.mxu0 %v389_v2  ;;  %381 = vmatpush3.bf16.msra.mxu1 %v389_v2 }
   0xc   :  { %353 = vmatprep.subr.bf16.mxu0 %v390_v3  ;;  %374 = vmatprep.subr.bf16.mxu1 %v390_v3 }
   0xf   :  { %354 = vmatpush3.bf16.msra.mxu0 %v390_v3  ;;  %382 = vmatpush3.bf16.msra.mxu1 %v390_v3 }
  0x10   :  { %355 = vmatprep.subr.bf16.mxu0 %v391_v6  ;;  %375 = vmatprep.subr.bf16.mxu1 %v391_v6 }
  0x13   :  { %356 = vmatpush3.bf16.msra.mxu0 %v391_v6  ;;  %383 = vmatpush3.bf16.msra.mxu1 %v391_v6 }
  0x14   :  { %357 = vmatprep.subr.bf16.mxu0 %v392_v7  ;;  %376 = vmatprep.subr.bf16.mxu1 %v392_v7 }
  0x17   :  { %358 = vmatpush3.bf16.msra.mxu0 %v392_v7  ;;  %384 = vmatpush3.bf16.msra.mxu1 %v392_v7 }
  0x18   :  { %359 = vmatprep.subr.bf16.mxu0 %v393_v8  ;;  %377 = vmatprep.subr.bf16.mxu1 %v393_v8 }
  0x1b   :  { %360 = vmatpush3.bf16.msra.mxu0 %v393_v8  ;;  %385 = vmatpush3.bf16.msra.mxu1 %v393_v8 }
  0x1c   :  { %361 = vmatprep.subr.bf16.mxu0 %v394_v9  ;;  %378 = vmatprep.subr.bf16.mxu1 %v394_v9 }
  0x1f   :  { %362 = vmatpush3.bf16.msra.mxu0 %v394_v9  ;;  %386 = vmatpush3.bf16.msra.mxu1 %v394_v9 }
  0x22   :  { %364 = vmatmul.mubr.bf16.vlgmr.msra.gmra.mrb[0].mxu0 %v397_v10  ;;  %368 = vmatmul.mubr.bf16.vlgmr.msra.gmra.mrb[0].mxu1 %v398_v11 }
  0xf5   :  { %v365_v13 = vpop.f32.mrb[0].mxu0  ;;  %v369_v14 = vpop.f32.mrb[0].mxu1 }
  0xf6   :  { %v161_v15 = vadd.f32 %v365_v13, %v275_v12  ;;  %v474_v16 = vadd.f32 %v369_v14, %v275_v12  ;;  %v152_v17 = vpop.f32.mrb[1].mxu0  ;;  %v168_v18 = vpop.f32.mrb[1].mxu1 }
  0xf7   :  { %v476_v19 = vadd.f32 %v275_v12, %v152_v17  ;;  %v478_v20 = vadd.f32 %v275_v12, %v168_v18  ;;  %v366_v21 = vpop.f32.mrb[2].mxu0  ;;  %v370_v22 = vpop.f32.mrb[2].mxu1 }
  0xf8   :  { %v193_v23 = vmin.f32 %v161_v15, 0.0  ;;  %v197_v24 = vmin.f32 %v474_v16, 0.0  ;;  %v155_v25 = vpop.f32.mrb[3].mxu0  ;;  %v171_v26 = vpop.f32.mrb[3].mxu1  ;;  %v164_v31 = vadd.f32 %v366_v21, %v275_v12  ;;  %v180_v32 = vadd.f32 %v370_v22, %v275_v12 }
  0xf9   :  { %v191_v27 = vmin.f32 %v476_v19, 0.0  ;;  %v195_v28 = vmin.f32 %v478_v20, 0.0  ;;  %v156_v35 = vadd.f32 %v275_v12, %v155_v25  ;;  %v172_v36 = vadd.f32 %v275_v12, %v171_v26 }
  0xfa   :  { %v203_v29 = vmul.f32 1.442695, %v193_v23  ;;  %v211_v30 = vmul.f32 1.442695, %v197_v24  ;;  %v194_v37 = vmin.f32 %v164_v31, 0.0  ;;  %v198_v38 = vmin.f32 %v180_v32, 0.0 }
  0xfb   :  { %v199_v33 = vmul.f32 1.442695, %v191_v27  ;;  %v207_v34 = vmul.f32 1.442695, %v195_v28  ;;  %v192_v39 = vmin.f32 %v156_v35, 0.0  ;;  %v196_v41 = vmin.f32 %v172_v36, 0.0 }
  0xfc   :  { %399 = vpow2.f32 %v203_v29  ;;  %v205_v40 = vmul.f32 1.442695, %v194_v37  ;;  %v213_v42 = vmul.f32 1.442695, %v198_v38  ;;  %vm185_vm0 = vcmp.gt.f32.partialorder %v161_v15, 0.0 }
  0xfd   :  { %401 = vpow2.f32 %v211_v30  ;;  %v201_v43 = vmul.f32 1.442695, %v192_v39  ;;  %v209_v44 = vmul.f32 1.442695, %v196_v41  ;;  %vm189_vm1 = vcmp.gt.f32.partialorder %v474_v16, 0.0 }
  0xfe   :  { %403 = vpow2.f32 %v199_v33  ;;  %vm183_vm2 = vcmp.gt.f32.partialorder %v476_v19, 0.0  ;;  %vm187_vm3 = vcmp.gt.f32.partialorder %v478_v20, 0.0  ;;  %vm186_vm4 = vcmp.gt.f32.partialorder %v164_v31, 0.0 }
  0xff   :  { %405 = vpow2.f32 %v207_v34  ;;  %vm190_vm5 = vcmp.gt.f32.partialorder %v180_v32, 0.0  ;;  %vm184_vm6 = vcmp.gt.f32.partialorder %v156_v35, 0.0  ;;  %vm188_vm7 = vcmp.gt.f32.partialorder %v172_v36, 0.0 }
 0x100   :  { %407 = vpow2.f32 %v205_v40 }
 0x101   :  { %409 = vpow2.f32 %v213_v42 }
 0x102   :  { %411 = vpow2.f32 %v201_v43 }
 0x103   :  { %413 = vpow2.f32 %v209_v44 }
 0x106   :  { %v400_v45 = vpop.eup %399 }
 0x107   :  { %v402_v46 = vpop.eup %401  ;;  %v290_v49 = vadd.f32 -1.0, %v400_v45 }
 0x108   :  { %v404_v47 = vpop.eup %403  ;;  %v294_v51 = vadd.f32 -1.0, %v402_v46 }
 0x109   :  { %v406_v48 = vpop.eup %405  ;;  %v288_v53 = vadd.f32 -1.0, %v404_v47  ;;  %v225_v59 = vsel %vm185_vm0, %v161_v15, %v290_v49 }
 0x10a   :  { %v408_v50 = vpop.eup %407  ;;  %v292_v56 = vadd.f32 -1.0, %v406_v48  ;;  %v229_v62 = vsel %vm189_vm1, %v474_v16, %v294_v51 }
 0x10b   :  { %v410_v52 = vpop.eup %409  ;;  %v291_v54 = vadd.f32 -1.0, %v408_v50  ;;  %v223_v2 = vsel %vm183_vm2, %v476_v19, %v288_v53 }
 0x10c   :  { %v412_v55 = vpop.eup %411  ;;  %v295_v57 = vadd.f32 -1.0, %v410_v52  ;;  %v227_v5 = vsel %vm187_vm3, %v478_v20, %v292_v56 }
 0x10d   :  { %v414_v58 = vpop.eup %413  ;;  %v226_v60 = vsel %vm186_vm4, %v164_v31, %v291_v54  ;;  %v289_v61 = vadd.f32 -1.0, %v412_v55 }
 0x10e   :  { %v320_v63 = vpack.c.bf16 %v226_v60, %v225_v59  ;;  %v230_v0 = vsel %vm190_vm5, %v180_v32, %v295_v57  ;;  %v293_v1 = vadd.f32 -1.0, %v414_v58 }
 0x10f   :  { %v330_v3 = vpack.c.bf16 %v230_v0, %v229_v62  ;;  %v224_v4 = vsel %vm184_vm6, %v156_v35, %v289_v61 }
 0x110   :  { %332 = vst [vmem:[%s510_s3 + $0x8] sm:$0xff] %v320_v63   ;;  %v315_v6 = vpack.c.bf16 %v224_v4, %v223_v2  ;;  %v228_v7 = vsel %vm188_vm7, %v172_v36, %v293_v1 }
 0x111   :  { %334 = vst [vmem:[%s510_s3 + $0x18] sm:$0xff] %v330_v3   ;;  %v325_v8 = vpack.c.bf16 %v228_v7, %v227_v5 }
 0x112   :  { %316 = vst [vmem:[%s510_s3] sm:$0xff] %v315_v6  }
 0x113   :  { %333 = vst [vmem:[%s510_s3 + $0x10] sm:$0xff] %v325_v8  }

// kernel: ligandnet_forward.18
= control target key start
LH: loop header
LB: loop body
LE: loop exit
PB: predicated region body
PF: predicated region fallthrough
CT: control target
= control target key end

     0   :  { %v2505_v0 = vmov 0   ;;  %v84_v29 = vlaneseq  ;;  %vm230_vm4 = vcmask 523264   ;;  %v2506_v35 = vmov 0.0   ;;  %s3036_s0 = inlined_call_operand.vmem [shape: s32[64,1], index: 0, kind: input, shape index: {}]   ;;  %s3037_s3 = inlined_call_operand.vmem [shape: bf16[64,128], index: 3, kind: input, shape index: {}]   ;;  %s3038_s1 = inlined_call_operand.vmem [shape: s32[64,1], index: 1, kind: input, shape index: {}]   ;;  %s3039_s5 = inlined_call_operand.vmem [shape: f32[64,1], index: 5, kind: input, shape index: {}]   ;;  %s3040_s7 = inlined_call_operand.vmem [shape: bf16[128,128], index: 7, kind: input, shape index: {}]   ;;  %s3041_s6 = inlined_call_operand.vmem [shape: bf16[128,128], index: 6, kind: input, shape index: {}]   ;;  %s3042_s8 = inlined_call_operand.vmem [shape: bf16[128,128], index: 8, kind: input, shape index: {}]   ;;  %s3043_s4 = inlined_call_operand.vmem [shape: bf16[64,128], index: 4, kind: input, shape index: {}]   ;;  %s3044_s11 = inlined_call_operand.vmem [shape: bf16[128,128], index: 11, kind: input, shape index: {}]   ;;  %s3045_s10 = inlined_call_operand.vmem [shape: bf16[128,128], index: 10, kind: input, shape index: {}]   ;;  %s3046_s9 = inlined_call_operand.vmem [shape: f32[1,128], index: 9, kind: input, shape index: {}]   ;;  %s3047_s16 = inlined_call_operand.vmem [shape: bf16[64,128], index: 16, kind: output, shape index: {0}]   ;;  %s3048_s2 = inlined_call_operand.vmem [shape: s32[1,64], index: 2, kind: input, shape index: {}]   ;;  %s3049_s14 = inlined_call_operand.vmem [shape: bf16[128,128], index: 14, kind: input, shape index: {}]   ;;  %s3050_s12 = inlined_call_operand.vmem [shape: f32[1,128], index: 12, kind: input, shape index: {}]   ;;  %s3051_s13 = inlined_call_operand.vmem [shape: bf16[128,128], index: 13, kind: input, shape index: {}]   ;;  %s3052_s15 = inlined_call_operand.vmem [shape: f32[1,128], index: 15, kind: input, shape index: {}]   ;;  %s3053_s17 = inlined_call_operand.vmem [shape: bf16[64,128], index: 17, kind: output, shape index: {1}]  }
   0x1   :  { %3056 = sst [smem:[#allocation3_spill]] %s3036_s0  ;;  %2388 = vset.pattern.permute.xlu1 %v2505_v0  ;;  %2387 = vset.pattern.permute.xlu0 %v2505_v0  ;;  %v147_v12 = vld [vmem:[%s3038_s1 + $0x8] sm:$0xff]  ;;  %v146_v13 = vld [vmem:[%s3038_s1] sm:$0xff]  ;;  %v149_v15 = vld [vmem:[%s3038_s1 + $0x18] sm:$0xff] }
   0x2   :  { %3057 = sst [smem:[#allocation4_spill]] %s3037_s3  ;;  %s3058_s26 = sld [smem:[#allocation3_spill]]  ;;  %v148_v16 = vld [vmem:[%s3038_s1 + $0x10] sm:$0xff]  ;;  %v151_v17 = vld [vmem:[%s3038_s1 + $0x28] sm:$0xff]  ;;  %v150_v18 = vld [vmem:[%s3038_s1 + $0x20] sm:$0xff]  ;;  %v2699_v30 = vand.u32 127, %v84_v29 }
   0x3   :  { %s3059_s27 = sld [smem:[#allocation4_spill]]  ;;  %v153_v19 = vld [vmem:[%s3038_s1 + $0x38] sm:$0xff]  ;;  %v152_v20 = vld [vmem:[%s3038_s1 + $0x30] sm:$0xff]  ;;  %v1395_v21 = vld [vmem:[%s3039_s5 + $0x8] sm:$0xff] }
   0x4   :  { %v1394_v22 = vld [vmem:[%s3039_s5] sm:$0xff]  ;;  %v1397_v23 = vld [vmem:[%s3039_s5 + $0x18] sm:$0xff]  ;;  %v1396_v24 = vld [vmem:[%s3039_s5 + $0x10] sm:$0xff] }
   0x5   :  { %v1399_v25 = vld [vmem:[%s3039_s5 + $0x28] sm:$0xff]  ;;  %v1398_v26 = vld [vmem:[%s3039_s5 + $0x20] sm:$0xff]  ;;  %v1401_v27 = vld [vmem:[%s3039_s5 + $0x38] sm:$0xff] }
   0x6   :  { %v1400_v28 = vld [vmem:[%s3039_s5 + $0x30] sm:$0xff]  ;;  %v2393_v59 = vld [vmem:[%s3040_s7] sm:$0xff]  }
   0x8   :  { %v88_v1 = vld [vmem:[%s3058_s26 + $0x10] sm:$0xff]  ;;  %v86_v2 = vld [vmem:[%s3058_s26] sm:$0xff]  ;;  %v89_v3 = vld [vmem:[%s3058_s26 + $0x18] sm:$0xff] }
   0x9   :  { %101 = vperm.xlu1 %2388, %v88_v1   ;;  %95 = vperm.xlu0 %2387, %v86_v2   ;;  %v87_v4 = vld [vmem:[%s3058_s26 + $0x8] sm:$0xff]  ;;  %v90_v6 = vld [vmem:[%s3058_s26 + $0x20] sm:$0xff]  ;;  %v93_v7 = vld [vmem:[%s3058_s26 + $0x38] sm:$0xff] }
   0xa   :  { %v91_v5 = vld [vmem:[%s3058_s26 + $0x28] sm:$0xff]  ;;  %v2621_v8 = vld [vmem:[%s3059_s27] sm:$0xff]   ;;  %v92_v10 = vld [vmem:[%s3058_s26 + $0x30] sm:$0xff] }
   0xb   :  { %v2626_v9 = vld [vmem:[%s3059_s27 + $0x8] sm:$0xff]   ;;  %2137 = vmatprep.subr.bf16.mxu0 %v2621_v8  ;;  %v2637_v11 = vld [vmem:[%s3059_s27 + $0x10] sm:$0xff]   ;;  %v2650_v14 = vld [vmem:[%s3059_s27 + $0x18] sm:$0xff]  }
   0xc   :  { %2138 = vmatpush3.bf16.msra.mxu0 %v2621_v8  ;;  %v2394_v1 = vld [vmem:[%s3040_s7 + $0x8] sm:$0xff]  }
   0xd   :  { %104 = vperm.xlu1 %2388, %v89_v3   ;;  %98 = vperm.xlu0 %2387, %v87_v4  }
   0xe   :  { %2139 = vmatprep.subr.bf16.mxu0 %v2626_v9 }
  0x10   :  { %2140 = vmatpush3.bf16.msra.mxu0 %v2626_v9 }
  0x11   :  { %110 = vperm.xlu1 %2388, %v91_v5   ;;  %107 = vperm.xlu0 %2387, %v90_v6  }
  0x12   :  { %2141 = vmatprep.subr.bf16.mxu0 %v2637_v11 }
  0x14   :  { %2142 = vmatpush3.bf16.msra.mxu0 %v2637_v11 }
  0x15   :  { %116 = vperm.xlu1 %2388, %v93_v7   ;;  %113 = vperm.xlu0 %2387, %v92_v10   ;;  %v2395_v7 = vld [vmem:[%s3040_s7 + $0x10] sm:$0xff]  }
  0x16   :  { %2143 = vmatprep.subr.bf16.mxu0 %v2650_v14 }
  0x18   :  { %2144 = vmatpush3.bf16.msra.mxu0 %v2650_v14 }
  0x19   :  { %158 = vperm.xlu1 %2388, %v147_v12   ;;  %155 = vperm.xlu0 %2387, %v146_v13   ;;  %v2397_v12 = vld [vmem:[%s3040_s7 + $0x20] sm:$0xff]   ;;  %v2398_v13 = vld [vmem:[%s3040_s7 + $0x28] sm:$0xff]  }
  0x1a   :  { %2153 = vmatprep.subr.bf16.mxu0 %v2621_v8 }
  0x1d   :  { %164 = vperm.xlu1 %2388, %v149_v15   ;;  %161 = vperm.xlu0 %2387, %v148_v16   ;;  %v2400_v15 = vld [vmem:[%s3040_s7 + $0x38] sm:$0xff]   ;;  %v2401_v16 = vld [vmem:[%s3041_s6] sm:$0xff]  }
  0x21   :  { %170 = vperm.xlu1 %2388, %v151_v17   ;;  %167 = vperm.xlu0 %2387, %v150_v18   ;;  %v2421_v17 = vld [vmem:[%s3044_s11] sm:$0xff]   ;;  %v2422_v18 = vld [vmem:[%s3044_s11 + $0x8] sm:$0xff]  }
  0x22   :  { %2241 = vmatprep.subr.bf16.mxu1 %v2421_v17 }
  0x23   :  { %2242 = vmatpush3.bf16.msra.mxu1 %v2421_v17 }
  0x24   :  { %2243 = vmatprep.subr.bf16.mxu1 %v2422_v18 }
  0x25   :  { %176 = vperm.xlu1 %2388, %v153_v19   ;;  %173 = vperm.xlu0 %2387, %v152_v20  }
  0x27   :  { %2244 = vmatpush3.bf16.msra.mxu1 %v2422_v18 }
  0x29   :  { %1409 = vperm.xlu1 %2388, %v1395_v21   ;;  %1404 = vperm.xlu0 %2387, %v1394_v22  }
  0x2d   :  { %1419 = vperm.xlu1 %2388, %v1397_v23   ;;  %1414 = vperm.xlu0 %2387, %v1396_v24  }
  0x31   :  { %1429 = vperm.xlu1 %2388, %v1399_v25   ;;  %1424 = vperm.xlu0 %2387, %v1398_v26  }
  0x35   :  { %1439 = vperm.xlu1 %2388, %v1401_v27   ;;  %1434 = vperm.xlu0 %2387, %v1400_v28  }
  0x88   :  { %v102_v31 = vpop.permute.xlu1 %101  ;;  %v96_v32 = vpop.permute.xlu0 %95 }
  0x89   :  { %vm120_vm0 = vcmp.eq.s32.totalorder %v102_v31, %v2699_v30  ;;  %vm118_vm1 = vcmp.eq.s32.totalorder %v96_v32, %v2699_v30 }
  0x8a   :  { %v1825_v36 = vsel %vm120_vm0, 1.0, %v2506_v35  ;;  %v1823_v37 = vsel %vm118_vm1, 1.0, %v2506_v35 }
  0x8c   :  { %v105_v33 = vpop.permute.xlu1 %104  ;;  %v99_v34 = vpop.permute.xlu0 %98 }
  0x8d   :  { %vm121_vm2 = vcmp.eq.s32.totalorder %v105_v33, %v2699_v30  ;;  %vm119_vm3 = vcmp.eq.s32.totalorder %v99_v34, %v2699_v30 }
  0x8e   :  { %v1826_v38 = vsel %vm121_vm2, 1.0, %v2506_v35  ;;  %v1824_v39 = vsel %vm119_vm3, 1.0, %v2506_v35 }
  0x8f   :  { %v143_v40 = vpack.c.bf16 %v1826_v38, %v1825_v36  ;;  %v142_v41 = vpack.c.bf16 %v1824_v39, %v1823_v37  ;;  %v2402_v39 = vld [vmem:[%s3041_s6 + $0x8] sm:$0xff]  }
  0x90   :  { %v111_v42 = vpop.permute.xlu1 %110  ;;  %v108_v43 = vpop.permute.xlu0 %107 }
  0x91   :  { %vm123_vm5 = vcmp.eq.s32.totalorder %v111_v42, %v2699_v30  ;;  %vm122_vm6 = vcmp.eq.s32.totalorder %v108_v43, %v2699_v30  ;;  %2145 = vmatprep.mubr.msk.bf16.mxu0 %vm230_vm4, %v142_v41  ;;  %v2403_v42 = vld [vmem:[%s3041_s6 + $0x10] sm:$0xff]  }
  0x92   :  { %v1828_v44 = vsel %vm123_vm5, 1.0, %v2506_v35  ;;  %v1827_v45 = vsel %vm122_vm6, 1.0, %v2506_v35  ;;  %2146 = vmatmul.mubr.msk.bf16.vlgmr.msra.gmra.mrb[0].mxu0 %vm230_vm4, %v143_v40 }
  0x93   :  { %v144_v46 = vpack.c.bf16 %v1828_v44, %v1827_v45  ;;  %2154 = vmatpush3.bf16.msra.mxu0 %v2621_v8 }
  0x94   :  { %v117_v47 = vpop.permute.xlu1 %116  ;;  %v114_v48 = vpop.permute.xlu0 %113  ;;  %2155 = vmatprep.subr.bf16.mxu0 %v2626_v9 }
  0x95   :  { %vm125_vm7 = vcmp.eq.s32.totalorder %v117_v47, %v2699_v30  ;;  %vm124_vm8 = vcmp.eq.s32.totalorder %v114_v48, %v2699_v30  ;;  %2149 = vmatprep.mubr.msk.bf16.mxu0 %vm230_vm4, %v144_v46  ;;  %v2404_v47 = vld [vmem:[%s3041_s6 + $0x18] sm:$0xff]   ;;  %v2405_v48 = vld [vmem:[%s3041_s6 + $0x20] sm:$0xff]  }
  0x96   :  { %v1830_v49 = vsel %vm125_vm7, 1.0, %v2506_v35  ;;  %v1829_v50 = vsel %vm124_vm8, 1.0, %v2506_v35 }
  0x97   :  { %v145_v51 = vpack.c.bf16 %v1830_v49, %v1829_v50  ;;  %2156 = vmatpush3.bf16.msra.mxu0 %v2626_v9  ;;  %v2406_v49 = vld [vmem:[%s3041_s6 + $0x28] sm:$0xff]   ;;  %v2407_v50 = vld [vmem:[%s3041_s6 + $0x30] sm:$0xff]  }
  0x98   :  { %v159_v52 = vpop.permute.xlu1 %158  ;;  %v156_v53 = vpop.permute.xlu0 %155  ;;  %2157 = vmatprep.subr.bf16.mxu0 %v2637_v11 }
  0x99   :  { %vm179_vm9 = vcmp.eq.s32.totalorder %v159_v52, %v2699_v30  ;;  %vm178_vm10 = vcmp.eq.s32.totalorder %v156_v53, %v2699_v30  ;;  %v2409_v52 = vld [vmem:[%s3042_s8] sm:$0xff]   ;;  %v2410_v53 = vld [vmem:[%s3042_s8 + $0x8] sm:$0xff]  }
  0x9a   :  { %v1832_v54 = vsel %vm179_vm9, 1.0, %v2506_v35  ;;  %v1831_v55 = vsel %vm178_vm10, 1.0, %v2506_v35  ;;  %2150 = vmatmul.mubr.msk.bf16.gmra.mrb[4].mxu0 %vm230_vm4, %v145_v51  ;;  %v2408_v51 = vld [vmem:[%s3041_s6 + $0x38] sm:$0xff]  }
  0x9b   :  { %v202_v56 = vpack.c.bf16 %v1832_v54, %v1831_v55  ;;  %2158 = vmatpush3.bf16.msra.mxu0 %v2637_v11  ;;  %v2396_v11 = vld [vmem:[%s3040_s7 + $0x18] sm:$0xff]   ;;  %v2411_v54 = vld [vmem:[%s3042_s8 + $0x10] sm:$0xff]   ;;  %v2417_v55 = vld [vmem:[%s3043_s4] sm:$0xff]  }
  0x9c   :  { %v165_v57 = vpop.permute.xlu1 %164  ;;  %v162_v58 = vpop.permute.xlu0 %161  ;;  %2159 = vmatprep.subr.bf16.mxu0 %v2650_v14 }
  0x9d   :  { %vm181_vm11 = vcmp.eq.s32.totalorder %v165_v57, %v2699_v30  ;;  %vm180_vm12 = vcmp.eq.s32.totalorder %v162_v58, %v2699_v30  ;;  %2161 = vmatprep.mubr.msk.bf16.mxu0 %vm230_vm4, %v202_v56  ;;  %v2412_v56 = vld [vmem:[%s3042_s8 + $0x18] sm:$0xff]   ;;  %v2413_v57 = vld [vmem:[%s3042_s8 + $0x20] sm:$0xff]   ;;  %v2414_v58 = vld [vmem:[%s3042_s8 + $0x28] sm:$0xff]  }
  0x9e   :  { %v1834_v60 = vsel %vm181_vm11, 1.0, %v2506_v35  ;;  %v1833_v61 = vsel %vm180_vm12, 1.0, %v2506_v35 }
  0x9f   :  { %v203_v62 = vpack.c.bf16 %v1834_v60, %v1833_v61  ;;  %2160 = vmatpush3.bf16.msra.mxu0 %v2650_v14  ;;  %v2399_v14 = vld [vmem:[%s3040_s7 + $0x30] sm:$0xff]   ;;  %v2416_v60 = vld [vmem:[%s3042_s8 + $0x38] sm:$0xff]   ;;  %v2418_v61 = vld [vmem:[%s3043_s4 + $0x8] sm:$0xff]  }
  0xa0   :  { %v171_v63 = vpop.permute.xlu1 %170  ;;  %v168_v0 = vpop.permute.xlu0 %167  ;;  %2169 = vmatprep.subr.bf16.mxu0 %v2393_v59 }
  0xa1   :  { %vm183_vm13 = vcmp.eq.s32.totalorder %v171_v63, %v2699_v30  ;;  %vm182_vm14 = vcmp.eq.s32.totalorder %v168_v0, %v2699_v30  ;;  %v2420_v63 = vld [vmem:[%s3043_s4 + $0x18] sm:$0xff]   ;;  %v2423_v0 = vld [vmem:[%s3044_s11 + $0x10] sm:$0xff]  }
  0xa2   :  { %v1836_v2 = vsel %vm183_vm13, 1.0, %v2506_v35  ;;  %v1835_v3 = vsel %vm182_vm14, 1.0, %v2506_v35  ;;  %2162 = vmatmul.mubr.msk.bf16.vlgmr.msra.gmra.mrb[8].mxu0 %vm230_vm4, %v203_v62  ;;  %v2419_v62 = vld [vmem:[%s3043_s4 + $0x10] sm:$0xff]   ;;  %2245 = vmatprep.subr.bf16.mxu1 %v2423_v0 }
  0xa3   :  { %v204_v4 = vpack.c.bf16 %v1836_v2, %v1835_v3  ;;  %2170 = vmatpush3.bf16.msra.mxu0 %v2393_v59  ;;  %v2415_v59 = vld [vmem:[%s3042_s8 + $0x30] sm:$0xff]   ;;  %2246 = vmatpush3.bf16.msra.mxu1 %v2423_v0  ;;  %v2425_v2 = vld [vmem:[%s3044_s11 + $0x20] sm:$0xff]   ;;  %v2426_v3 = vld [vmem:[%s3044_s11 + $0x28] sm:$0xff]  }
  0xa4   :  { %v177_v5 = vpop.permute.xlu1 %176  ;;  %v174_v6 = vpop.permute.xlu0 %173  ;;  %2171 = vmatprep.subr.bf16.mxu0 %v2394_v1 }
  0xa5   :  { %vm185_vm15 = vcmp.eq.s32.totalorder %v177_v5, %v2699_v30  ;;  %vm184_vm0 = vcmp.eq.s32.totalorder %v174_v6, %v2699_v30  ;;  %2165 = vmatprep.mubr.msk.bf16.mxu0 %vm230_vm4, %v204_v4  ;;  %v2427_v4 = vld [vmem:[%s3044_s11 + $0x30] sm:$0xff]   ;;  %v2428_v5 = vld [vmem:[%s3044_s11 + $0x38] sm:$0xff]   ;;  %v2871_v6 = vld [vmem:[%s3045_s10] sm:$0xff]  }
  0xa6   :  { %v1838_v8 = vsel %vm185_vm15, 1.0, %v2506_v35  ;;  %v1837_v9 = vsel %vm184_vm0, 1.0, %v2506_v35 }
  0xa7   :  { %v205_v10 = vpack.c.bf16 %v1838_v8, %v1837_v9  ;;  %2172 = vmatpush3.bf16.msra.mxu0 %v2394_v1  ;;  %v2424_v1 = vld [vmem:[%s3044_s11 + $0x18] sm:$0xff]  }
  0xa8   :  { %2173 = vmatprep.subr.bf16.mxu0 %v2395_v7  ;;  %2247 = vmatprep.subr.bf16.mxu1 %v2424_v1 }
  0xa9   :  { %2248 = vmatpush3.bf16.msra.mxu1 %v2424_v1 }
  0xaa   :  { %2166 = vmatmul.mubr.msk.bf16.gmra.mrb[12].mxu0 %vm230_vm4, %v205_v10  ;;  %2249 = vmatprep.subr.bf16.mxu1 %v2425_v2 }
  0xab   :  { %2174 = vmatpush3.bf16.msra.mxu0 %v2395_v7  ;;  %v1879_v7 = vld [vmem:[%s3046_s9] ss:$0 sm:$0xff] }
  0xac   :  { %2175 = vmatprep.subr.bf16.mxu0 %v2396_v11 }
  0xad   :  { %2250 = vmatpush3.bf16.msra.mxu1 %v2425_v2 }
  0xae   :  { %2251 = vmatprep.subr.bf16.mxu1 %v2426_v3 }
  0xaf   :  { %2176 = vmatpush3.bf16.msra.mxu0 %v2396_v11 }
  0xb0   :  { %2177 = vmatprep.subr.bf16.mxu0 %v2397_v12 }
  0xb1   :  { %2252 = vmatpush3.bf16.msra.mxu1 %v2426_v3 }
  0xb2   :  { %2253 = vmatprep.subr.bf16.mxu1 %v2427_v4 }
  0xb3   :  { %2178 = vmatpush3.bf16.msra.mxu0 %v2397_v12 }
  0xb4   :  { %2179 = vmatprep.subr.bf16.mxu0 %v2398_v13 }
  0xb5   :  { %2254 = vmatpush3.bf16.msra.mxu1 %v2427_v4 }
  0xb6   :  { %2255 = vmatprep.subr.bf16.mxu1 %v2428_v5 }
  0xb7   :  { %2180 = vmatpush3.bf16.msra.mxu0 %v2398_v13 }
  0xb8   :  { %2181 = vmatprep.subr.bf16.mxu0 %v2399_v14 }
  0xb9   :  { %2256 = vmatpush3.bf16.msra.mxu1 %v2428_v5  ;;  %v2431_v5 = vld [vmem:[%s3045_s10 + $0x10] sm:$0xff]  }
  0xba   :  { %2265 = vmatprep.subr.bf16.mxu1 %v2871_v6 }
  0xbb   :  { %2182 = vmatpush3.bf16.msra.mxu0 %v2399_v14 }
  0xbc   :  { %2183 = vmatprep.subr.bf16.mxu0 %v2400_v15 }
  0xbf   :  { %2184 = vmatpush3.bf16.msra.mxu0 %v2400_v15 }
  0xc0   :  { %2193 = vmatprep.subr.bf16.mxu0 %v2401_v16 }
 0x165   :  { %v2147_v19 = vpop.f32.mrb[0].mxu0 }
 0x166   :  { %v277_v20 = vpop.f32.mrb[1].mxu0 }
 0x167   :  { %v2148_v21 = vpop.f32.mrb[2].mxu0 }
 0x168   :  { %v2781_v22 = vpack.c.bf16 %v2148_v21, %v2147_v19  ;;  %v280_v23 = vpop.f32.mrb[3].mxu0 }
 0x169   :  { %v2783_v24 = vpack.c.bf16 %v280_v23, %v277_v20 }
 0x16d   :  { %v2151_v25 = vpop.f32.mrb[4].mxu0 }
 0x16e   :  { %v293_v26 = vpop.f32.mrb[5].mxu0 }
 0x16f   :  { %v2152_v27 = vpop.f32.mrb[6].mxu0 }
 0x170   :  { %v2785_v28 = vpack.c.bf16 %v2152_v27, %v2151_v25  ;;  %v296_v30 = vpop.f32.mrb[7].mxu0 }
 0x171   :  { %v2787_v31 = vpack.c.bf16 %v296_v30, %v293_v26 }
 0x175   :  { %v2163_v32 = vpop.f32.mrb[8].mxu0 }
 0x176   :  { %v358_v33 = vpop.f32.mrb[9].mxu0 }
 0x177   :  { %v2164_v34 = vpop.f32.mrb[10].mxu0 }
 0x178   :  { %v390_v36 = vpack.c.bf16 %v2164_v34, %v2163_v32  ;;  %v361_v37 = vpop.f32.mrb[11].mxu0 }
 0x179   :  { %v389_v38 = vpack.c.bf16 %v361_v37, %v358_v33 }
 0x17b   :  { %2185 = vmatprep.mubr.bf16.mxu0 %v389_v38 }
 0x17c   :  { %2186 = vmatmul.mubr.bf16.vlgmr.msra.gmra.mrb[16].mxu0 %v390_v36 }
 0x17d   :  { %2194 = vmatpush3.bf16.msra.mxu0 %v2401_v16  ;;  %v2167_v40 = vpop.f32.mrb[12].mxu0 }
 0x17e   :  { %v374_v41 = vpop.f32.mrb[13].mxu0  ;;  %2195 = vmatprep.subr.bf16.mxu0 %v2402_v39 }
 0x17f   :  { %v2168_v43 = vpop.f32.mrb[14].mxu0 }
 0x180   :  { %v392_v44 = vpack.c.bf16 %v2168_v43, %v2167_v40  ;;  %v377_v45 = vpop.f32.mrb[15].mxu0 }
 0x181   :  { %v391_v46 = vpack.c.bf16 %v377_v45, %v374_v41  ;;  %2196 = vmatpush3.bf16.msra.mxu0 %v2402_v39 }
 0x182   :  { %2197 = vmatprep.subr.bf16.mxu0 %v2403_v42 }
 0x183   :  { %2189 = vmatprep.mubr.bf16.mxu0 %v391_v46 }
 0x184   :  { %2190 = vmatmul.mubr.bf16.gmra.mrb[20].mxu0 %v392_v44 }
 0x185   :  { %2198 = vmatpush3.bf16.msra.mxu0 %v2403_v42  ;;  %2209 = vmatprep.mubr.bf16.mxu0 %v2783_v24 }
 0x186   :  { %2199 = vmatprep.subr.bf16.mxu0 %v2404_v47 }
 0x189   :  { %2200 = vmatpush3.bf16.msra.mxu0 %v2404_v47 }
 0x18a   :  { %2201 = vmatprep.subr.bf16.mxu0 %v2405_v48 }
 0x18d   :  { %2202 = vmatpush3.bf16.msra.mxu0 %v2405_v48 }
 0x18e   :  { %2203 = vmatprep.subr.bf16.mxu0 %v2406_v49 }
 0x191   :  { %2204 = vmatpush3.bf16.msra.mxu0 %v2406_v49 }
 0x192   :  { %2205 = vmatprep.subr.bf16.mxu0 %v2407_v50 }
 0x195   :  { %2206 = vmatpush3.bf16.msra.mxu0 %v2407_v50 }
 0x196   :  { %2207 = vmatprep.subr.bf16.mxu0 %v2408_v51 }
 0x199   :  { %2208 = vmatpush3.bf16.msra.mxu0 %v2408_v51 }
 0x19a   :  { %2217 = vmatprep.subr.bf16.mxu0 %v2409_v52 }
 0x19c   :  { %2210 = vmatmul.mubr.bf16.vlgmr.msra.gmra.mrb[16].mxu0 %v2781_v22 }
 0x19d   :  { %2213 = vmatprep.mubr.bf16.mxu0 %v2787_v31  ;;  %2218 = vmatpush3.bf16.msra.mxu0 %v2409_v52 }
 0x19e   :  { %2219 = vmatprep.subr.bf16.mxu0 %v2410_v53 }
 0x1a1   :  { %2220 = vmatpush3.bf16.msra.mxu0 %v2410_v53 }
 0x1a2   :  { %2221 = vmatprep.subr.bf16.mxu0 %v2411_v54 }
 0x1a4   :  { %2214 = vmatmul.mubr.bf16.gmra.mrb[20].mxu0 %v2785_v28 }
 0x1a5   :  { %2222 = vmatpush3.bf16.msra.mxu0 %v2411_v54  ;;  %2233 = vmatprep.mubr.bf16.mxu0 %v2417_v55 }
 0x1a6   :  { %2223 = vmatprep.subr.bf16.mxu0 %v2412_v56 }
 0x1a9   :  { %2224 = vmatpush3.bf16.msra.mxu0 %v2412_v56 }
 0x1aa   :  { %2225 = vmatprep.subr.bf16.mxu0 %v2413_v57 }
 0x1ad   :  { %2226 = vmatpush3.bf16.msra.mxu0 %v2413_v57 }
 0x1ae   :  { %2227 = vmatprep.subr.bf16.mxu0 %v2414_v58 }
 0x1b1   :  { %2228 = vmatpush3.bf16.msra.mxu0 %v2414_v58 }
 0x1b2   :  { %2229 = vmatprep.subr.bf16.mxu0 %v2415_v59 }
 0x1b5   :  { %2230 = vmatpush3.bf16.msra.mxu0 %v2415_v59 }
 0x1b6   :  { %2231 = vmatprep.subr.bf16.mxu0 %v2416_v60 }
 0x1b9   :  { %2232 = vmatpush3.bf16.msra.mxu0 %v2416_v60 }
 0x1bc   :  { %2234 = vmatmul.mubr.bf16.vlgmr.msra.gmra.mrb[16].mxu0 %v2418_v61  ;;  %v2430_v61 = vld [vmem:[%s3045_s10 + $0x8] sm:$0xff]  }
 0x1bd   :  { %2237 = vmatprep.mubr.bf16.mxu0 %v2419_v62 }
 0x1c4   :  { %2238 = vmatmul.mubr.bf16.gmra.mrb[20].mxu0 %v2420_v63 }
 0x28f   :  { %v2235_v8 = vpop.f32.mrb[16].mxu0 }
 0x290   :  { %v821_v9 = vadd.f32 %v2235_v8, %v1879_v7  ;;  %v773_v10 = vpop.f32.mrb[17].mxu0 }
 0x291   :  { %v819_v11 = vadd.f32 %v1879_v7, %v773_v10  ;;  %v2236_v12 = vpop.f32.mrb[18].mxu0 }
 0x292   :  { %v837_v13 = vmin.f32 %v821_v9, 0.0  ;;  %v822_v14 = vadd.f32 %v2236_v12, %v1879_v7  ;;  %v776_v15 = vpop.f32.mrb[19].mxu0  ;;  %vm829_vm1 = vcmp.gt.f32.partialorder %v821_v9, 0.0 }
 0x293   :  { %v835_v16 = vmin.f32 %v819_v11, 0.0  ;;  %v820_v17 = vadd.f32 %v1879_v7, %v776_v15  ;;  %vm827_vm3 = vcmp.gt.f32.partialorder %v819_v11, 0.0  ;;  %v2435_v15 = vld [vmem:[%s3045_s10 + $0x30] sm:$0xff]  }
 0x294   :  { %v847_v18 = vmul.f32 1.442695, %v837_v13  ;;  %v838_v19 = vmin.f32 %v822_v14, 0.0  ;;  %vm830_vm2 = vcmp.gt.f32.partialorder %v822_v14, 0.0  ;;  %v2433_v13 = vld [vmem:[%s3045_s10 + $0x20] sm:$0xff]  }
 0x295   :  { %v843_v20 = vmul.f32 1.442695, %v835_v16  ;;  %v836_v21 = vmin.f32 %v820_v17, 0.0  ;;  %vm828_vm5 = vcmp.gt.f32.partialorder %v820_v17, 0.0  ;;  %v1241_v16 = vshrl.u32 %v84_v29, 7 }
 0x296   :  { %2453 = vpow2.f32 %v847_v18  ;;  %v849_v23 = vmul.f32 1.442695, %v838_v19  ;;  %v1921_v18 = vld [vmem:[%s3048_s2] ss:$0 sm:$0xff] }
 0x297   :  { %2455 = vpow2.f32 %v843_v20  ;;  %v845_v25 = vmul.f32 1.442695, %v836_v21  ;;  %v2239_v26 = vpop.f32.mrb[20].mxu0  ;;  %v1243_v19 = vadd.s32 16, %v1241_v16  ;;  %v1244_v20 = vadd.s32 24, %v1241_v16 }
 0x298   :  { %2457 = vpow2.f32 %v849_v23  ;;  %v825_v27 = vadd.f32 %v2239_v26, %v1879_v7  ;;  %v789_v30 = vpop.f32.mrb[21].mxu0  ;;  %vm1254_vm10 = vcmp.eq.s32.totalorder %v1921_v18, %v1241_v16  ;;  %v1246_v26 = vadd.s32 40, %v1241_v16 }
 0x299   :  { %2459 = vpow2.f32 %v845_v25  ;;  %v823_v32 = vadd.f32 %v1879_v7, %v789_v30  ;;  %v2240_v33 = vpop.f32.mrb[22].mxu0  ;;  %v1922_v21 = vsel %vm1254_vm10, 1.0, %v2506_v35  ;;  %vm1256_vm12 = vcmp.eq.s32.totalorder %v1921_v18, %v1243_v19 }
 0x29a   :  { %v841_v34 = vmin.f32 %v825_v27, 0.0  ;;  %v826_v36 = vadd.f32 %v2240_v33, %v1879_v7  ;;  %v792_v37 = vpop.f32.mrb[23].mxu0  ;;  %vm833_vm6 = vcmp.gt.f32.partialorder %v825_v27, 0.0  ;;  %vm1257_vm13 = vcmp.eq.s32.totalorder %v1921_v18, %v1244_v20 }
 0x29b   :  { %v839_v38 = vmin.f32 %v823_v32, 0.0  ;;  %v824_v39 = vadd.f32 %v1879_v7, %v792_v37  ;;  %vm831_vm8 = vcmp.gt.f32.partialorder %v823_v32, 0.0  ;;  %v2925_v29 = vsel %vm1257_vm13, 1.0, %v2506_v35 }
 0x29c   :  { %v855_v40 = vmul.f32 1.442695, %v841_v34  ;;  %v842_v41 = vmin.f32 %v826_v36, 0.0  ;;  %vm834_vm7 = vcmp.gt.f32.partialorder %v826_v36, 0.0  ;;  %v1245_v25 = vadd.s32 32, %v1241_v16 }
 0x29d   :  { %v851_v42 = vmul.f32 1.442695, %v839_v38  ;;  %v840_v43 = vmin.f32 %v824_v39, 0.0  ;;  %vm832_vm9 = vcmp.gt.f32.partialorder %v824_v39, 0.0  ;;  %v1248_v30 = vadd.s32 56, %v1241_v16 }
 0x29e   :  { %2461 = vpow2.f32 %v855_v40  ;;  %v857_v44 = vmul.f32 1.442695, %v842_v41  ;;  %vm1258_vm14 = vcmp.eq.s32.totalorder %v1921_v18, %v1245_v25  ;;  %vm1259_vm15 = vcmp.eq.s32.totalorder %v1921_v18, %v1246_v26 }
 0x29f   :  { %2463 = vpow2.f32 %v851_v42  ;;  %v853_v45 = vmul.f32 1.442695, %v840_v43  ;;  %v2934_v33 = vsel %vm1259_vm15, 1.0, %v2506_v35 }
 0x2a0   :  { %v2454_v46 = vpop.eup %2453  ;;  %2465 = vpow2.f32 %v857_v44 }
 0x2a1   :  { %v2456_v47 = vpop.eup %2455  ;;  %v1882_v48 = vadd.f32 -1.0, %v2454_v46  ;;  %2467 = vpow2.f32 %v853_v45 }
 0x2a2   :  { %v2458_v49 = vpop.eup %2457  ;;  %v1880_v50 = vadd.f32 -1.0, %v2456_v47 }
 0x2a3   :  { %v2460_v51 = vpop.eup %2459  ;;  %v1883_v52 = vadd.f32 -1.0, %v2458_v49  ;;  %v869_v54 = vsel %vm829_vm1, %v821_v9, %v1882_v48  ;;  %vm1261_vm1 = vcmp.eq.s32.totalorder %v1921_v18, %v1248_v30 }
 0x2a4   :  { %v1881_v53 = vadd.f32 -1.0, %v2460_v51  ;;  %v867_v56 = vsel %vm827_vm3, %v819_v11, %v1880_v50  ;;  %v2942_v37 = vsel %vm1261_vm1, 1.0, %v2506_v35 }
 0x2a5   :  { %v870_v55 = vsel %vm830_vm2, %v822_v14, %v1883_v52  ;;  %v2434_v14 = vld [vmem:[%s3045_s10 + $0x28] sm:$0xff]  }
 0x2a6   :  { %v868_v57 = vsel %vm828_vm5, %v820_v17, %v1881_v53  ;;  %v876_v58 = vpack.c.bf16 %v870_v55, %v869_v54  ;;  %v1242_v17 = vadd.s32 8, %v1241_v16 }
 0x2a7   :  { %v875_v59 = vpack.c.bf16 %v868_v57, %v867_v56 }
 0x2a8   :  { %v2462_v60 = vpop.eup %2461  ;;  %2023 = vst [vmem:[%s3047_s16 + $0x8] sm:$0xff] %v876_v58   ;;  %vm1255_vm11 = vcmp.eq.s32.totalorder %v1921_v18, %v1242_v17 }
 0x2a9   :  { %v2464_v62 = vpop.eup %2463  ;;  %v1886_v63 = vadd.f32 -1.0, %v2462_v60  ;;  %1987 = vst [vmem:[%s3047_s16] sm:$0xff] %v875_v59   ;;  %2257 = vmatprep.mubr.bf16.mxu1 %v875_v59  ;;  %v1923_v23 = vsel %vm1255_vm11, 1.0, %v2506_v35 }
 0x2aa   :  { %v2466_v0 = vpop.eup %2465  ;;  %v1884_v1 = vadd.f32 -1.0, %v2464_v62  ;;  %2258 = vmatmul.mubr.bf16.vlgmr.msra.gmra.mrb[0].mxu1 %v876_v58 }
 0x2ab   :  { %v2468_v2 = vpop.eup %2467  ;;  %v1887_v3 = vadd.f32 -1.0, %v2466_v0  ;;  %2266 = vmatpush3.bf16.msra.mxu1 %v2871_v6  ;;  %v873_v7 = vsel %vm833_vm6, %v825_v27, %v1886_v63  ;;  %v2432_v6 = vld [vmem:[%s3045_s10 + $0x18] sm:$0xff]   ;;  %v1247_v27 = vadd.s32 48, %v1241_v16 }
 0x2ac   :  { %v1885_v4 = vadd.f32 -1.0, %v2468_v2  ;;  %2267 = vmatprep.subr.bf16.mxu1 %v2430_v61  ;;  %v871_v9 = vsel %vm831_vm8, %v823_v32, %v1884_v1  ;;  %v2931_v32 = vsel %vm1258_vm14, 1.0, %v2506_v35 }
 0x2ad   :  { %v874_v8 = vsel %vm834_vm7, %v826_v36, %v1887_v3  ;;  %vm1260_vm0 = vcmp.eq.s32.totalorder %v1921_v18, %v1247_v27  ;;  %v1280_v34 = vpack.c.bf16 %v2934_v33, %v2931_v32  ;;  %v2444_v32 = vld [vmem:[%s3049_s14 + $0x38] sm:$0xff]   ;;  %v2445_v33 = vld [vmem:[%s3051_s13] sm:$0xff]  }
 0x2ae   :  { %v872_v10 = vsel %vm832_vm9, %v824_v39, %v1885_v4  ;;  %v878_v11 = vpack.c.bf16 %v874_v8, %v873_v7  ;;  %v2939_v36 = vsel %vm1260_vm0, 1.0, %v2506_v35  ;;  %v1912_v39 = vld [vmem:[%s3050_s12] ss:$0 sm:$0xff] }
 0x2af   :  { %2268 = vmatpush3.bf16.msra.mxu1 %v2430_v61  ;;  %v877_v12 = vpack.c.bf16 %v872_v10, %v871_v9  ;;  %v1281_v38 = vpack.c.bf16 %v2942_v37, %v2939_v36  ;;  %v1405_v36 = vpop.permute.xlu0 %1404 }
 0x2b0   :  { %2269 = vmatprep.subr.bf16.mxu1 %v2431_v5  ;;  %2025 = vst [vmem:[%s3047_s16 + $0x18] sm:$0xff] %v878_v11  }
 0x2b1   :  { %2024 = vst [vmem:[%s3047_s16 + $0x10] sm:$0xff] %v877_v12   ;;  %2261 = vmatprep.mubr.bf16.mxu1 %v877_v12 }
 0x2b2   :  { %2262 = vmatmul.mubr.bf16.gmra.mrb[4].mxu1 %v878_v11 }
 0x2b3   :  { %2270 = vmatpush3.bf16.msra.mxu1 %v2431_v5  ;;  %2281 = vmatprep.mubr.bf16.mxu1 %v2783_v24  ;;  %v2436_v24 = vld [vmem:[%s3045_s10 + $0x38] sm:$0xff]  }
 0x2b4   :  { %2271 = vmatprep.subr.bf16.mxu1 %v2432_v6 }
 0x2b7   :  { %2272 = vmatpush3.bf16.msra.mxu1 %v2432_v6 }
 0x2b8   :  { %2273 = vmatprep.subr.bf16.mxu1 %v2433_v13 }
 0x2bb   :  { %2274 = vmatpush3.bf16.msra.mxu1 %v2433_v13 }
 0x2bc   :  { %2275 = vmatprep.subr.bf16.mxu1 %v2434_v14 }
 0x2bf   :  { %2276 = vmatpush3.bf16.msra.mxu1 %v2434_v14 }
 0x2c0   :  { %2277 = vmatprep.subr.bf16.mxu1 %v2435_v15 }
 0x2c3   :  { %2278 = vmatpush3.bf16.msra.mxu1 %v2435_v15 }
 0x2c4   :  { %2279 = vmatprep.subr.bf16.mxu1 %v2436_v24 }
 0x2c7   :  { %2280 = vmatpush3.bf16.msra.mxu1 %v2436_v24 }
 0x2ca   :  { %2282 = vmatmul.mubr.bf16.vlgmr.msra.gmra.mrb[0].mxu1 %v2781_v22  ;;  %v1278_v22 = vpack.c.bf16 %v1923_v23, %v1922_v21 }
 0x2cb   :  { %2285 = vmatprep.mubr.bf16.mxu1 %v2787_v31 }
 0x2d2   :  { %2286 = vmatmul.mubr.bf16.gmra.mrb[4].mxu1 %v2785_v28  ;;  %v2922_v28 = vsel %vm1256_vm12, 1.0, %v2506_v35 }
 0x2d3   :  { %v1279_v31 = vpack.c.bf16 %v2925_v29, %v2922_v28  ;;  %2297 = vmatprep.mubr.msk.bf16.mxu1 %vm230_vm4, %v1278_v22  ;;  %v2441_v28 = vld [vmem:[%s3049_s14 + $0x20] sm:$0xff]   ;;  %v2442_v29 = vld [vmem:[%s3049_s14 + $0x28] sm:$0xff]  }
 0x39d   :  { %v2283_v40 = vpop.f32.mrb[0].mxu1 }
 0x39e   :  { %v1182_v41 = vadd.f32 %v2283_v40, %v1912_v39  ;;  %v1142_v42 = vpop.f32.mrb[1].mxu1 }
 0x39f   :  { %v1180_v43 = vadd.f32 %v1912_v39, %v1142_v42  ;;  %v2284_v44 = vpop.f32.mrb[2].mxu1 }
 0x3a0   :  { %v1198_v45 = vmin.f32 %v1182_v41, 0.0  ;;  %v1183_v46 = vadd.f32 %v2284_v44, %v1912_v39  ;;  %v1145_v47 = vpop.f32.mrb[3].mxu1  ;;  %vm1190_vm2 = vcmp.gt.f32.partialorder %v1182_v41, 0.0 }
 0x3a1   :  { %v1196_v48 = vmin.f32 %v1180_v43, 0.0  ;;  %v1181_v49 = vadd.f32 %v1912_v39, %v1145_v47  ;;  %vm1188_vm5 = vcmp.gt.f32.partialorder %v1180_v43, 0.0  ;;  %v2439_v47 = vld [vmem:[%s3049_s14 + $0x10] sm:$0xff]  }
 0x3a2   :  { %v1208_v50 = vmul.f32 1.442695, %v1198_v45  ;;  %v1199_v35 = vmin.f32 %v1183_v46, 0.0  ;;  %vm1191_vm3 = vcmp.gt.f32.partialorder %v1183_v46, 0.0  ;;  %v2437_v45 = vld [vmem:[%s3049_s14] sm:$0xff]  }
 0x3a3   :  { %v1204_v51 = vmul.f32 1.442695, %v1196_v48  ;;  %v1197_v52 = vmin.f32 %v1181_v49, 0.0  ;;  %vm1189_vm6 = vcmp.gt.f32.partialorder %v1181_v49, 0.0  ;;  %v2440_v48 = vld [vmem:[%s3049_s14 + $0x18] sm:$0xff]  }
 0x3a4   :  { %2469 = vpow2.f32 %v1208_v50  ;;  %v1210_v53 = vmul.f32 1.442695, %v1199_v35 }
 0x3a5   :  { %2471 = vpow2.f32 %v1204_v51  ;;  %v1206_v54 = vmul.f32 1.442695, %v1197_v52  ;;  %v2287_v55 = vpop.f32.mrb[4].mxu1 }
 0x3a6   :  { %2473 = vpow2.f32 %v1210_v53  ;;  %v1186_v56 = vadd.f32 %v2287_v55, %v1912_v39  ;;  %v1158_v57 = vpop.f32.mrb[5].mxu1 }
 0x3a7   :  { %2475 = vpow2.f32 %v1206_v54  ;;  %v1184_v58 = vadd.f32 %v1912_v39, %v1158_v57  ;;  %v2288_v59 = vpop.f32.mrb[6].mxu1 }
 0x3a8   :  { %v1202_v60 = vmin.f32 %v1186_v56, 0.0  ;;  %v1187_v61 = vadd.f32 %v2288_v59, %v1912_v39  ;;  %v1161_v62 = vpop.f32.mrb[7].mxu1  ;;  %vm1194_vm7 = vcmp.gt.f32.partialorder %v1186_v56, 0.0 }
 0x3a9   :  { %v1200_v63 = vmin.f32 %v1184_v58, 0.0  ;;  %v1185_v0 = vadd.f32 %v1912_v39, %v1161_v62  ;;  %vm1192_vm9 = vcmp.gt.f32.partialorder %v1184_v58, 0.0 }
 0x3aa   :  { %v1216_v1 = vmul.f32 1.442695, %v1202_v60  ;;  %v1203_v2 = vmin.f32 %v1187_v61, 0.0  ;;  %vm1195_vm8 = vcmp.gt.f32.partialorder %v1187_v61, 0.0  ;;  %v2446_v60 = vld [vmem:[%s3051_s13 + $0x8] sm:$0xff]  }
 0x3ab   :  { %v1212_v3 = vmul.f32 1.442695, %v1200_v63  ;;  %v1201_v4 = vmin.f32 %v1185_v0, 0.0  ;;  %vm1193_vm10 = vcmp.gt.f32.partialorder %v1185_v0, 0.0 }
 0x3ac   :  { %2477 = vpow2.f32 %v1216_v1  ;;  %v1218_v5 = vmul.f32 1.442695, %v1203_v2 }
 0x3ad   :  { %2479 = vpow2.f32 %v1212_v3  ;;  %v1214_v7 = vmul.f32 1.442695, %v1201_v4 }
 0x3ae   :  { %v2470_v8 = vpop.eup %2469  ;;  %2481 = vpow2.f32 %v1218_v5  ;;  %v2447_v5 = vld [vmem:[%s3051_s13 + $0x10] sm:$0xff]  }
 0x3af   :  { %v2472_v9 = vpop.eup %2471  ;;  %v1915_v10 = vadd.f32 -1.0, %v2470_v8  ;;  %2483 = vpow2.f32 %v1214_v7 }
 0x3b0   :  { %v2474_v11 = vpop.eup %2473  ;;  %v1913_v12 = vadd.f32 -1.0, %v2472_v9 }
 0x3b1   :  { %v2476_v6 = vpop.eup %2475  ;;  %v1916_v13 = vadd.f32 -1.0, %v2474_v11  ;;  %v1230_v15 = vsel %vm1190_vm2, %v1182_v41, %v1915_v10  ;;  %v2448_v11 = vld [vmem:[%s3051_s13 + $0x18] sm:$0xff]  }
 0x3b2   :  { %v1914_v14 = vadd.f32 -1.0, %v2476_v6  ;;  %v1228_v16 = vsel %vm1188_vm5, %v1180_v43, %v1913_v12  ;;  %v2501_v12 = vld [vmem:[%s3059_s27] sm:$0xff]  }
 0x3b3   :  { %v1231_v24 = vsel %vm1191_vm3, %v1183_v46, %v1916_v13  ;;  %v2438_v46 = vld [vmem:[%s3049_s14 + $0x8] sm:$0xff]   ;;  %v2449_v6 = vld [vmem:[%s3051_s13 + $0x20] sm:$0xff]  }
 0x3b4   :  { %v1229_v17 = vsel %vm1189_vm6, %v1181_v49, %v1914_v14  ;;  %v1237_v18 = vpack.c.bf16 %v1231_v24, %v1230_v15  ;;  %v2450_v13 = vld [vmem:[%s3051_s13 + $0x28] sm:$0xff]   ;;  %v2451_v14 = vld [vmem:[%s3051_s13 + $0x30] sm:$0xff]   ;;  %v2452_v15 = vld [vmem:[%s3051_s13 + $0x38] sm:$0xff]  }
 0x3b5   :  { %v1236_v19 = vpack.c.bf16 %v1229_v17, %v1228_v16  ;;  %v2502_v24 = vld [vmem:[%s3059_s27 + $0x8] sm:$0xff]   ;;  %v2503_v16 = vld [vmem:[%s3059_s27 + $0x10] sm:$0xff]   ;;  %v2504_v17 = vld [vmem:[%s3059_s27 + $0x18] sm:$0xff]  }
 0x3b6   :  { %v2478_v20 = vpop.eup %2477 }
 0x3b7   :  { %v2480_v21 = vpop.eup %2479  ;;  %v1919_v23 = vadd.f32 -1.0, %v2478_v20  ;;  %2289 = vmatprep.subr.bf16.mxu1 %v1236_v19 }
 0x3b8   :  { %v2482_v22 = vpop.eup %2481  ;;  %v1917_v25 = vadd.f32 -1.0, %v2480_v21  ;;  %2290 = vmatpush3.bf16.msra.mxu1 %v1236_v19 }
 0x3b9   :  { %v2484_v26 = vpop.eup %2483  ;;  %v1920_v27 = vadd.f32 -1.0, %v2482_v22  ;;  %2291 = vmatprep.subr.bf16.mxu1 %v1237_v18  ;;  %v1234_v39 = vsel %vm1194_vm7, %v1186_v56, %v1919_v23 }
 0x3ba   :  { %v1918_v30 = vadd.f32 -1.0, %v2484_v26  ;;  %v1232_v41 = vsel %vm1192_vm9, %v1184_v58, %v1917_v25 }
 0x3bb   :  { %v1235_v40 = vsel %vm1195_vm8, %v1187_v61, %v1920_v27 }
 0x3bc   :  { %2292 = vmatpush3.bf16.msra.mxu1 %v1237_v18  ;;  %v1233_v42 = vsel %vm1193_vm10, %v1185_v0, %v1918_v30  ;;  %v1239_v43 = vpack.c.bf16 %v1235_v40, %v1234_v39  ;;  %v1950_v18 = vld [vmem:[%s3052_s15] ss:$0 sm:$0xff] }
 0x3bd   :  { %v1238_v44 = vpack.c.bf16 %v1233_v42, %v1232_v41 }
 0x3bf   :  { %2293 = vmatprep.subr.bf16.mxu1 %v1238_v44 }
 0x3c0   :  { %2294 = vmatpush3.bf16.msra.mxu1 %v1238_v44 }
 0x3c1   :  { %2295 = vmatprep.subr.bf16.mxu1 %v1239_v43 }
 0x3c4   :  { %2296 = vmatpush3.bf16.msra.mxu1 %v1239_v43 }
 0x3c5   :  { %2305 = vmatprep.subr.bf16.mxu1 %v2437_v45 }
 0x3c7   :  { %2298 = vmatmul.mubr.msk.bf16.vlgmr.msra.gmra.mrb[8].mxu1 %vm230_vm4, %v1279_v31  ;;  %v2443_v31 = vld [vmem:[%s3049_s14 + $0x30] sm:$0xff]  }
 0x3c8   :  { %2301 = vmatprep.mubr.msk.bf16.mxu1 %vm230_vm4, %v1280_v34  ;;  %2306 = vmatpush3.bf16.msra.mxu1 %v2437_v45  ;;  %v1410_v34 = vpop.permute.xlu1 %1409 }
 0x3c9   :  { %2307 = vmatprep.subr.bf16.mxu1 %v2438_v46 }
 0x3cc   :  { %2308 = vmatpush3.bf16.msra.mxu1 %v2438_v46  ;;  %v1420_v37 = vpop.permute.xlu1 %1419 }
 0x3cd   :  { %2309 = vmatprep.subr.bf16.mxu1 %v2439_v47 }
 0x3cf   :  { %2302 = vmatmul.mubr.msk.bf16.gmra.mrb[12].mxu1 %vm230_vm4, %v1281_v38  ;;  %v1415_v38 = vpop.permute.xlu0 %1414 }
 0x3d0   :  { %2310 = vmatpush3.bf16.msra.mxu1 %v2439_v47  ;;  %v1430_v51 = vpop.permute.xlu1 %1429 }
 0x3d1   :  { %2311 = vmatprep.subr.bf16.mxu1 %v2440_v48 }
 0x3d3   :  { %v1425_v55 = vpop.permute.xlu0 %1424 }
 0x3d4   :  { %2312 = vmatpush3.bf16.msra.mxu1 %v2440_v48  ;;  %v1440_v62 = vpop.permute.xlu1 %1439 }
 0x3d5   :  { %2313 = vmatprep.subr.bf16.mxu1 %v2441_v28 }
 0x3d7   :  { %v1435_v0 = vpop.permute.xlu0 %1434 }
 0x3d8   :  { %2314 = vmatpush3.bf16.msra.mxu1 %v2441_v28 }
 0x3d9   :  { %2315 = vmatprep.subr.bf16.mxu1 %v2442_v29 }
 0x3dc   :  { %2316 = vmatpush3.bf16.msra.mxu1 %v2442_v29 }
 0x3dd   :  { %2317 = vmatprep.subr.bf16.mxu1 %v2443_v31 }
 0x3e0   :  { %2318 = vmatpush3.bf16.msra.mxu1 %v2443_v31 }
 0x3e1   :  { %2319 = vmatprep.subr.bf16.mxu1 %v2444_v32 }
 0x3e4   :  { %2320 = vmatpush3.bf16.msra.mxu1 %v2444_v32 }
 0x3e5   :  { %2329 = vmatprep.subr.bf16.mxu1 %v2445_v33 }
 0x49a   :  { %v2299_v49 = vpop.f32.mrb[8].mxu1 }
 0x49b   :  { %v1336_v50 = vpop.f32.mrb[9].mxu1  ;;  %v1444_v52 = vmul.f32 %v2299_v49, %v1415_v38 }
 0x49c   :  { %v2300_v35 = vpop.f32.mrb[10].mxu1  ;;  %v1442_v56 = vmul.f32 %v1405_v36, %v1336_v50 }
 0x49d   :  { %v1445_v53 = vmul.f32 %v2300_v35, %v1420_v37  ;;  %v1339_v54 = vpop.f32.mrb[11].mxu1 }
 0x49e   :  { %v1443_v57 = vmul.f32 %v1410_v34, %v1339_v54 }
 0x49f   :  { %v1451_v58 = vpack.c.bf16 %v1445_v53, %v1444_v52 }
 0x4a0   :  { %v1450_v59 = vpack.c.bf16 %v1443_v57, %v1442_v56 }
 0x4a2   :  { %v2303_v61 = vpop.f32.mrb[12].mxu1  ;;  %2321 = vmatprep.mubr.bf16.mxu1 %v1450_v59 }
 0x4a3   :  { %v1352_v63 = vpop.f32.mrb[13].mxu1  ;;  %2322 = vmatmul.mubr.bf16.vlgmr.msra.gmra.mrb[16].mxu1 %v1451_v58  ;;  %v1448_v2 = vmul.f32 %v2303_v61, %v1435_v0 }
 0x4a4   :  { %2330 = vmatpush3.bf16.msra.mxu1 %v2445_v33  ;;  %v2304_v1 = vpop.f32.mrb[14].mxu1  ;;  %v1446_v7 = vmul.f32 %v1425_v55, %v1352_v63 }
 0x4a5   :  { %v1449_v3 = vmul.f32 %v2304_v1, %v1440_v62  ;;  %v1355_v4 = vpop.f32.mrb[15].mxu1  ;;  %2331 = vmatprep.subr.bf16.mxu1 %v2446_v60 }
 0x4a6   :  { %v1447_v8 = vmul.f32 %v1430_v51, %v1355_v4 }
 0x4a7   :  { %v1453_v9 = vpack.c.bf16 %v1449_v3, %v1448_v2 }
 0x4a8   :  { %v1452_v10 = vpack.c.bf16 %v1447_v8, %v1446_v7  ;;  %2332 = vmatpush3.bf16.msra.mxu1 %v2446_v60 }
 0x4a9   :  { %2333 = vmatprep.subr.bf16.mxu1 %v2447_v5 }
 0x4aa   :  { %2325 = vmatprep.mubr.bf16.mxu1 %v1452_v10 }
 0x4ab   :  { %2326 = vmatmul.mubr.bf16.gmra.mrb[20].mxu1 %v1453_v9 }
 0x4ac   :  { %2334 = vmatpush3.bf16.msra.mxu1 %v2447_v5  ;;  %2345 = vmatprep.mubr.bf16.mxu1 %v2501_v12 }
 0x4ad   :  { %2335 = vmatprep.subr.bf16.mxu1 %v2448_v11 }
 0x4b0   :  { %2336 = vmatpush3.bf16.msra.mxu1 %v2448_v11 }
 0x4b1   :  { %2337 = vmatprep.subr.bf16.mxu1 %v2449_v6 }
 0x4b4   :  { %2338 = vmatpush3.bf16.msra.mxu1 %v2449_v6 }
 0x4b5   :  { %2339 = vmatprep.subr.bf16.mxu1 %v2450_v13 }
 0x4b8   :  { %2340 = vmatpush3.bf16.msra.mxu1 %v2450_v13 }
 0x4b9   :  { %2341 = vmatprep.subr.bf16.mxu1 %v2451_v14 }
 0x4bc   :  { %2342 = vmatpush3.bf16.msra.mxu1 %v2451_v14 }
 0x4bd   :  { %2343 = vmatprep.subr.bf16.mxu1 %v2452_v15 }
 0x4c0   :  { %2344 = vmatpush3.bf16.msra.mxu1 %v2452_v15 }
 0x4c3   :  { %2346 = vmatmul.mubr.bf16.vlgmr.msra.gmra.mrb[16].mxu1 %v2502_v24 }
 0x4c4   :  { %2349 = vmatprep.mubr.bf16.mxu1 %v2503_v16 }
 0x4cb   :  { %2350 = vmatmul.mubr.bf16.gmra.mrb[20].mxu1 %v2504_v17 }
 0x596   :  { %v2347_v19 = vpop.f32.mrb[16].mxu1 }
 0x597   :  { %v1721_v20 = vadd.f32 %v2347_v19, %v1950_v18  ;;  %v1681_v21 = vpop.f32.mrb[17].mxu1 }
 0x598   :  { %v1719_v23 = vadd.f32 %v1950_v18, %v1681_v21  ;;  %v2348_v22 = vpop.f32.mrb[18].mxu1 }
 0x599   :  { %v1737_v25 = vmin.f32 %v1721_v20, 0.0  ;;  %v1722_v26 = vadd.f32 %v2348_v22, %v1950_v18  ;;  %v1684_v27 = vpop.f32.mrb[19].mxu1  ;;  %vm1729_vm4 = vcmp.gt.f32.partialorder %v1721_v20, 0.0 }
 0x59a   :  { %v1735_v30 = vmin.f32 %v1719_v23, 0.0  ;;  %v1720_v39 = vadd.f32 %v1950_v18, %v1684_v27  ;;  %vm1727_vm12 = vcmp.gt.f32.partialorder %v1719_v23, 0.0 }
 0x59b   :  { %v1747_v40 = vmul.f32 1.442695, %v1737_v25  ;;  %v1738_v41 = vmin.f32 %v1722_v26, 0.0  ;;  %vm1730_vm11 = vcmp.gt.f32.partialorder %v1722_v26, 0.0 }
 0x59c   :  { %v1743_v42 = vmul.f32 1.442695, %v1735_v30  ;;  %v1736_v43 = vmin.f32 %v1720_v39, 0.0  ;;  %vm1728_vm13 = vcmp.gt.f32.partialorder %v1720_v39, 0.0 }
 0x59d   :  { %2485 = vpow2.f32 %v1747_v40  ;;  %v1749_v44 = vmul.f32 1.442695, %v1738_v41 }
 0x59e   :  { %2487 = vpow2.f32 %v1743_v42  ;;  %v1745_v45 = vmul.f32 1.442695, %v1736_v43  ;;  %v2351_v46 = vpop.f32.mrb[20].mxu1 }
 0x59f   :  { %2489 = vpow2.f32 %v1749_v44  ;;  %v1725_v47 = vadd.f32 %v2351_v46, %v1950_v18  ;;  %v1697_v48 = vpop.f32.mrb[21].mxu1 }
 0x5a0   :  { %2491 = vpow2.f32 %v1745_v45  ;;  %v1723_v28 = vadd.f32 %v1950_v18, %v1697_v48  ;;  %v2352_v29 = vpop.f32.mrb[22].mxu1 }
 0x5a1   :  { %v1741_v31 = vmin.f32 %v1725_v47, 0.0  ;;  %v1726_v32 = vadd.f32 %v2352_v29, %v1950_v18  ;;  %v1700_v33 = vpop.f32.mrb[23].mxu1  ;;  %vm1733_vm14 = vcmp.gt.f32.partialorder %v1725_v47, 0.0 }
 0x5a2   :  { %v1739_v34 = vmin.f32 %v1723_v28, 0.0  ;;  %v1724_v36 = vadd.f32 %v1950_v18, %v1700_v33  ;;  %vm1731_vm0 = vcmp.gt.f32.partialorder %v1723_v28, 0.0 }
 0x5a3   :  { %v1755_v37 = vmul.f32 1.442695, %v1741_v31  ;;  %v1742_v38 = vmin.f32 %v1726_v32, 0.0  ;;  %vm1734_vm15 = vcmp.gt.f32.partialorder %v1726_v32, 0.0 }
 0x5a4   :  { %v1751_v49 = vmul.f32 1.442695, %v1739_v34  ;;  %v1740_v50 = vmin.f32 %v1724_v36, 0.0  ;;  %vm1732_vm1 = vcmp.gt.f32.partialorder %v1724_v36, 0.0 }
 0x5a5   :  { %2493 = vpow2.f32 %v1755_v37  ;;  %v1757_v35 = vmul.f32 1.442695, %v1742_v38 }
 0x5a6   :  { %2495 = vpow2.f32 %v1751_v49  ;;  %v1753_v51 = vmul.f32 1.442695, %v1740_v50 }
 0x5a7   :  { %v2486_v52 = vpop.eup %2485  ;;  %2497 = vpow2.f32 %v1757_v35 }
 0x5a8   :  { %v2488_v53 = vpop.eup %2487  ;;  %v1953_v54 = vadd.f32 -1.0, %v2486_v52  ;;  %2499 = vpow2.f32 %v1753_v51 }
 0x5a9   :  { %v2490_v55 = vpop.eup %2489  ;;  %v1951_v56 = vadd.f32 -1.0, %v2488_v53 }
 0x5aa   :  { %v2492_v57 = vpop.eup %2491  ;;  %v1954_v58 = vadd.f32 -1.0, %v2490_v55  ;;  %v1769_v60 = vsel %vm1729_vm4, %v1721_v20, %v1953_v54 }
 0x5ab   :  { %v1952_v59 = vadd.f32 -1.0, %v2492_v57  ;;  %v1767_v62 = vsel %vm1727_vm12, %v1719_v23, %v1951_v56 }
 0x5ac   :  { %v1770_v61 = vsel %vm1730_vm11, %v1722_v26, %v1954_v58 }
 0x5ad   :  { %v2011_v63 = vpack.c.bf16 %v1770_v61, %v1769_v60  ;;  %v1768_v0 = vsel %vm1728_vm13, %v1720_v39, %v1952_v59 }
 0x5ae   :  { %v2006_v1 = vpack.c.bf16 %v1768_v0, %v1767_v62 }
 0x5af   :  { %v2494_v2 = vpop.eup %2493  ;;  %2026 = vst [vmem:[%s3053_s17 + $0x8] sm:$0xff] %v2011_v63  }
 0x5b0   :  { %v2496_v3 = vpop.eup %2495  ;;  %2007 = vst [vmem:[%s3053_s17] sm:$0xff] %v2006_v1   ;;  %v1957_v4 = vadd.f32 -1.0, %v2494_v2 }
 0x5b1   :  { %v2498_v5 = vpop.eup %2497  ;;  %v1955_v7 = vadd.f32 -1.0, %v2496_v3 }
 0x5b2   :  { %v2500_v8 = vpop.eup %2499  ;;  %v1958_v9 = vadd.f32 -1.0, %v2498_v5  ;;  %v1773_v11 = vsel %vm1733_vm14, %v1725_v47, %v1957_v4 }
 0x5b3   :  { %v1956_v10 = vadd.f32 -1.0, %v2500_v8  ;;  %v1771_v6 = vsel %vm1731_vm0, %v1723_v28, %v1955_v7 }
 0x5b4   :  { %v1774_v12 = vsel %vm1734_vm15, %v1726_v32, %v1958_v9 }
 0x5b5   :  { %v2021_v13 = vpack.c.bf16 %v1774_v12, %v1773_v11  ;;  %v1772_v14 = vsel %vm1732_vm1, %v1724_v36, %v1956_v10 }
 0x5b6   :  { %v2016_v15 = vpack.c.bf16 %v1772_v14, %v1771_v6 }
 0x5b7   :  { %2028 = vst [vmem:[%s3053_s17 + $0x18] sm:$0xff] %v2021_v13  }
 0x5b8   :  { %2027 = vst [vmem:[%s3053_s17 + $0x10] sm:$0xff] %v2016_v15  }

// kernel: ligandnet_forward.31
= control target key start
LH: loop header
LB: loop body
LE: loop exit
PB: predicated region body
PF: predicated region fallthrough
CT: control target
= control target key end

     0   :  { %18 = vsyncpa [#allocation3], 0  ;;  %s4813_s0 = inlined_call_operand.vmem [shape: s32[1,64], index: 0, kind: input, shape index: {}]   ;;  %s4814_s1 = inlined_call_operand.vmem [shape: bf16[64,128], index: 1, kind: input, shape index: {}]   ;;  %s4815_s2 = inlined_call_operand.vmem [shape: bf16[8,512], index: 2, kind: input, shape index: {}]   ;;  %s4816_s3 = inlined_call_operand.vmem [shape: bf16[128,512], index: 3, kind: input, shape index: {}]   ;;  %s4817_s4 = inlined_call_operand.vmem [shape: bf16[128,512], index: 4, kind: input, shape index: {}]   ;;  %s4818_s5 = inlined_call_operand.vmem [shape: bf16[128,512], index: 5, kind: input, shape index: {}]   ;;  %s4819_s6 = inlined_call_operand.vmem [shape: f32[1,512], index: 6, kind: input, shape index: {}]   ;;  %s4820_s7 = inlined_call_operand.vmem [shape: bf16[512,128], index: 7, kind: input, shape index: {}]   ;;  %s4821_s8 = inlined_call_operand.hbm [shape: f32[1,128], index: 8, kind: input, shape index: {}]   ;;  %s4822_s9 = inlined_call_operand.vmem [shape: bf16[128,128], index: 9, kind: input, shape index: {}]   ;;  %s4823_s10 = inlined_call_operand.vmem [shape: bf16[128,128], index: 10, kind: input, shape index: {}]   ;;  %s4824_s11 = inlined_call_operand.vmem [shape: bf16[128,128], index: 11, kind: input, shape index: {}]   ;;  %s4825_s12 = inlined_call_operand.hbm [shape: f32[1,128], index: 12, kind: input, shape index: {}]   ;;  %s4826_s13 = inlined_call_operand.vmem [shape: f32[8,128], index: 13, kind: output, shape index: {}]  }
   0x1   :  { %19 = vsyncpa [#allocation5], 0  ;;  %s3356_s25 = smov [#allocation2]   ;;  %s3357_s27 = smov [#allocation4]  }
   0x2   :  { %s42_s26 = sshll.u32 %s3356_s25, 4  ;;  %s58_s28 = sshll.u32 %s3357_s27, 4  ;;  %s43_s26 = int_to_ptr.vmem [resolvable:$true] %s42_s26  ;;  %s59_s28 = int_to_ptr.vmem [resolvable:$true] %s58_s28 }
   0x3   :  { %s3308_s14 = scalar_lea.hbm %s4821_s8, 16 }
   0x4   :  { %p3309_p0 = scmp.ne.s32.totalorder %s4821_s8, %s3308_s14  ;;  %p3312_p1 = scmp.lt.u32.totalorder %s3308_s14, %s4821_s8 }
   0x6   :  { %p3314_p2 = pnand %p3312_p1, %p3309_p0 }
   0x8   :  { %3317 = shalt.err (!%p3314_p2)
}
   0x9   :  { %s3318_s19 = scalar_lea.vmem %s43_s26, 16  ;;  %s3322_s20 = scalar_lea.vmem %s43_s26, 32 }
   0xa   :  { %p3319_p3 = scmp.ne.s32.totalorder %s43_s26, %s3318_s19  ;;  %p3323_p4 = scmp.lt.s32.totalorder %s43_s26, %s43_s26 }
   0xb   :  { %p3324_p5 = scmp.lt.s32.totalorder %s3322_s20, %s3318_s19 }
   0xd   :  { %p3325_p6 = por %p3324_p5, %p3323_p4 }
   0xf   :  { %p3326_p7 = pnand %p3325_p6, %p3319_p3 }
  0x11   :  { %3329 = shalt.err (!%p3326_p7)
}
  0x12   :  { %45 = dma.hbm_to_vmem [thread:$0]  %s4821_s8, 16, %s43_s26, [#allocation3]  }
  0x13   :  { %s3330_s25 = scalar_lea.hbm %s4825_s12, 16 }
  0x14   :  { %p3331_p8 = scmp.ne.s32.totalorder %s4825_s12, %s3330_s25  ;;  %p3334_p9 = scmp.lt.u32.totalorder %s3330_s25, %s4825_s12 }
  0x16   :  { %p3336_p10 = pnand %p3334_p9, %p3331_p8 }
  0x18   :  { %3339 = shalt.err (!%p3336_p10)
}
  0x19   :  { %s3340_s15 = scalar_lea.vmem %s59_s28, 16  ;;  %s3344_s16 = scalar_lea.vmem %s59_s28, 32 }
  0x1a   :  { %p3341_p11 = scmp.ne.s32.totalorder %s59_s28, %s3340_s15  ;;  %p3345_p12 = scmp.lt.s32.totalorder %s59_s28, %s59_s28 }
  0x1b   :  { %p3346_p13 = scmp.lt.s32.totalorder %s3344_s16, %s3340_s15 }
  0x1d   :  { %p3347_p0 = por %p3346_p13, %p3345_p12 }
  0x1f   :  { %p3348_p1 = pnand %p3347_p0, %p3341_p11 }
  0x21   :  { %3351 = shalt.err (!%p3348_p1)
}
  0x22   :  { %61 = dma.hbm_to_vmem [thread:$0]  %s4825_s12, 16, %s59_s28, [#allocation5]  }
  0x23   :  { %3352 = dma.done.wait [#allocation3], 16  }
  0x24   :  { %3353 = vsyncadd [#allocation3], 4294967280 }
  0x25   :  { %3354 = dma.done.wait [#allocation5], 16  }
  0x26   :  { %3355 = vsyncadd [#allocation5], 4294967280  ;;  %v4827_v0 = vmov 0   ;;  %v3460_v1 = vld [vmem:[%s4817_s4 + $0x4] ss:$16 sps:$4 sm:$0xff]   ;;  %vm3360_vm0 = vmmov 0  }
  0x27   :  { %343 = vmatprep.mubr.bf16.mxu0 %v4827_v0  ;;  %384 = vmatprep.mubr.bf16.mxu1 %v4827_v0  ;;  %v3465_v2 = vld [vmem:[%s4817_s4 + $0xc] ss:$16 sps:$4 sm:$0xff]   ;;  %v2950_v3 = vld [vmem:[%s4817_s4] ss:$16 sps:$4 sm:$0xff]   ;;  %v3474_v4 = vld [vmem:[%s4817_s4 + $0x8] ss:$16 sps:$4 sm:$0xff]  }
  0x28   :  { %311 = vmatprep.subr.bf16.mxu0 %v3460_v1  ;;  %352 = vmatprep.subr.bf16.mxu1 %v3465_v2  ;;  %v2952_v5 = vld [vmem:[%s4817_s4 + $0x24] ss:$16 sps:$4 sm:$0xff]   ;;  %v3484_v6 = vld [vmem:[%s4817_s4 + $0x2c] ss:$16 sps:$4 sm:$0xff]   ;;  %v2956_v7 = vld [vmem:[%s4817_s4 + $0x20] ss:$16 sps:$4 sm:$0xff]  }
  0x29   :  { %312 = vmatpush1.bf16.msra.mxu0 %v2950_v3  ;;  %353 = vmatpush1.bf16.msra.mxu1 %v3474_v4  ;;  %v3492_v8 = vld [vmem:[%s4817_s4 + $0x28] ss:$16 sps:$4 sm:$0xff]   ;;  %v2958_v9 = vld [vmem:[%s4817_s4 + $0x44] ss:$16 sps:$4 sm:$0xff]   ;;  %v3501_v10 = vld [vmem:[%s4817_s4 + $0x4c] ss:$16 sps:$4 sm:$0xff]  }
  0x2a   :  { %313 = vmatprep.subr.bf16.mxu0 %v2952_v5  ;;  %354 = vmatprep.subr.bf16.mxu1 %v3484_v6  ;;  %v2962_v11 = vld [vmem:[%s4817_s4 + $0x40] ss:$16 sps:$4 sm:$0xff]   ;;  %v3509_v12 = vld [vmem:[%s4817_s4 + $0x48] ss:$16 sps:$4 sm:$0xff]   ;;  %v2964_v13 = vld [vmem:[%s4817_s4 + $0x64] ss:$16 sps:$4 sm:$0xff]  }
  0x2b   :  { %v3519_v14 = vld [vmem:[%s4817_s4 + $0x6c] ss:$16 sps:$4 sm:$0xff]   ;;  %v2968_v15 = vld [vmem:[%s4817_s4 + $0x60] ss:$16 sps:$4 sm:$0xff]   ;;  %v3528_v16 = vld [vmem:[%s4817_s4 + $0x68] ss:$16 sps:$4 sm:$0xff]  }
  0x2c   :  { %v2970_v17 = vld [vmem:[%s4817_s4 + $0x84] ss:$16 sps:$4 sm:$0xff]   ;;  %v3537_v18 = vld [vmem:[%s4817_s4 + $0x8c] ss:$16 sps:$4 sm:$0xff]   ;;  %v3542_v19 = vld [vmem:[%s4817_s4 + $0x80] ss:$16 sps:$4 sm:$0xff]  }
  0x2d   :  { %314 = vmatpush1.bf16.msra.mxu0 %v2956_v7  ;;  %355 = vmatpush1.bf16.msra.mxu1 %v3492_v8  ;;  %v3547_v20 = vld [vmem:[%s4817_s4 + $0x88] ss:$16 sps:$4 sm:$0xff]   ;;  %v3553_v21 = vld [vmem:[%s4817_s4 + $0xa4] ss:$16 sps:$4 sm:$0xff]   ;;  %v3559_v22 = vld [vmem:[%s4817_s4 + $0xac] ss:$16 sps:$4 sm:$0xff]  }
  0x2e   :  { %315 = vmatprep.subr.bf16.mxu0 %v2958_v9  ;;  %356 = vmatprep.subr.bf16.mxu1 %v3501_v10  ;;  %v3564_v23 = vld [vmem:[%s4817_s4 + $0xa0] ss:$16 sps:$4 sm:$0xff]   ;;  %v3571_v24 = vld [vmem:[%s4817_s4 + $0xa8] ss:$16 sps:$4 sm:$0xff]   ;;  %v3576_v25 = vld [vmem:[%s4817_s4 + $0xc4] ss:$16 sps:$4 sm:$0xff]  }
  0x2f   :  { %v3583_v26 = vld [vmem:[%s4817_s4 + $0xcc] ss:$16 sps:$4 sm:$0xff]   ;;  %v3588_v27 = vld [vmem:[%s4817_s4 + $0xc0] ss:$16 sps:$4 sm:$0xff]   ;;  %v3593_v28 = vld [vmem:[%s4817_s4 + $0xc8] ss:$16 sps:$4 sm:$0xff]  }
  0x30   :  { %v3600_v29 = vld [vmem:[%s4817_s4 + $0xe4] ss:$16 sps:$4 sm:$0xff]   ;;  %v3607_v30 = vld [vmem:[%s4817_s4 + $0xec] ss:$16 sps:$4 sm:$0xff]   ;;  %v3612_v31 = vld [vmem:[%s4817_s4 + $0xe0] ss:$16 sps:$4 sm:$0xff]  }
  0x31   :  { %316 = vmatpush1.bf16.msra.mxu0 %v2962_v11  ;;  %357 = vmatpush1.bf16.msra.mxu1 %v3509_v12  ;;  %v3617_v32 = vld [vmem:[%s4817_s4 + $0xe8] ss:$16 sps:$4 sm:$0xff]   ;;  %v3624_v33 = vld [vmem:[%s4816_s3 + $0x4] ss:$16 sps:$4 sm:$0xff]   ;;  %v3631_v34 = vld [vmem:[%s4816_s3 + $0xc] ss:$16 sps:$4 sm:$0xff]  }
  0x32   :  { %317 = vmatprep.subr.bf16.mxu0 %v2964_v13  ;;  %358 = vmatprep.subr.bf16.mxu1 %v3519_v14  ;;  %v3636_v35 = vld [vmem:[%s4816_s3] ss:$16 sps:$4 sm:$0xff]   ;;  %v3641_v36 = vld [vmem:[%s4816_s3 + $0x8] ss:$16 sps:$4 sm:$0xff]   ;;  %v3648_v37 = vld [vmem:[%s4816_s3 + $0x24] ss:$16 sps:$4 sm:$0xff]  }
  0x33   :  { %v3655_v38 = vld [vmem:[%s4816_s3 + $0x2c] ss:$16 sps:$4 sm:$0xff]   ;;  %v3662_v39 = vld [vmem:[%s4816_s3 + $0x20] ss:$16 sps:$4 sm:$0xff]   ;;  %v3667_v40 = vld [vmem:[%s4816_s3 + $0x28] ss:$16 sps:$4 sm:$0xff]  }
  0x34   :  { %v3674_v41 = vld [vmem:[%s4816_s3 + $0x44] ss:$16 sps:$4 sm:$0xff]   ;;  %v3681_v42 = vld [vmem:[%s4816_s3 + $0x4c] ss:$16 sps:$4 sm:$0xff]   ;;  %v3688_v43 = vld [vmem:[%s4816_s3 + $0x40] ss:$16 sps:$4 sm:$0xff]  }
  0x35   :  { %318 = vmatpush1.bf16.msra.mxu0 %v2968_v15  ;;  %359 = vmatpush1.bf16.msra.mxu1 %v3528_v16  ;;  %v3693_v44 = vld [vmem:[%s4816_s3 + $0x48] ss:$16 sps:$4 sm:$0xff]   ;;  %v3700_v45 = vld [vmem:[%s4816_s3 + $0x64] ss:$16 sps:$4 sm:$0xff]   ;;  %v3707_v46 = vld [vmem:[%s4816_s3 + $0x6c] ss:$16 sps:$4 sm:$0xff]  }
  0x36   :  { %319 = vmatprep.subr.bf16.mxu0 %v2970_v17  ;;  %360 = vmatprep.subr.bf16.mxu1 %v3537_v18  ;;  %v3712_v47 = vld [vmem:[%s4816_s3 + $0x60] ss:$16 sps:$4 sm:$0xff]   ;;  %v3717_v48 = vld [vmem:[%s4816_s3 + $0x68] ss:$16 sps:$4 sm:$0xff]   ;;  %v3724_v49 = vld [vmem:[%s4816_s3 + $0x84] ss:$16 sps:$4 sm:$0xff]  }
  0x37   :  { %4890 = vst [vmem:[#allocation8_spill] sm:$0xff] %v3717_v48  ;;  %4891 = vst [vmem:[#allocation9_spill] sm:$0xff] %v3724_v49  ;;  %v3731_v50 = vld [vmem:[%s4816_s3 + $0x8c] ss:$16 sps:$4 sm:$0xff]   ;;  %v3736_v51 = vld [vmem:[%s4816_s3 + $0x80] ss:$16 sps:$4 sm:$0xff]  }
  0x38   :  { %4892 = vst [vmem:[#allocation10_spill] sm:$0xff] %v3731_v50  ;;  %4893 = vst [vmem:[#allocation11_spill] sm:$0xff] %v3736_v51  ;;  %v3741_v52 = vld [vmem:[%s4816_s3 + $0x88] ss:$16 sps:$4 sm:$0xff]   ;;  %v3748_v53 = vld [vmem:[%s4816_s3 + $0xa4] ss:$16 sps:$4 sm:$0xff]  }
  0x39   :  { %320 = vmatpush1.bf16.msra.mxu0 %v3542_v19  ;;  %361 = vmatpush1.bf16.msra.mxu1 %v3547_v20  ;;  %4894 = vst [vmem:[#allocation12_spill] sm:$0xff] %v3741_v52  ;;  %4895 = vst [vmem:[#allocation13_spill] sm:$0xff] %v3748_v53  ;;  %v3755_v54 = vld [vmem:[%s4816_s3 + $0xac] ss:$16 sps:$4 sm:$0xff]   ;;  %v3760_v55 = vld [vmem:[%s4816_s3 + $0xa0] ss:$16 sps:$4 sm:$0xff]  }
  0x3a   :  { %321 = vmatprep.subr.bf16.mxu0 %v3553_v21  ;;  %362 = vmatprep.subr.bf16.mxu1 %v3559_v22  ;;  %4896 = vst [vmem:[#allocation14_spill] sm:$0xff] %v3755_v54  ;;  %4897 = vst [vmem:[#allocation15_spill] sm:$0xff] %v3760_v55  ;;  %v3765_v56 = vld [vmem:[%s4816_s3 + $0xa8] ss:$16 sps:$4 sm:$0xff]   ;;  %v3772_v57 = vld [vmem:[%s4816_s3 + $0xc4] ss:$16 sps:$4 sm:$0xff]  }
  0x3b   :  { %4898 = vst [vmem:[#allocation16_spill] sm:$0xff] %v3765_v56  ;;  %4899 = vst [vmem:[#allocation17_spill] sm:$0xff] %v3772_v57  ;;  %v3779_v58 = vld [vmem:[%s4816_s3 + $0xcc] ss:$16 sps:$4 sm:$0xff]   ;;  %v3784_v59 = vld [vmem:[%s4816_s3 + $0xc0] ss:$16 sps:$4 sm:$0xff]  }
  0x3c   :  { %4900 = vst [vmem:[#allocation18_spill] sm:$0xff] %v3779_v58  ;;  %4901 = vst [vmem:[#allocation19_spill] sm:$0xff] %v3784_v59  ;;  %v3789_v60 = vld [vmem:[%s4816_s3 + $0xc8] ss:$16 sps:$4 sm:$0xff]   ;;  %v3796_v61 = vld [vmem:[%s4816_s3 + $0xe4] ss:$16 sps:$4 sm:$0xff]  }
  0x3d   :  { %322 = vmatpush1.bf16.msra.mxu0 %v3564_v23  ;;  %363 = vmatpush1.bf16.msra.mxu1 %v3571_v24  ;;  %4902 = vst [vmem:[#allocation20_spill] sm:$0xff] %v3789_v60  ;;  %4903 = vst [vmem:[#allocation21_spill] sm:$0xff] %v3796_v61  ;;  %v3803_v62 = vld [vmem:[%s4816_s3 + $0xec] ss:$16 sps:$4 sm:$0xff]   ;;  %v3808_v63 = vld [vmem:[%s4816_s3 + $0xe0] ss:$16 sps:$4 sm:$0xff]  }
  0x3e   :  { %323 = vmatprep.subr.bf16.mxu0 %v3576_v25  ;;  %364 = vmatprep.subr.bf16.mxu1 %v3583_v26  ;;  %4904 = vst [vmem:[#allocation22_spill] sm:$0xff] %v3803_v62  ;;  %4905 = vst [vmem:[#allocation23_spill] sm:$0xff] %v3808_v63  ;;  %v3813_v3 = vld [vmem:[%s4816_s3 + $0xe8] ss:$16 sps:$4 sm:$0xff]   ;;  %v3820_v5 = vld [vmem:[%s4818_s5 + $0x4] ss:$16 sps:$4 sm:$0xff]  }
  0x3f   :  { %4906 = vst [vmem:[#allocation24_spill] sm:$0xff] %v3813_v3  ;;  %4907 = vst [vmem:[#allocation25_spill] sm:$0xff] %v3820_v5  ;;  %v3827_v7 = vld [vmem:[%s4818_s5 + $0xc] ss:$16 sps:$4 sm:$0xff]   ;;  %v3832_v9 = vld [vmem:[%s4818_s5] ss:$16 sps:$4 sm:$0xff]  }
  0x40   :  { %4908 = vst [vmem:[#allocation26_spill] sm:$0xff] %v3827_v7  ;;  %4909 = vst [vmem:[#allocation27_spill] sm:$0xff] %v3832_v9  ;;  %v3837_v11 = vld [vmem:[%s4818_s5 + $0x8] ss:$16 sps:$4 sm:$0xff]   ;;  %v3842_v13 = vld [vmem:[%s4818_s5 + $0x24] ss:$16 sps:$4 sm:$0xff]  }
  0x41   :  { %324 = vmatpush1.bf16.msra.mxu0 %v3588_v27  ;;  %365 = vmatpush1.bf16.msra.mxu1 %v3593_v28  ;;  %4910 = vst [vmem:[#allocation28_spill] sm:$0xff] %v3837_v11  ;;  %4911 = vst [vmem:[#allocation29_spill] sm:$0xff] %v3842_v13  ;;  %v3847_v15 = vld [vmem:[%s4818_s5 + $0x2c] ss:$16 sps:$4 sm:$0xff]   ;;  %v3856_v17 = vld [vmem:[%s4818_s5 + $0x20] ss:$16 sps:$4 sm:$0xff]  }
  0x42   :  { %325 = vmatprep.subr.bf16.mxu0 %v3600_v29  ;;  %366 = vmatprep.subr.bf16.mxu1 %v3607_v30  ;;  %4912 = vst [vmem:[#allocation30_spill] sm:$0xff] %v3847_v15  ;;  %4913 = vst [vmem:[#allocation31_spill] sm:$0xff] %v3856_v17  ;;  %vm1029_vm2 = vcmask 523264  }
  0x45   :  { %326 = vmatpush1.bf16.msra.mxu0 %v3612_v31  ;;  %367 = vmatpush1.bf16.msra.mxu1 %v3617_v32 }
  0x46   :  { %553 = vmatprep.subr.bf16.mxu0 %v3624_v33  ;;  %594 = vmatprep.subr.bf16.mxu1 %v3631_v34 }
  0x48   :  { %344 = vmatmul.mubr.bf16.vlgmr.msra.gmra.mrb[0].mxu0 %v4827_v0  ;;  %385 = vmatmul.mubr.bf16.vlgmr.msra.gmra.mrb[0].mxu1 %v4827_v0 }
  0x49   :  { %554 = vmatpush1.bf16.msra.mxu0 %v3636_v35  ;;  %595 = vmatpush1.bf16.msra.mxu1 %v3641_v36 }
  0x4a   :  { %555 = vmatprep.subr.bf16.mxu0 %v3648_v37  ;;  %596 = vmatprep.subr.bf16.mxu1 %v3655_v38 }
  0x4b   :  { %585 = vmatprep.mubr.bf16.mxu0 %v4827_v0  ;;  %626 = vmatprep.mubr.bf16.mxu1 %v4827_v0  ;;  %v3861_v0 = vld [vmem:[%s4818_s5 + $0x28] ss:$16 sps:$4 sm:$0xff]  }
  0x4c   :  { %4914 = vst [vmem:[#allocation32_spill] sm:$0xff] %v3861_v0 }
  0x4d   :  { %556 = vmatpush1.bf16.msra.mxu0 %v3662_v39  ;;  %597 = vmatpush1.bf16.msra.mxu1 %v3667_v40 }
  0x4e   :  { %557 = vmatprep.subr.bf16.mxu0 %v3674_v41  ;;  %598 = vmatprep.subr.bf16.mxu1 %v3681_v42 }
  0x51   :  { %558 = vmatpush1.bf16.msra.mxu0 %v3688_v43  ;;  %599 = vmatpush1.bf16.msra.mxu1 %v3693_v44 }
  0x52   :  { %559 = vmatprep.subr.bf16.mxu0 %v3700_v45  ;;  %600 = vmatprep.subr.bf16.mxu1 %v3707_v46 }
  0x55   :  { %560 = vmatpush1.bf16.msra.mxu0 %v3712_v47  ;;  %601 = vmatpush1.bf16.msra.mxu1 %v3717_v48 }
  0x56   :  { %561 = vmatprep.subr.bf16.mxu0 %v3724_v49  ;;  %602 = vmatprep.subr.bf16.mxu1 %v3731_v50 }
  0x59   :  { %562 = vmatpush1.bf16.msra.mxu0 %v3736_v51  ;;  %603 = vmatpush1.bf16.msra.mxu1 %v3741_v52 }
  0x5a   :  { %563 = vmatprep.subr.bf16.mxu0 %v3748_v53  ;;  %604 = vmatprep.subr.bf16.mxu1 %v3755_v54  ;;  %v78_v53 = vlaneseq }
  0x5c   :  { %v4061_v52 = vshrl.u32 %v78_v53, 7 }
  0x5d   :  { %564 = vmatpush1.bf16.msra.mxu0 %v3760_v55  ;;  %605 = vmatpush1.bf16.msra.mxu1 %v3765_v56 }
  0x5e   :  { %565 = vmatprep.subr.bf16.mxu0 %v3772_v57  ;;  %606 = vmatprep.subr.bf16.mxu1 %v3779_v58 }
  0x61   :  { %566 = vmatpush1.bf16.msra.mxu0 %v3784_v59  ;;  %607 = vmatpush1.bf16.msra.mxu1 %v3789_v60 }
  0x62   :  { %567 = vmatprep.subr.bf16.mxu0 %v3796_v61  ;;  %608 = vmatprep.subr.bf16.mxu1 %v3803_v62  ;;  %v4915_v62 = vmov 0  }
  0x65   :  { %568 = vmatpush1.bf16.msra.mxu0 %v3808_v63  ;;  %609 = vmatpush1.bf16.msra.mxu1 %v3813_v3  ;;  %v3882_v3 = vld [vmem:[%s4818_s5 + $0x40] ss:$16 sps:$4 sm:$0xff]   ;;  %v3887_v63 = vld [vmem:[%s4818_s5 + $0x48] ss:$16 sps:$4 sm:$0xff]  }
  0x66   :  { %827 = vmatprep.subr.bf16.mxu0 %v3820_v5  ;;  %868 = vmatprep.subr.bf16.mxu1 %v3827_v7  ;;  %v3868_v5 = vld [vmem:[%s4818_s5 + $0x44] ss:$16 sps:$4 sm:$0xff]   ;;  %v3873_v7 = vld [vmem:[%s4818_s5 + $0x4c] ss:$16 sps:$4 sm:$0xff]   ;;  %4918 = vst [vmem:[#allocation35_spill] sm:$0xff] %v3882_v3  ;;  %4919 = vst [vmem:[#allocation36_spill] sm:$0xff] %v3887_v63 }
  0x67   :  { %4916 = vst [vmem:[#allocation33_spill] sm:$0xff] %v3868_v5  ;;  %4917 = vst [vmem:[#allocation34_spill] sm:$0xff] %v3873_v7 }
  0x68   :  { %586 = vmatmul.mubr.bf16.vlgmr.msra.gmra.mrb[4].mxu0 %v4915_v62  ;;  %627 = vmatmul.mubr.bf16.vlgmr.msra.gmra.mrb[4].mxu1 %v4915_v62 }
  0x69   :  { %828 = vmatpush1.bf16.msra.mxu0 %v3832_v9  ;;  %869 = vmatpush1.bf16.msra.mxu1 %v3837_v11  ;;  %v3908_v11 = vld [vmem:[%s4818_s5 + $0x60] ss:$16 sps:$4 sm:$0xff]   ;;  %v3913_v9 = vld [vmem:[%s4818_s5 + $0x68] ss:$16 sps:$4 sm:$0xff]  }
  0x6a   :  { %829 = vmatprep.subr.bf16.mxu0 %v3842_v13  ;;  %870 = vmatprep.subr.bf16.mxu1 %v3847_v15  ;;  %v3894_v13 = vld [vmem:[%s4818_s5 + $0x64] ss:$16 sps:$4 sm:$0xff]   ;;  %v3899_v15 = vld [vmem:[%s4818_s5 + $0x6c] ss:$16 sps:$4 sm:$0xff]   ;;  %4922 = vst [vmem:[#allocation39_spill] sm:$0xff] %v3908_v11  ;;  %4923 = vst [vmem:[#allocation40_spill] sm:$0xff] %v3913_v9 }
  0x6b   :  { %859 = vmatprep.mubr.bf16.mxu0 %v4915_v62  ;;  %900 = vmatprep.mubr.bf16.mxu1 %v4915_v62  ;;  %4920 = vst [vmem:[#allocation37_spill] sm:$0xff] %v3894_v13  ;;  %4921 = vst [vmem:[#allocation38_spill] sm:$0xff] %v3899_v15 }
  0x6d   :  { %830 = vmatpush1.bf16.msra.mxu0 %v3856_v17  ;;  %871 = vmatpush1.bf16.msra.mxu1 %v3861_v0  ;;  %v3918_v17 = vld [vmem:[%s4818_s5 + $0x84] ss:$16 sps:$4 sm:$0xff]   ;;  %v3937_v0 = vld [vmem:[%s4818_s5 + $0x88] ss:$16 sps:$4 sm:$0xff]  }
  0x6e   :  { %831 = vmatprep.subr.bf16.mxu0 %v3868_v5  ;;  %872 = vmatprep.subr.bf16.mxu1 %v3873_v7  ;;  %4924 = vst [vmem:[#allocation41_spill] sm:$0xff] %v3918_v17  ;;  %v3923_v5 = vld [vmem:[%s4818_s5 + $0x8c] ss:$16 sps:$4 sm:$0xff]   ;;  %v3932_v7 = vld [vmem:[%s4818_s5 + $0x80] ss:$16 sps:$4 sm:$0xff]   ;;  %4927 = vst [vmem:[#allocation44_spill] sm:$0xff] %v3937_v0 }
  0x6f   :  { %4925 = vst [vmem:[#allocation42_spill] sm:$0xff] %v3923_v5  ;;  %4926 = vst [vmem:[#allocation43_spill] sm:$0xff] %v3932_v7 }
  0x71   :  { %832 = vmatpush1.bf16.msra.mxu0 %v3882_v3  ;;  %873 = vmatpush1.bf16.msra.mxu1 %v3887_v63  ;;  %v3942_v3 = vld [vmem:[%s4818_s5 + $0xa4] ss:$16 sps:$4 sm:$0xff]   ;;  %v3961_v63 = vld [vmem:[%s4818_s5 + $0xa8] ss:$16 sps:$4 sm:$0xff]  }
  0x72   :  { %833 = vmatprep.subr.bf16.mxu0 %v3894_v13  ;;  %874 = vmatprep.subr.bf16.mxu1 %v3899_v15  ;;  %4928 = vst [vmem:[#allocation45_spill] sm:$0xff] %v3942_v3  ;;  %v3947_v13 = vld [vmem:[%s4818_s5 + $0xac] ss:$16 sps:$4 sm:$0xff]   ;;  %v3956_v15 = vld [vmem:[%s4818_s5 + $0xa0] ss:$16 sps:$4 sm:$0xff]   ;;  %4931 = vst [vmem:[#allocation48_spill] sm:$0xff] %v3961_v63 }
  0x73   :  { %4929 = vst [vmem:[#allocation46_spill] sm:$0xff] %v3947_v13  ;;  %4930 = vst [vmem:[#allocation47_spill] sm:$0xff] %v3956_v15 }
  0x75   :  { %834 = vmatpush1.bf16.msra.mxu0 %v3908_v11  ;;  %875 = vmatpush1.bf16.msra.mxu1 %v3913_v9  ;;  %v3966_v11 = vld [vmem:[%s4818_s5 + $0xc4] ss:$16 sps:$4 sm:$0xff]   ;;  %v3985_v9 = vld [vmem:[%s4818_s5 + $0xc8] ss:$16 sps:$4 sm:$0xff]  }
  0x76   :  { %835 = vmatprep.subr.bf16.mxu0 %v3918_v17  ;;  %876 = vmatprep.subr.bf16.mxu1 %v3923_v5  ;;  %4932 = vst [vmem:[#allocation49_spill] sm:$0xff] %v3966_v11  ;;  %v3971_v17 = vld [vmem:[%s4818_s5 + $0xcc] ss:$16 sps:$4 sm:$0xff]   ;;  %v3980_v5 = vld [vmem:[%s4818_s5 + $0xc0] ss:$16 sps:$4 sm:$0xff]   ;;  %4935 = vst [vmem:[#allocation52_spill] sm:$0xff] %v3985_v9 }
  0x77   :  { %4933 = vst [vmem:[#allocation50_spill] sm:$0xff] %v3971_v17  ;;  %4934 = vst [vmem:[#allocation51_spill] sm:$0xff] %v3980_v5 }
  0x79   :  { %836 = vmatpush1.bf16.msra.mxu0 %v3932_v7  ;;  %877 = vmatpush1.bf16.msra.mxu1 %v3937_v0  ;;  %v3990_v7 = vld [vmem:[%s4818_s5 + $0xe4] ss:$16 sps:$4 sm:$0xff]   ;;  %v4009_v0 = vld [vmem:[%s4818_s5 + $0xe8] ss:$16 sps:$4 sm:$0xff]  }
  0x7a   :  { %837 = vmatprep.subr.bf16.mxu0 %v3942_v3  ;;  %878 = vmatprep.subr.bf16.mxu1 %v3947_v13  ;;  %4936 = vst [vmem:[#allocation53_spill] sm:$0xff] %v3990_v7  ;;  %v3995_v3 = vld [vmem:[%s4818_s5 + $0xec] ss:$16 sps:$4 sm:$0xff]   ;;  %v4004_v13 = vld [vmem:[%s4818_s5 + $0xe0] ss:$16 sps:$4 sm:$0xff]   ;;  %4939 = vst [vmem:[#allocation56_spill] sm:$0xff] %v4009_v0 }
  0x7b   :  { %4937 = vst [vmem:[#allocation54_spill] sm:$0xff] %v3995_v3  ;;  %4938 = vst [vmem:[#allocation55_spill] sm:$0xff] %v4004_v13 }
  0x7d   :  { %838 = vmatpush1.bf16.msra.mxu0 %v3956_v15  ;;  %879 = vmatpush1.bf16.msra.mxu1 %v3961_v63 }
  0x7e   :  { %839 = vmatprep.subr.bf16.mxu0 %v3966_v11  ;;  %880 = vmatprep.subr.bf16.mxu1 %v3971_v17  ;;  %v4022_v17 = vld [vmem:[%s4814_s1] sm:$0xff]  }
  0x7f   :  { %4940 = vst [vmem:[#allocation57_spill] sm:$0xff] %v4022_v17 }
  0x81   :  { %840 = vmatpush1.bf16.msra.mxu0 %v3980_v5  ;;  %881 = vmatpush1.bf16.msra.mxu1 %v3985_v9  ;;  %v4870_v5 = vmov 0.0  }
  0x82   :  { %841 = vmatprep.subr.bf16.mxu0 %v3990_v7  ;;  %882 = vmatprep.subr.bf16.mxu1 %v3995_v3 }
  0x85   :  { %842 = vmatpush1.bf16.msra.mxu0 %v4004_v13  ;;  %883 = vmatpush1.bf16.msra.mxu1 %v4009_v0  ;;  %v4033_v0 = vld [vmem:[%s4814_s1 + $0x8] sm:$0xff]  }
  0x86   :  { %2809 = vmatprep.subr.bf16.mxu0 %v4870_v5  ;;  %2821 = vmatprep.subr.bf16.mxu1 %v4870_v5  ;;  %4941 = vst [vmem:[#allocation58_spill] sm:$0xff] %v4033_v0 }
  0x88   :  { %860 = vmatmul.mubr.bf16.vlgmr.msra.gmra.mrb[8].mxu0 %v4915_v62  ;;  %901 = vmatmul.mubr.bf16.vlgmr.msra.gmra.mrb[8].mxu1 %v4915_v62 }
  0x89   :  { %2822 = vmatpush3.bf16.msra.mxu1 %v4022_v17  ;;  %2817 = vmatprep.mubr.msk.bf16.mxu0 %vm3360_vm0, %v4870_v5 }
  0x8a   :  { %2823 = vmatprep.subr.bf16.mxu1 %v4870_v5  ;;  %2829 = vmatprep.mubr.msk.bf16.mxu1 %vm3360_vm0, %v4870_v5 }
  0x8d   :  { %2824 = vmatpush3.bf16.msra.mxu1 %v4033_v0 }
  0x8e   :  { %2810 = vmatpush3.bf16.xpose.msra.mxu0 %v4022_v17  ;;  %2825 = vmatprep.subr.bf16.mxu1 %v4870_v5  ;;  %v4042_v17 = vld [vmem:[%s4814_s1 + $0x10] sm:$0xff]  }
  0x8f   :  { %2811 = vmatprep.subr.bf16.mxu0 %v4870_v5  ;;  %4942 = vst [vmem:[#allocation59_spill] sm:$0xff] %v4042_v17 }
  0x91   :  { %2826 = vmatpush3.bf16.msra.mxu1 %v4042_v17 }
  0x92   :  { %2827 = vmatprep.subr.bf16.mxu1 %v4870_v5 }
  0x96   :  { %2812 = vmatpush3.bf16.xpose.msra.mxu0 %v4033_v0  ;;  %v4055_v0 = vld [vmem:[%s4814_s1 + $0x18] sm:$0xff]  }
  0x97   :  { %2813 = vmatprep.subr.bf16.mxu0 %v4870_v5  ;;  %4943 = vst [vmem:[#allocation60_spill] sm:$0xff] %v4055_v0  ;;  %2828 = vmatpush3.bf16.msra.mxu1 %v4055_v0 }
  0x98   :  { %1088 = vmatprep.subr.bf16.mxu1 %v3460_v1 }
  0x9e   :  { %2814 = vmatpush3.bf16.xpose.msra.mxu0 %v4042_v17 }
  0x9f   :  { %2815 = vmatprep.subr.bf16.mxu0 %v4870_v5 }
  0xa6   :  { %2816 = vmatpush3.bf16.xpose.msra.mxu0 %v4055_v0 }
  0xa7   :  { %1129 = vmatprep.subr.bf16.mxu0 %v3465_v2 }
 0x11b   :  { %v345_v13 = vpop.f32.mrb[0].mxu0  ;;  %v386_v17 = vpop.f32.mrb[0].mxu1 }
 0x11c   :  { %v347_v3 = vpop.f32.mrb[1].mxu0  ;;  %v388_v7 = vpop.f32.mrb[1].mxu1 }
 0x11d   :  { %v349_v9 = vpop.f32.mrb[2].mxu0  ;;  %v390_v11 = vpop.f32.mrb[2].mxu1 }
 0x11e   :  { %v350_v5 = vpop.f32.mrb[3].mxu0  ;;  %v391_v63 = vpop.f32.mrb[3].mxu1  ;;  %v917_v9 = vsub.s32 0, %v4061_v52 }
 0x11f   :  { %v913_v63 = vld [vmem:[%s4819_s6] sm:$0xf]  ;;  %v921_v5 = vsub.s32 1, %v4061_v52 }
 0x13b   :  { %v587_v15 = vpop.f32.mrb[4].mxu0  ;;  %v628_v61 = vpop.f32.mrb[4].mxu1 }
 0x13c   :  { %v588_v60 = vadd.f32 %v587_v15, %v345_v13  ;;  %v629_v59 = vadd.f32 %v628_v61, %v386_v17  ;;  %v589_v58 = vpop.f32.mrb[5].mxu0  ;;  %v630_v57 = vpop.f32.mrb[5].mxu1  ;;  %v4068_v61 = vrot.slane %v913_v63, %v917_v9  ;;  %v929_v13 = vsub.s32 3, %v4061_v52 }
 0x13d   :  { %v590_v56 = vadd.f32 %v589_v58, %v347_v3  ;;  %v631_v1 = vadd.f32 %v630_v57, %v388_v7  ;;  %v591_v55 = vpop.f32.mrb[6].mxu0  ;;  %v632_v0 = vpop.f32.mrb[6].mxu1  ;;  %v4070_v57 = vrot.slane %v913_v63, %v921_v5 }
 0x13e   :  { %v592_v54 = vpop.f32.mrb[7].mxu0  ;;  %v633_v2 = vpop.f32.mrb[7].mxu1  ;;  %v4075_v5 = vrot.slane %v913_v63, %v929_v13 }
 0x15b   :  { %v861_v11 = vpop.f32.mrb[8].mxu0  ;;  %v902_v58 = vpop.f32.mrb[8].mxu1 }
 0x15c   :  { %v909_v0 = vadd.f32 %v861_v11, %v588_v60  ;;  %v911_v54 = vadd.f32 %v902_v58, %v629_v59  ;;  %v863_v55 = vpop.f32.mrb[9].mxu0  ;;  %v904_v3 = vpop.f32.mrb[9].mxu1  ;;  %v925_v59 = vsub.s32 2, %v4061_v52 }
 0x15d   :  { %v910_v53 = vadd.f32 %v863_v55, %v590_v56  ;;  %v912_v7 = vadd.f32 %v904_v3, %v631_v1  ;;  %v865_v15 = vpop.f32.mrb[10].mxu0  ;;  %v906_v17 = vpop.f32.mrb[10].mxu1 }
 0x15e   :  { %v935_v2 = vadd.f32 %v4068_v61, %v909_v0  ;;  %v866_v51 = vpop.f32.mrb[11].mxu0  ;;  %v907_v50 = vpop.f32.mrb[11].mxu1  ;;  %v4079_v60 = vrot.slane %v913_v63, %v925_v59  ;;  %v4135_v59 = vld [vmem:[%s4817_s4 + $0x24] ss:$16 sps:$4 sm:$0xff]  }
 0x15f   :  { %v936_v9 = vadd.f32 %v4070_v57, %v910_v53  ;;  %v938_v56 = vadd.f32 %v4075_v5, %v912_v7 }
 0x160   :  { %v2630_v49 = vmul.f32 -1.442695, %v935_v2  ;;  %v937_v11 = vadd.f32 %v4079_v60, %v911_v54 }
 0x161   :  { %v2631_v48 = vmul.f32 -1.442695, %v936_v9  ;;  %v2632_v1 = vmul.f32 -1.442695, %v938_v56  ;;  %v4128_v9 = vld [vmem:[%s4817_s4] ss:$16 sps:$4 sm:$0xff]  }
 0x162   :  { %3154 = vpow2.f32 %v2630_v49  ;;  %v4141_v56 = vld [vmem:[%s4817_s4 + $0x20] ss:$16 sps:$4 sm:$0xff]  }
 0x163   :  { %3156 = vpow2.f32 %v2631_v48 }
 0x164   :  { %3158 = vpow2.f32 %v2632_v1  ;;  %v4147_v1 = vld [vmem:[%s4817_s4 + $0x44] ss:$16 sps:$4 sm:$0xff]  }
 0x165   :  { %3160 = vtanh.f32 %v937_v11  ;;  %v4153_v11 = vld [vmem:[%s4817_s4 + $0x40] ss:$16 sps:$4 sm:$0xff]  }
 0x16c   :  { %v3155_v58 = vpop.eup %3154 }
 0x16d   :  { %v3157_v51 = vpop.eup %3156  ;;  %v942_v50 = vadd.f32 1.0, %v3155_v58  ;;  %v4159_v58 = vld [vmem:[%s4817_s4 + $0x64] ss:$16 sps:$4 sm:$0xff]  }
 0x16e   :  { %v948_v0 = vadd.f32 1.0, %v3157_v51  ;;  %v3159_v55 = vpop.eup %3158  ;;  %v4165_v51 = vld [vmem:[%s4817_s4 + $0x60] ss:$16 sps:$4 sm:$0xff]  }
 0x16f   :  { %3162 = vrcp.f32 %v942_v50  ;;  %v3161_v49 = vpop.eup %3160  ;;  %v955_v13 = vadd.f32 1.0, %v3159_v55  ;;  %v4171_v50 = vld [vmem:[%s4817_s4 + $0x84] ss:$16 sps:$4 sm:$0xff]  }
 0x170   :  { %3164 = vrcp.f32 %v948_v0 }
 0x171   :  { %3166 = vrcp.f32 %v955_v13  ;;  %v4963_v13 = vld [vmem:[#allocation26_spill] sm:$0xff] }
 0x179   :  { %v3163_v3 = vpop.eup %3162 }
 0x17a   :  { %v3165_v53 = vpop.eup %3164  ;;  %v959_v48 = vmul.f32 %v3163_v3, %v3161_v49 }
 0x17b   :  { %v958_v7 = vmul.f32 0.0, %v3165_v53  ;;  %v3167_v54 = vpop.eup %3166 }
 0x17d   :  { %v4082_v63 = vadd.f32 %v959_v48, %v958_v7  ;;  %v4964_v7 = vld [vmem:[#allocation27_spill] sm:$0xff] }
 0x17f   :  { %3168 = vtanh.f32 %v4082_v63 }
 0x189   :  { %v3169_v15 = vpop.eup %3168 }
 0x18a   :  { %v962_v17 = vmul.f32 %v3169_v15, %v3167_v54  ;;  %v4965_v54 = vld [vmem:[#allocation28_spill] sm:$0xff]  ;;  %v4966_v15 = vld [vmem:[#allocation29_spill] sm:$0xff] }
 0x18c   :  { %v4085_v2 = vpack.c.bf16 %v962_v17, %v962_v17  ;;  %v4967_v17 = vld [vmem:[#allocation30_spill] sm:$0xff] }
 0x18e   :  { %2818 = vmatmul.mubr.bf16.vlgmr.msra.gmra.mrb[12].mxu0 %v4085_v2 }
 0x18f   :  { %1130 = vmatpush1.bf16.msra.mxu0 %v3474_v4  ;;  %1161 = vmatprep.mubr.bf16.mxu0 %v4915_v62  ;;  %v4108_v4 = vld [vmem:[%s4813_s0] ss:$0 sm:$0xff] }
 0x190   :  { %1131 = vmatprep.subr.bf16.mxu0 %v3484_v6  ;;  %vm84_vm1 = vcmp.eq.s32.totalorder %v4108_v4, %v4061_v52 }
 0x193   :  { %1132 = vmatpush1.bf16.msra.mxu0 %v3492_v8 }
 0x194   :  { %1133 = vmatprep.subr.bf16.mxu0 %v3501_v10 }
 0x197   :  { %1134 = vmatpush1.bf16.msra.mxu0 %v3509_v12 }
 0x198   :  { %1135 = vmatprep.subr.bf16.mxu0 %v3519_v14 }
 0x19b   :  { %1136 = vmatpush1.bf16.msra.mxu0 %v3528_v16 }
 0x19c   :  { %1137 = vmatprep.subr.bf16.mxu0 %v3537_v18 }
 0x19f   :  { %1138 = vmatpush1.bf16.msra.mxu0 %v3547_v20 }
 0x1a0   :  { %1139 = vmatprep.subr.bf16.mxu0 %v3559_v22 }
 0x1a3   :  { %1140 = vmatpush1.bf16.msra.mxu0 %v3571_v24  ;;  %v4944_v24 = vmov 0.0  }
 0x1a4   :  { %1141 = vmatprep.subr.bf16.mxu0 %v3583_v26  ;;  %v4120_v26 = vsel %vm84_vm1, 1.0, %v4944_v24 }
 0x1a7   :  { %1142 = vmatpush1.bf16.msra.mxu0 %v3593_v28 }
 0x1a8   :  { %1143 = vmatprep.subr.bf16.mxu0 %v3607_v30 }
 0x1ab   :  { %1144 = vmatpush1.bf16.msra.mxu0 %v3617_v32 }
 0x1ac   :  { %1211 = vmatprep.subr.bf16.mxu0 %v3631_v34 }
 0x261   :  { %v1022_v6 = vpop.f32.mrb[12].mxu0 }
 0x262   :  { %v1028_v8 = vsel %vm84_vm1, %v1022_v6, -1e+30  ;;  %v2819_v10 = vpop.f32.mrb[13].mxu0  ;;  %v4968_v6 = vld [vmem:[#allocation31_spill] sm:$0xff] }
 0x263   :  { %v1025_v12 = vpop.f32.mrb[14].mxu0  ;;  %v1030_v14 = vsel %vm1029_vm2, %v1028_v8, -inf  ;;  %v4970_v10 = vld [vmem:[#allocation33_spill] sm:$0xff] }
 0x264   :  { %1031 = vmax.xlane.f32.xlu0 %v1030_v14  ;;  %v2820_v16 = vpop.f32.mrb[15].mxu0  ;;  %v4971_v12 = vld [vmem:[#allocation34_spill] sm:$0xff]  ;;  %v4972_v14 = vld [vmem:[#allocation35_spill] sm:$0xff] }
 0x265   :  { %v4973_v16 = vld [vmem:[#allocation36_spill] sm:$0xff] }
 0x2f1   :  { %v1032_v18 = vpop.xlane.xlu0 %1031 }
 0x2f2   :  { %v1033_v20 = vsub.f32 %v1028_v8, %v1032_v18  ;;  %v4969_v8 = vld [vmem:[#allocation32_spill] sm:$0xff]  ;;  %v4974_v18 = vld [vmem:[#allocation37_spill] sm:$0xff] }
 0x2f4   :  { %v1034_v22 = vmul.f32 1.442695, %v1033_v20  ;;  %v4975_v20 = vld [vmem:[#allocation38_spill] sm:$0xff] }
 0x2f6   :  { %3170 = vpow2.f32 %v1034_v22  ;;  %v4976_v22 = vld [vmem:[#allocation39_spill] sm:$0xff] }
 0x300   :  { %v3171_v28 = vpop.eup %3170 }
 0x301   :  { %v1036_v30 = vmul.f32 %v3171_v28, %v4120_v26  ;;  %v4977_v28 = vld [vmem:[#allocation40_spill] sm:$0xff] }
 0x303   :  { %v1037_v32 = vsel %vm1029_vm2, %v1036_v30, 0.0  ;;  %v1040_v34 = vpack.c.bf16 %v1036_v30, %v1036_v30  ;;  %v4978_v30 = vld [vmem:[#allocation41_spill] sm:$0xff] }
 0x304   :  { %1038 = vadd.xlane.f32.xlu0 %v1037_v32  ;;  %v4979_v32 = vld [vmem:[#allocation42_spill] sm:$0xff] }
 0x305   :  { %2830 = vmatmul.mubr.msk.bf16.vlgmr.msra.gmra.mrb[12].mxu1 %vm1029_vm2, %v1040_v34  ;;  %v4980_v34 = vld [vmem:[#allocation43_spill] sm:$0xff] }
 0x306   :  { %1089 = vmatpush1.bf16.msra.mxu1 %v4128_v9  ;;  %1120 = vmatprep.mubr.bf16.mxu1 %v4915_v62 }
 0x307   :  { %1090 = vmatprep.subr.bf16.mxu1 %v4135_v59 }
 0x30a   :  { %1091 = vmatpush1.bf16.msra.mxu1 %v4141_v56 }
 0x30b   :  { %1092 = vmatprep.subr.bf16.mxu1 %v4147_v1 }
 0x30e   :  { %1093 = vmatpush1.bf16.msra.mxu1 %v4153_v11 }
 0x30f   :  { %1094 = vmatprep.subr.bf16.mxu1 %v4159_v58 }
 0x312   :  { %1095 = vmatpush1.bf16.msra.mxu1 %v4165_v51 }
 0x313   :  { %1096 = vmatprep.subr.bf16.mxu1 %v4171_v50 }
 0x316   :  { %1097 = vmatpush1.bf16.msra.mxu1 %v3542_v19 }
 0x317   :  { %1098 = vmatprep.subr.bf16.mxu1 %v3553_v21 }
 0x31a   :  { %1099 = vmatpush1.bf16.msra.mxu1 %v3564_v23 }
 0x31b   :  { %1100 = vmatprep.subr.bf16.mxu1 %v3576_v25  ;;  %v4945_v25 = vld [vmem:[#allocation8_spill] sm:$0xff] }
 0x31e   :  { %1101 = vmatpush1.bf16.msra.mxu1 %v3588_v27  ;;  %v4946_v27 = vld [vmem:[#allocation9_spill] sm:$0xff] }
 0x31f   :  { %1102 = vmatprep.subr.bf16.mxu1 %v3600_v29  ;;  %v4947_v29 = vld [vmem:[#allocation10_spill] sm:$0xff] }
 0x322   :  { %1103 = vmatpush1.bf16.msra.mxu1 %v3612_v31  ;;  %v4948_v31 = vld [vmem:[#allocation11_spill] sm:$0xff] }
 0x323   :  { %1170 = vmatprep.subr.bf16.mxu1 %v3624_v33  ;;  %v4949_v33 = vld [vmem:[#allocation12_spill] sm:$0xff] }
 0x391   :  { %v1039_v0 = vpop.xlane.xlu0 %1038 }
 0x392   :  { %v1084_v55 = vmax.f32 %v1039_v0, 1e-20  ;;  %v4981_v0 = vld [vmem:[#allocation44_spill] sm:$0xff] }
 0x394   :  { %3172 = vrcp.f32 %v1084_v55  ;;  %v4982_v55 = vld [vmem:[#allocation45_spill] sm:$0xff] }
 0x39e   :  { %v3173_v49 = vpop.eup %3172 }
 0x3d8   :  { %v1078_v3 = vpop.f32.mrb[12].mxu1 }
 0x3d9   :  { %v1086_v19 = vmul.f32 %v3173_v49, %v1078_v3  ;;  %v2831_v53 = vpop.f32.mrb[13].mxu1  ;;  %v4983_v49 = vld [vmem:[#allocation46_spill] sm:$0xff]  ;;  %v4984_v3 = vld [vmem:[#allocation47_spill] sm:$0xff] }
 0x3da   :  { %v1081_v21 = vpop.f32.mrb[14].mxu1  ;;  %v4986_v53 = vld [vmem:[#allocation49_spill] sm:$0xff] }
 0x3db   :  { %v1087_v48 = vpack.c.bf16 %v1086_v19, %v1086_v19  ;;  %v2832_v23 = vpop.f32.mrb[15].mxu1  ;;  %v4985_v19 = vld [vmem:[#allocation48_spill] sm:$0xff]  ;;  %v4987_v21 = vld [vmem:[#allocation50_spill] sm:$0xff] }
 0x3dc   :  { %v4989_v23 = vld [vmem:[#allocation52_spill] sm:$0xff] }
 0x3dd   :  { %1121 = vmatmul.mubr.bf16.vlgmr.msra.gmra.mrb[16].mxu1 %v1087_v48  ;;  %1162 = vmatmul.mubr.bf16.vlgmr.msra.gmra.mrb[16].mxu0 %v1087_v48  ;;  %v4988_v48 = vld [vmem:[#allocation51_spill] sm:$0xff] }
 0x3de   :  { %1171 = vmatpush1.bf16.msra.mxu1 %v3636_v35  ;;  %1212 = vmatpush1.bf16.msra.mxu0 %v3641_v36  ;;  %v4950_v35 = vld [vmem:[#allocation13_spill] sm:$0xff]  ;;  %v4951_v36 = vld [vmem:[#allocation14_spill] sm:$0xff] }
 0x3df   :  { %1172 = vmatprep.subr.bf16.mxu1 %v3648_v37  ;;  %1213 = vmatprep.subr.bf16.mxu0 %v3655_v38  ;;  %v4952_v37 = vld [vmem:[#allocation15_spill] sm:$0xff]  ;;  %v4953_v38 = vld [vmem:[#allocation16_spill] sm:$0xff] }
 0x3e0   :  { %1202 = vmatprep.mubr.bf16.mxu1 %v4915_v62  ;;  %1243 = vmatprep.mubr.bf16.mxu0 %v4915_v62 }
 0x3e2   :  { %1173 = vmatpush1.bf16.msra.mxu1 %v3662_v39  ;;  %1214 = vmatpush1.bf16.msra.mxu0 %v3667_v40  ;;  %v4954_v39 = vld [vmem:[#allocation17_spill] sm:$0xff]  ;;  %v4955_v40 = vld [vmem:[#allocation18_spill] sm:$0xff] }
 0x3e3   :  { %1174 = vmatprep.subr.bf16.mxu1 %v3674_v41  ;;  %1215 = vmatprep.subr.bf16.mxu0 %v3681_v42  ;;  %v4956_v41 = vld [vmem:[#allocation19_spill] sm:$0xff]  ;;  %v4957_v42 = vld [vmem:[#allocation20_spill] sm:$0xff] }
 0x3e6   :  { %1175 = vmatpush1.bf16.msra.mxu1 %v3688_v43  ;;  %1216 = vmatpush1.bf16.msra.mxu0 %v3693_v44  ;;  %v4958_v43 = vld [vmem:[#allocation21_spill] sm:$0xff]  ;;  %v4959_v44 = vld [vmem:[#allocation22_spill] sm:$0xff] }
 0x3e7   :  { %1176 = vmatprep.subr.bf16.mxu1 %v3700_v45  ;;  %1217 = vmatprep.subr.bf16.mxu0 %v3707_v46  ;;  %v4960_v45 = vld [vmem:[#allocation23_spill] sm:$0xff]  ;;  %v4961_v46 = vld [vmem:[#allocation24_spill] sm:$0xff] }
 0x3ea   :  { %1177 = vmatpush1.bf16.msra.mxu1 %v3712_v47  ;;  %1218 = vmatpush1.bf16.msra.mxu0 %v4945_v25  ;;  %v4962_v47 = vld [vmem:[#allocation25_spill] sm:$0xff] }
 0x3eb   :  { %1178 = vmatprep.subr.bf16.mxu1 %v4946_v27  ;;  %1219 = vmatprep.subr.bf16.mxu0 %v4947_v29  ;;  %v4990_v25 = vld [vmem:[#allocation53_spill] sm:$0xff]  ;;  %v4991_v27 = vld [vmem:[#allocation54_spill] sm:$0xff]  ;;  %v4992_v29 = vld [vmem:[#allocation55_spill] sm:$0xff] }
 0x3ee   :  { %1179 = vmatpush1.bf16.msra.mxu1 %v4948_v31  ;;  %1220 = vmatpush1.bf16.msra.mxu0 %v4949_v33  ;;  %v4993_v31 = vld [vmem:[#allocation56_spill] sm:$0xff]  ;;  %v4994_v33 = vld [vmem:[#allocation57_spill] sm:$0xff] }
 0x3ef   :  { %1180 = vmatprep.subr.bf16.mxu1 %v4950_v35  ;;  %1221 = vmatprep.subr.bf16.mxu0 %v4951_v36  ;;  %v4995_v35 = vld [vmem:[#allocation58_spill] sm:$0xff]  ;;  %v4996_v36 = vld [vmem:[#allocation59_spill] sm:$0xff] }
 0x3f2   :  { %1181 = vmatpush1.bf16.msra.mxu1 %v4952_v37  ;;  %1222 = vmatpush1.bf16.msra.mxu0 %v4953_v38  ;;  %v3222_v37 = vld [vmem:[%s4817_s4 + $0x4] ss:$16 sps:$4 sm:$0xff]   ;;  %v3223_v38 = vld [vmem:[%s4817_s4 + $0xc] ss:$16 sps:$4 sm:$0xff]  }
 0x3f3   :  { %1182 = vmatprep.subr.bf16.mxu1 %v4954_v39  ;;  %1223 = vmatprep.subr.bf16.mxu0 %v4955_v40 }
 0x3f6   :  { %1183 = vmatpush1.bf16.msra.mxu1 %v4956_v41  ;;  %1224 = vmatpush1.bf16.msra.mxu0 %v4957_v42 }
 0x3f7   :  { %1184 = vmatprep.subr.bf16.mxu1 %v4958_v43  ;;  %1225 = vmatprep.subr.bf16.mxu0 %v4959_v44 }
 0x3fa   :  { %1185 = vmatpush1.bf16.msra.mxu1 %v4960_v45  ;;  %1226 = vmatpush1.bf16.msra.mxu0 %v4961_v46 }
 0x3fb   :  { %1252 = vmatprep.subr.bf16.mxu1 %v4962_v47  ;;  %1293 = vmatprep.subr.bf16.mxu0 %v4963_v13 }
 0x3fd   :  { %1203 = vmatmul.mubr.bf16.vlgmr.msra.gmra.mrb[20].mxu1 %v4085_v2  ;;  %1244 = vmatmul.mubr.bf16.vlgmr.msra.gmra.mrb[20].mxu0 %v4085_v2 }
 0x3fe   :  { %1253 = vmatpush1.bf16.msra.mxu1 %v4964_v7  ;;  %1294 = vmatpush1.bf16.msra.mxu0 %v4965_v54 }
 0x3ff   :  { %1254 = vmatprep.subr.bf16.mxu1 %v4966_v15  ;;  %1295 = vmatprep.subr.bf16.mxu0 %v4967_v17 }
 0x400   :  { %1284 = vmatprep.mubr.bf16.mxu1 %v4915_v62  ;;  %1325 = vmatprep.mubr.bf16.mxu0 %v4915_v62 }
 0x402   :  { %1255 = vmatpush1.bf16.msra.mxu1 %v4968_v6  ;;  %1296 = vmatpush1.bf16.msra.mxu0 %v4969_v8 }
 0x403   :  { %1256 = vmatprep.subr.bf16.mxu1 %v4970_v10  ;;  %1297 = vmatprep.subr.bf16.mxu0 %v4971_v12 }
 0x406   :  { %1257 = vmatpush1.bf16.msra.mxu1 %v4972_v14  ;;  %1298 = vmatpush1.bf16.msra.mxu0 %v4973_v16 }
 0x407   :  { %1258 = vmatprep.subr.bf16.mxu1 %v4974_v18  ;;  %1299 = vmatprep.subr.bf16.mxu0 %v4975_v20 }
 0x40a   :  { %1259 = vmatpush1.bf16.msra.mxu1 %v4976_v22  ;;  %1300 = vmatpush1.bf16.msra.mxu0 %v4977_v28 }
 0x40b   :  { %1260 = vmatprep.subr.bf16.mxu1 %v4978_v30  ;;  %1301 = vmatprep.subr.bf16.mxu0 %v4979_v32 }
 0x40e   :  { %1261 = vmatpush1.bf16.msra.mxu1 %v4980_v34  ;;  %1302 = vmatpush1.bf16.msra.mxu0 %v4981_v0 }
 0x40f   :  { %1262 = vmatprep.subr.bf16.mxu1 %v4982_v55  ;;  %1303 = vmatprep.subr.bf16.mxu0 %v4983_v49 }
 0x412   :  { %1263 = vmatpush1.bf16.msra.mxu1 %v4984_v3  ;;  %1304 = vmatpush1.bf16.msra.mxu0 %v4985_v19 }
 0x413   :  { %1264 = vmatprep.subr.bf16.mxu1 %v4986_v53  ;;  %1305 = vmatprep.subr.bf16.mxu0 %v4987_v21 }
 0x416   :  { %1265 = vmatpush1.bf16.msra.mxu1 %v4988_v48  ;;  %1306 = vmatpush1.bf16.msra.mxu0 %v4989_v23 }
 0x417   :  { %1266 = vmatprep.subr.bf16.mxu1 %v4990_v25  ;;  %1307 = vmatprep.subr.bf16.mxu0 %v4991_v27 }
 0x41a   :  { %1267 = vmatpush1.bf16.msra.mxu1 %v4992_v29  ;;  %1308 = vmatpush1.bf16.msra.mxu0 %v4993_v31 }
 0x41b   :  { %2833 = vmatprep.subr.bf16.mxu1 %v4944_v24  ;;  %2845 = vmatprep.subr.bf16.mxu0 %v4944_v24 }
 0x41d   :  { %1285 = vmatmul.mubr.bf16.vlgmr.msra.gmra.mrb[24].mxu1 %v4085_v2  ;;  %1326 = vmatmul.mubr.bf16.vlgmr.msra.gmra.mrb[24].mxu0 %v4085_v2  ;;  %v4997_v2 = vld [vmem:[#allocation60_spill] sm:$0xff] }
 0x41e   :  { %2841 = vmatprep.mubr.msk.bf16.mxu1 %vm3360_vm0, %v4944_v24  ;;  %2846 = vmatpush3.bf16.msra.mxu0 %v4994_v33 }
 0x41f   :  { %2847 = vmatprep.subr.bf16.mxu0 %v4944_v24  ;;  %2853 = vmatprep.mubr.msk.bf16.mxu0 %vm3360_vm0, %v4944_v24 }
 0x422   :  { %2848 = vmatpush3.bf16.msra.mxu0 %v4995_v35 }
 0x423   :  { %2834 = vmatpush3.bf16.xpose.msra.mxu1 %v4994_v33  ;;  %2849 = vmatprep.subr.bf16.mxu0 %v4944_v24 }
 0x424   :  { %2835 = vmatprep.subr.bf16.mxu1 %v4944_v24 }
 0x426   :  { %2850 = vmatpush3.bf16.msra.mxu0 %v4996_v36 }
 0x427   :  { %2851 = vmatprep.subr.bf16.mxu0 %v4944_v24 }
 0x42a   :  { %2852 = vmatpush3.bf16.msra.mxu0 %v4997_v2 }
 0x42b   :  { %2836 = vmatpush3.bf16.xpose.msra.mxu1 %v4995_v35  ;;  %1466 = vmatprep.subr.bf16.mxu0 %v3222_v37 }
 0x42c   :  { %2837 = vmatprep.subr.bf16.mxu1 %v4944_v24 }
 0x433   :  { %2838 = vmatpush3.bf16.xpose.msra.mxu1 %v4996_v36 }
 0x434   :  { %2839 = vmatprep.subr.bf16.mxu1 %v4944_v24 }
 0x43b   :  { %2840 = vmatpush3.bf16.xpose.msra.mxu1 %v4997_v2 }
 0x43c   :  { %1507 = vmatprep.subr.bf16.mxu1 %v3223_v38 }
 0x4b0   :  { %v1122_v39 = vpop.f32.mrb[16].mxu1  ;;  %v1163_v40 = vpop.f32.mrb[16].mxu0 }
 0x4b1   :  { %v1124_v41 = vpop.f32.mrb[17].mxu1  ;;  %v1165_v42 = vpop.f32.mrb[17].mxu0 }
 0x4b2   :  { %v1126_v43 = vpop.f32.mrb[18].mxu1  ;;  %v1167_v44 = vpop.f32.mrb[18].mxu0 }
 0x4b3   :  { %v1127_v45 = vpop.f32.mrb[19].mxu1  ;;  %v1168_v46 = vpop.f32.mrb[19].mxu0 }
 0x4d0   :  { %v1204_v47 = vpop.f32.mrb[20].mxu1  ;;  %v1245_v13 = vpop.f32.mrb[20].mxu0 }
 0x4d1   :  { %v1205_v7 = vadd.f32 %v1204_v47, %v1122_v39  ;;  %v1246_v54 = vadd.f32 %v1245_v13, %v1163_v40  ;;  %v1206_v15 = vpop.f32.mrb[21].mxu1  ;;  %v1247_v17 = vpop.f32.mrb[21].mxu0 }
 0x4d2   :  { %v1207_v6 = vadd.f32 %v1206_v15, %v1124_v41  ;;  %v1248_v8 = vadd.f32 %v1247_v17, %v1165_v42  ;;  %v1208_v10 = vpop.f32.mrb[22].mxu1  ;;  %v1249_v12 = vpop.f32.mrb[22].mxu0 }
 0x4d3   :  { %v1209_v14 = vpop.f32.mrb[23].mxu1  ;;  %v1250_v16 = vpop.f32.mrb[23].mxu0  ;;  %v3226_v10 = vld [vmem:[%s4817_s4 + $0x28] ss:$16 sps:$4 sm:$0xff]   ;;  %v3227_v12 = vld [vmem:[%s4817_s4 + $0x4c] ss:$16 sps:$4 sm:$0xff]  }
 0x4d4   :  { %v3228_v14 = vld [vmem:[%s4817_s4 + $0x48] ss:$16 sps:$4 sm:$0xff]   ;;  %v3229_v16 = vld [vmem:[%s4817_s4 + $0x6c] ss:$16 sps:$4 sm:$0xff]  }
 0x4f0   :  { %v1286_v18 = vpop.f32.mrb[24].mxu1  ;;  %v1327_v20 = vpop.f32.mrb[24].mxu0 }
 0x4f1   :  { %v1334_v22 = vadd.f32 %v1286_v18, %v1205_v7  ;;  %v1336_v28 = vadd.f32 %v1327_v20, %v1246_v54  ;;  %v1288_v30 = vpop.f32.mrb[25].mxu1  ;;  %v1329_v32 = vpop.f32.mrb[25].mxu0  ;;  %v3230_v18 = vld [vmem:[%s4817_s4 + $0x68] ss:$16 sps:$4 sm:$0xff]   ;;  %v3231_v20 = vld [vmem:[%s4817_s4 + $0x8c] ss:$16 sps:$4 sm:$0xff]  }
 0x4f2   :  { %v1335_v34 = vadd.f32 %v1288_v30, %v1207_v6  ;;  %v1337_v0 = vadd.f32 %v1329_v32, %v1248_v8  ;;  %v1290_v55 = vpop.f32.mrb[26].mxu1  ;;  %v1331_v49 = vpop.f32.mrb[26].mxu0  ;;  %v3224_v8 = vld [vmem:[%s4817_s4 + $0x8] ss:$16 sps:$4 sm:$0xff]   ;;  %v3235_v32 = vld [vmem:[%s4817_s4 + $0xcc] ss:$16 sps:$4 sm:$0xff]  }
 0x4f3   :  { %v1338_v3 = vadd.f32 %v1334_v22, %v4068_v61  ;;  %v1291_v19 = vpop.f32.mrb[27].mxu1  ;;  %v1332_v53 = vpop.f32.mrb[27].mxu0  ;;  %v1340_v37 = vadd.f32 %v1336_v28, %v4079_v60  ;;  %v3232_v22 = vld [vmem:[%s4817_s4 + $0x88] ss:$16 sps:$4 sm:$0xff]   ;;  %v3233_v28 = vld [vmem:[%s4817_s4 + $0xac] ss:$16 sps:$4 sm:$0xff]  }
 0x4f4   :  { %v1339_v21 = vadd.f32 %v1335_v34, %v4070_v57  ;;  %v1341_v25 = vadd.f32 %v1337_v0, %v4075_v5  ;;  %v3234_v30 = vld [vmem:[%s4817_s4 + $0xa8] ss:$16 sps:$4 sm:$0xff]   ;;  %v3237_v0 = vld [vmem:[%s4817_s4 + $0xec] ss:$16 sps:$4 sm:$0xff]  }
 0x4f5   :  { %v2638_v48 = vmul.f32 -1.442695, %v1338_v3  ;;  %v3236_v34 = vld [vmem:[%s4817_s4 + $0xc8] ss:$16 sps:$4 sm:$0xff]   ;;  %v3239_v49 = vld [vmem:[%s4816_s3 + $0xc] ss:$16 sps:$4 sm:$0xff]  }
 0x4f6   :  { %v2639_v23 = vmul.f32 -1.442695, %v1339_v21  ;;  %v2640_v27 = vmul.f32 -1.442695, %v1341_v25  ;;  %v3238_v55 = vld [vmem:[%s4817_s4 + $0xe8] ss:$16 sps:$4 sm:$0xff]  }
 0x4f7   :  { %3174 = vpow2.f32 %v2638_v48 }
 0x4f8   :  { %3176 = vpow2.f32 %v2639_v23 }
 0x4f9   :  { %3178 = vpow2.f32 %v2640_v27 }
 0x4fa   :  { %3180 = vtanh.f32 %v1340_v37 }
 0x501   :  { %v3175_v38 = vpop.eup %3174 }
 0x502   :  { %v3177_v39 = vpop.eup %3176  ;;  %v1345_v40 = vadd.f32 1.0, %v3175_v38 }
 0x503   :  { %v1351_v41 = vadd.f32 1.0, %v3177_v39  ;;  %v3179_v42 = vpop.eup %3178 }
 0x504   :  { %3182 = vrcp.f32 %v1345_v40  ;;  %v3181_v43 = vpop.eup %3180  ;;  %v1358_v47 = vadd.f32 1.0, %v3179_v42 }
 0x505   :  { %3184 = vrcp.f32 %v1351_v41 }
 0x506   :  { %3186 = vrcp.f32 %v1358_v47 }
 0x50e   :  { %v3183_v44 = vpop.eup %3182 }
 0x50f   :  { %v3185_v45 = vpop.eup %3184  ;;  %v1362_v46 = vmul.f32 %v3183_v44, %v3181_v43 }
 0x510   :  { %v1361_v13 = vmul.f32 %v3185_v45, %v4082_v63  ;;  %v3187_v54 = vpop.eup %3186  ;;  %v3225_v63 = vld [vmem:[%s4817_s4 + $0x2c] ss:$16 sps:$4 sm:$0xff]  }
 0x512   :  { %v4283_v7 = vadd.f32 %v1362_v46, %v1361_v13 }
 0x514   :  { %3188 = vtanh.f32 %v4283_v7 }
 0x51e   :  { %v3189_v15 = vpop.eup %3188 }
 0x51f   :  { %v1365_v17 = vmul.f32 %v3189_v15, %v3187_v54 }
 0x521   :  { %v4286_v6 = vpack.c.bf16 %v1365_v17, %v1365_v17  ;;  %v3248_v17 = vld [vmem:[%s4816_s3] ss:$16 sps:$4 sm:$0xff]  }
 0x523   :  { %2842 = vmatmul.mubr.bf16.vlgmr.msra.gmra.mrb[28].mxu1 %v4286_v6 }
 0x524   :  { %1508 = vmatpush1.bf16.msra.mxu1 %v3224_v8  ;;  %1539 = vmatprep.mubr.bf16.mxu1 %v4915_v62  ;;  %v3249_v8 = vld [vmem:[%s4816_s3 + $0x8] ss:$16 sps:$4 sm:$0xff]  }
 0x525   :  { %1509 = vmatprep.subr.bf16.mxu1 %v3225_v63  ;;  %v3250_v63 = vld [vmem:[%s4816_s3 + $0x24] ss:$16 sps:$4 sm:$0xff]  }
 0x528   :  { %1510 = vmatpush1.bf16.msra.mxu1 %v3226_v10  ;;  %v3251_v10 = vld [vmem:[%s4816_s3 + $0x2c] ss:$16 sps:$4 sm:$0xff]  }
 0x529   :  { %1511 = vmatprep.subr.bf16.mxu1 %v3227_v12  ;;  %v3252_v12 = vld [vmem:[%s4816_s3 + $0x20] ss:$16 sps:$4 sm:$0xff]  }
 0x52c   :  { %1512 = vmatpush1.bf16.msra.mxu1 %v3228_v14  ;;  %v3253_v14 = vld [vmem:[%s4816_s3 + $0x28] ss:$16 sps:$4 sm:$0xff]  }
 0x52d   :  { %1513 = vmatprep.subr.bf16.mxu1 %v3229_v16  ;;  %v3254_v16 = vld [vmem:[%s4816_s3 + $0x44] ss:$16 sps:$4 sm:$0xff]  }
 0x530   :  { %1514 = vmatpush1.bf16.msra.mxu1 %v3230_v18  ;;  %v3255_v18 = vld [vmem:[%s4816_s3 + $0x4c] ss:$16 sps:$4 sm:$0xff]  }
 0x531   :  { %1515 = vmatprep.subr.bf16.mxu1 %v3231_v20  ;;  %v3256_v20 = vld [vmem:[%s4816_s3 + $0x40] ss:$16 sps:$4 sm:$0xff]  }
 0x534   :  { %1516 = vmatpush1.bf16.msra.mxu1 %v3232_v22  ;;  %v3257_v22 = vld [vmem:[%s4816_s3 + $0x48] ss:$16 sps:$4 sm:$0xff]  }
 0x535   :  { %1517 = vmatprep.subr.bf16.mxu1 %v3233_v28  ;;  %v3258_v28 = vld [vmem:[%s4816_s3 + $0x64] ss:$16 sps:$4 sm:$0xff]  }
 0x538   :  { %1518 = vmatpush1.bf16.msra.mxu1 %v3234_v30  ;;  %v3259_v30 = vld [vmem:[%s4816_s3 + $0x6c] ss:$16 sps:$4 sm:$0xff]  }
 0x539   :  { %1519 = vmatprep.subr.bf16.mxu1 %v3235_v32  ;;  %v3260_v32 = vld [vmem:[%s4816_s3 + $0x60] ss:$16 sps:$4 sm:$0xff]  }
 0x53c   :  { %1520 = vmatpush1.bf16.msra.mxu1 %v3236_v34  ;;  %v3261_v34 = vld [vmem:[%s4816_s3 + $0x68] ss:$16 sps:$4 sm:$0xff]  }
 0x53d   :  { %1521 = vmatprep.subr.bf16.mxu1 %v3237_v0  ;;  %v3262_v0 = vld [vmem:[%s4816_s3 + $0x84] ss:$16 sps:$4 sm:$0xff]  }
 0x540   :  { %1522 = vmatpush1.bf16.msra.mxu1 %v3238_v55  ;;  %v3263_v55 = vld [vmem:[%s4816_s3 + $0x8c] ss:$16 sps:$4 sm:$0xff]  }
 0x541   :  { %1589 = vmatprep.subr.bf16.mxu1 %v3239_v49  ;;  %v3264_v49 = vld [vmem:[%s4816_s3 + $0x80] ss:$16 sps:$4 sm:$0xff]  }
 0x5f6   :  { %v1401_v3 = vpop.f32.mrb[28].mxu1 }
 0x5f7   :  { %v1407_v19 = vsel %vm84_vm1, %v1401_v3, -1e+30  ;;  %v2843_v53 = vpop.f32.mrb[29].mxu1  ;;  %v3265_v3 = vld [vmem:[%s4816_s3 + $0x88] ss:$16 sps:$4 sm:$0xff]  }
 0x5f8   :  { %v1404_v21 = vpop.f32.mrb[30].mxu1  ;;  %v1408_v48 = vsel %vm1029_vm2, %v1407_v19, -inf  ;;  %v3267_v53 = vld [vmem:[%s4816_s3 + $0xac] ss:$16 sps:$4 sm:$0xff]  }
 0x5f9   :  { %1409 = vmax.xlane.f32.xlu1 %v1408_v48  ;;  %v2844_v23 = vpop.f32.mrb[31].mxu1  ;;  %v3268_v21 = vld [vmem:[%s4816_s3 + $0xa0] ss:$16 sps:$4 sm:$0xff]   ;;  %v3269_v48 = vld [vmem:[%s4816_s3 + $0xa8] ss:$16 sps:$4 sm:$0xff]  }
 0x5fa   :  { %v3270_v23 = vld [vmem:[%s4816_s3 + $0xc4] ss:$16 sps:$4 sm:$0xff]  }
 0x686   :  { %v1410_v25 = vpop.xlane.xlu1 %1409 }
 0x687   :  { %v1411_v27 = vsub.f32 %v1407_v19, %v1410_v25  ;;  %v3266_v19 = vld [vmem:[%s4816_s3 + $0xa4] ss:$16 sps:$4 sm:$0xff]   ;;  %v3271_v25 = vld [vmem:[%s4816_s3 + $0xcc] ss:$16 sps:$4 sm:$0xff]  }
 0x689   :  { %v1412_v37 = vmul.f32 1.442695, %v1411_v27  ;;  %v3272_v27 = vld [vmem:[%s4816_s3 + $0xc0] ss:$16 sps:$4 sm:$0xff]  }
 0x68b   :  { %3190 = vpow2.f32 %v1412_v37  ;;  %v3273_v37 = vld [vmem:[%s4816_s3 + $0xc8] ss:$16 sps:$4 sm:$0xff]  }
 0x695   :  { %v3191_v38 = vpop.eup %3190 }
 0x696   :  { %v1414_v39 = vmul.f32 %v3191_v38, %v4120_v26  ;;  %v3274_v38 = vld [vmem:[%s4816_s3 + $0xe4] ss:$16 sps:$4 sm:$0xff]  }
 0x698   :  { %v1415_v40 = vsel %vm1029_vm2, %v1414_v39, 0.0  ;;  %v1418_v41 = vpack.c.bf16 %v1414_v39, %v1414_v39  ;;  %v3275_v39 = vld [vmem:[%s4816_s3 + $0xec] ss:$16 sps:$4 sm:$0xff]  }
 0x699   :  { %1416 = vadd.xlane.f32.xlu1 %v1415_v40  ;;  %v3276_v40 = vld [vmem:[%s4816_s3 + $0xe0] ss:$16 sps:$4 sm:$0xff]  }
 0x69a   :  { %2854 = vmatmul.mubr.msk.bf16.vlgmr.msra.gmra.mrb[28].mxu0 %vm1029_vm2, %v1418_v41  ;;  %v3277_v41 = vld [vmem:[%s4816_s3 + $0xe8] ss:$16 sps:$4 sm:$0xff]  }
 0x69b   :  { %1467 = vmatpush1.bf16.msra.mxu0 %v4128_v9  ;;  %1498 = vmatprep.mubr.bf16.mxu0 %v4915_v62  ;;  %v3240_v9 = vld [vmem:[%s4817_s4 + $0x80] ss:$16 sps:$4 sm:$0xff]  }
 0x69c   :  { %1468 = vmatprep.subr.bf16.mxu0 %v4135_v59  ;;  %v3241_v59 = vld [vmem:[%s4817_s4 + $0xa4] ss:$16 sps:$4 sm:$0xff]  }
 0x69f   :  { %1469 = vmatpush1.bf16.msra.mxu0 %v4141_v56  ;;  %v3242_v56 = vld [vmem:[%s4817_s4 + $0xa0] ss:$16 sps:$4 sm:$0xff]  }
 0x6a0   :  { %1470 = vmatprep.subr.bf16.mxu0 %v4147_v1  ;;  %v3243_v1 = vld [vmem:[%s4817_s4 + $0xc4] ss:$16 sps:$4 sm:$0xff]  }
 0x6a3   :  { %1471 = vmatpush1.bf16.msra.mxu0 %v4153_v11  ;;  %v3244_v11 = vld [vmem:[%s4817_s4 + $0xc0] ss:$16 sps:$4 sm:$0xff]  }
 0x6a4   :  { %1472 = vmatprep.subr.bf16.mxu0 %v4159_v58  ;;  %v3245_v58 = vld [vmem:[%s4817_s4 + $0xe4] ss:$16 sps:$4 sm:$0xff]  }
 0x6a7   :  { %1473 = vmatpush1.bf16.msra.mxu0 %v4165_v51  ;;  %v3246_v51 = vld [vmem:[%s4817_s4 + $0xe0] ss:$16 sps:$4 sm:$0xff]  }
 0x6a8   :  { %1474 = vmatprep.subr.bf16.mxu0 %v4171_v50  ;;  %v3247_v50 = vld [vmem:[%s4816_s3 + $0x4] ss:$16 sps:$4 sm:$0xff]  }
 0x6ab   :  { %1475 = vmatpush1.bf16.msra.mxu0 %v3240_v9  ;;  %v3278_v9 = vld [vmem:[%s4818_s5 + $0x4] ss:$16 sps:$4 sm:$0xff]  }
 0x6ac   :  { %1476 = vmatprep.subr.bf16.mxu0 %v3241_v59  ;;  %v3279_v59 = vld [vmem:[%s4818_s5 + $0xc] ss:$16 sps:$4 sm:$0xff]  }
 0x6af   :  { %1477 = vmatpush1.bf16.msra.mxu0 %v3242_v56  ;;  %v3280_v56 = vld [vmem:[%s4818_s5] ss:$16 sps:$4 sm:$0xff]  }
 0x6b0   :  { %1478 = vmatprep.subr.bf16.mxu0 %v3243_v1  ;;  %v3281_v1 = vld [vmem:[%s4818_s5 + $0x8] ss:$16 sps:$4 sm:$0xff]  }
 0x6b3   :  { %1479 = vmatpush1.bf16.msra.mxu0 %v3244_v11  ;;  %v3282_v11 = vld [vmem:[%s4818_s5 + $0x24] ss:$16 sps:$4 sm:$0xff]  }
 0x6b4   :  { %1480 = vmatprep.subr.bf16.mxu0 %v3245_v58  ;;  %v3283_v58 = vld [vmem:[%s4818_s5 + $0x2c] ss:$16 sps:$4 sm:$0xff]  }
 0x6b7   :  { %1481 = vmatpush1.bf16.msra.mxu0 %v3246_v51  ;;  %v3284_v51 = vld [vmem:[%s4818_s5 + $0x20] ss:$16 sps:$4 sm:$0xff]  }
 0x6b8   :  { %1548 = vmatprep.subr.bf16.mxu0 %v3247_v50  ;;  %v3285_v50 = vld [vmem:[%s4818_s5 + $0x28] ss:$16 sps:$4 sm:$0xff]  }
 0x726   :  { %v1417_v42 = vpop.xlane.xlu1 %1416 }
 0x727   :  { %v1462_v43 = vmax.f32 %v1417_v42, 1e-20  ;;  %v3286_v42 = vld [vmem:[%s4818_s5 + $0x44] ss:$16 sps:$4 sm:$0xff]  }
 0x729   :  { %3192 = vrcp.f32 %v1462_v43  ;;  %v3287_v43 = vld [vmem:[%s4818_s5 + $0x4c] ss:$16 sps:$4 sm:$0xff]  }
 0x733   :  { %v3193_v44 = vpop.eup %3192 }
 0x76d   :  { %v1456_v45 = vpop.f32.mrb[28].mxu0 }
 0x76e   :  { %v1464_v46 = vmul.f32 %v3193_v44, %v1456_v45  ;;  %v2855_v47 = vpop.f32.mrb[29].mxu0  ;;  %v3289_v44 = vld [vmem:[%s4818_s5 + $0x48] ss:$16 sps:$4 sm:$0xff]   ;;  %v3290_v45 = vld [vmem:[%s4818_s5 + $0x64] ss:$16 sps:$4 sm:$0xff]  }
 0x76f   :  { %v1459_v13 = vpop.f32.mrb[30].mxu0  ;;  %v3292_v47 = vld [vmem:[%s4818_s5 + $0x60] ss:$16 sps:$4 sm:$0xff]  }
 0x770   :  { %v1465_v54 = vpack.c.bf16 %v1464_v46, %v1464_v46  ;;  %v2856_v15 = vpop.f32.mrb[31].mxu0  ;;  %v3291_v46 = vld [vmem:[%s4818_s5 + $0x6c] ss:$16 sps:$4 sm:$0xff]   ;;  %v3293_v13 = vld [vmem:[%s4818_s5 + $0x68] ss:$16 sps:$4 sm:$0xff]  }
 0x771   :  { %v3295_v15 = vld [vmem:[%s4818_s5 + $0x8c] ss:$16 sps:$4 sm:$0xff]  }
 0x772   :  { %1499 = vmatmul.mubr.bf16.vlgmr.msra.gmra.mrb[32].mxu0 %v1465_v54  ;;  %1540 = vmatmul.mubr.bf16.vlgmr.msra.gmra.mrb[32].mxu1 %v1465_v54  ;;  %v3294_v54 = vld [vmem:[%s4818_s5 + $0x84] ss:$16 sps:$4 sm:$0xff]  }
 0x773   :  { %1549 = vmatpush1.bf16.msra.mxu0 %v3248_v17  ;;  %1590 = vmatpush1.bf16.msra.mxu1 %v3249_v8  ;;  %v3296_v17 = vld [vmem:[%s4818_s5 + $0x80] ss:$16 sps:$4 sm:$0xff]   ;;  %v3297_v8 = vld [vmem:[%s4818_s5 + $0x88] ss:$16 sps:$4 sm:$0xff]  }
 0x774   :  { %1550 = vmatprep.subr.bf16.mxu0 %v3250_v63  ;;  %1591 = vmatprep.subr.bf16.mxu1 %v3251_v10  ;;  %v3298_v63 = vld [vmem:[%s4818_s5 + $0xa4] ss:$16 sps:$4 sm:$0xff]   ;;  %v3299_v10 = vld [vmem:[%s4818_s5 + $0xac] ss:$16 sps:$4 sm:$0xff]  }
 0x775   :  { %1580 = vmatprep.mubr.bf16.mxu0 %v4915_v62  ;;  %1621 = vmatprep.mubr.bf16.mxu1 %v4915_v62 }
 0x777   :  { %1551 = vmatpush1.bf16.msra.mxu0 %v3252_v12  ;;  %1592 = vmatpush1.bf16.msra.mxu1 %v3253_v14  ;;  %v3300_v12 = vld [vmem:[%s4818_s5 + $0xa0] ss:$16 sps:$4 sm:$0xff]   ;;  %v3301_v14 = vld [vmem:[%s4818_s5 + $0xa8] ss:$16 sps:$4 sm:$0xff]  }
 0x778   :  { %1552 = vmatprep.subr.bf16.mxu0 %v3254_v16  ;;  %1593 = vmatprep.subr.bf16.mxu1 %v3255_v18  ;;  %v3302_v16 = vld [vmem:[%s4818_s5 + $0xc4] ss:$16 sps:$4 sm:$0xff]   ;;  %v3303_v18 = vld [vmem:[%s4818_s5 + $0xcc] ss:$16 sps:$4 sm:$0xff]  }
 0x77b   :  { %1553 = vmatpush1.bf16.msra.mxu0 %v3256_v20  ;;  %1594 = vmatpush1.bf16.msra.mxu1 %v3257_v22  ;;  %v3304_v20 = vld [vmem:[%s4818_s5 + $0xc0] ss:$16 sps:$4 sm:$0xff]   ;;  %v3305_v22 = vld [vmem:[%s4818_s5 + $0xc8] ss:$16 sps:$4 sm:$0xff]  }
 0x77c   :  { %1554 = vmatprep.subr.bf16.mxu0 %v3258_v28  ;;  %1595 = vmatprep.subr.bf16.mxu1 %v3259_v30  ;;  %v3306_v28 = vld [vmem:[%s4818_s5 + $0xe4] ss:$16 sps:$4 sm:$0xff]   ;;  %v3307_v30 = vld [vmem:[%s4818_s5 + $0xec] ss:$16 sps:$4 sm:$0xff]  }
 0x77f   :  { %1555 = vmatpush1.bf16.msra.mxu0 %v3260_v32  ;;  %1596 = vmatpush1.bf16.msra.mxu1 %v3261_v34 }
 0x780   :  { %1556 = vmatprep.subr.bf16.mxu0 %v3262_v0  ;;  %1597 = vmatprep.subr.bf16.mxu1 %v3263_v55 }
 0x783   :  { %1557 = vmatpush1.bf16.msra.mxu0 %v3264_v49  ;;  %1598 = vmatpush1.bf16.msra.mxu1 %v3265_v3 }
 0x784   :  { %1558 = vmatprep.subr.bf16.mxu0 %v3266_v19  ;;  %1599 = vmatprep.subr.bf16.mxu1 %v3267_v53 }
 0x787   :  { %1559 = vmatpush1.bf16.msra.mxu0 %v3268_v21  ;;  %1600 = vmatpush1.bf16.msra.mxu1 %v3269_v48 }
 0x788   :  { %1560 = vmatprep.subr.bf16.mxu0 %v3270_v23  ;;  %1601 = vmatprep.subr.bf16.mxu1 %v3271_v25 }
 0x78b   :  { %1561 = vmatpush1.bf16.msra.mxu0 %v3272_v27  ;;  %1602 = vmatpush1.bf16.msra.mxu1 %v3273_v37 }
 0x78c   :  { %1562 = vmatprep.subr.bf16.mxu0 %v3274_v38  ;;  %1603 = vmatprep.subr.bf16.mxu1 %v3275_v39 }
 0x78f   :  { %1563 = vmatpush1.bf16.msra.mxu0 %v3276_v40  ;;  %1604 = vmatpush1.bf16.msra.mxu1 %v3277_v41 }
 0x790   :  { %1630 = vmatprep.subr.bf16.mxu0 %v3278_v9  ;;  %1671 = vmatprep.subr.bf16.mxu1 %v3279_v59 }
 0x792   :  { %1581 = vmatmul.mubr.bf16.vlgmr.msra.gmra.mrb[36].mxu0 %v4286_v6  ;;  %1622 = vmatmul.mubr.bf16.vlgmr.msra.gmra.mrb[36].mxu1 %v4286_v6 }
 0x793   :  { %1631 = vmatpush1.bf16.msra.mxu0 %v3280_v56  ;;  %1672 = vmatpush1.bf16.msra.mxu1 %v3281_v1 }
 0x794   :  { %1632 = vmatprep.subr.bf16.mxu0 %v3282_v11  ;;  %1673 = vmatprep.subr.bf16.mxu1 %v3283_v58 }
 0x795   :  { %1662 = vmatprep.mubr.bf16.mxu0 %v4915_v62  ;;  %1703 = vmatprep.mubr.bf16.mxu1 %v4915_v62  ;;  %v3288_v62 = vld [vmem:[%s4818_s5 + $0x40] ss:$16 sps:$4 sm:$0xff]  }
 0x797   :  { %1633 = vmatpush1.bf16.msra.mxu0 %v3284_v51  ;;  %1674 = vmatpush1.bf16.msra.mxu1 %v3285_v50 }
 0x798   :  { %1634 = vmatprep.subr.bf16.mxu0 %v3286_v42  ;;  %1675 = vmatprep.subr.bf16.mxu1 %v3287_v43 }
 0x79b   :  { %1635 = vmatpush1.bf16.msra.mxu0 %v3288_v62  ;;  %1676 = vmatpush1.bf16.msra.mxu1 %v3289_v44 }
 0x79c   :  { %1636 = vmatprep.subr.bf16.mxu0 %v3290_v45  ;;  %1677 = vmatprep.subr.bf16.mxu1 %v3291_v46 }
 0x79f   :  { %1637 = vmatpush1.bf16.msra.mxu0 %v3292_v47  ;;  %1678 = vmatpush1.bf16.msra.mxu1 %v3293_v13 }
 0x7a0   :  { %1638 = vmatprep.subr.bf16.mxu0 %v3294_v54  ;;  %1679 = vmatprep.subr.bf16.mxu1 %v3295_v15 }
 0x7a3   :  { %1639 = vmatpush1.bf16.msra.mxu0 %v3296_v17  ;;  %1680 = vmatpush1.bf16.msra.mxu1 %v3297_v8 }
 0x7a4   :  { %1640 = vmatprep.subr.bf16.mxu0 %v3298_v63  ;;  %1681 = vmatprep.subr.bf16.mxu1 %v3299_v10 }
 0x7a7   :  { %1641 = vmatpush1.bf16.msra.mxu0 %v3300_v12  ;;  %1682 = vmatpush1.bf16.msra.mxu1 %v3301_v14 }
 0x7a8   :  { %1642 = vmatprep.subr.bf16.mxu0 %v3302_v16  ;;  %1683 = vmatprep.subr.bf16.mxu1 %v3303_v18  ;;  %v1844_v16 = vld [vmem:[%s4815_s2 + $0x8] sm:$0xff] }
 0x7ab   :  { %1643 = vmatpush1.bf16.msra.mxu0 %v3304_v20  ;;  %1684 = vmatpush1.bf16.msra.mxu1 %v3305_v22  ;;  %v3095_v22 = vld [vmem:[%s4820_s7 + $0x80] sm:$0xff]  }
 0x7ac   :  { %1644 = vmatprep.subr.bf16.mxu0 %v3306_v28  ;;  %1685 = vmatprep.subr.bf16.mxu1 %v3307_v30  ;;  %v2650_v28 = vcombine.high %v1844_v16, %v1844_v16 }
 0x7af   :  { %1645 = vmatpush1.bf16.msra.mxu0 %v4992_v29  ;;  %1686 = vmatpush1.bf16.msra.mxu1 %v4993_v31  ;;  %v3094_v29 = vld [vmem:[%s4820_s7 + $0xc0] sm:$0xff]  }
 0x7b0   :  { %2857 = vmatprep.subr.bf16.mxu0 %v4944_v24  ;;  %2869 = vmatprep.subr.bf16.mxu1 %v4944_v24 }
 0x7b2   :  { %1663 = vmatmul.mubr.bf16.vlgmr.msra.gmra.mrb[40].mxu0 %v4286_v6  ;;  %1704 = vmatmul.mubr.bf16.vlgmr.msra.gmra.mrb[40].mxu1 %v4286_v6 }
 0x7b3   :  { %2865 = vmatprep.mubr.msk.bf16.mxu0 %vm3360_vm0, %v4944_v24  ;;  %2870 = vmatpush3.bf16.msra.mxu1 %v4994_v33 }
 0x7b4   :  { %2871 = vmatprep.subr.bf16.mxu1 %v4944_v24  ;;  %2877 = vmatprep.mubr.msk.bf16.mxu1 %vm3360_vm0, %v4944_v24 }
 0x7b7   :  { %2872 = vmatpush3.bf16.msra.mxu1 %v4995_v35 }
 0x7b8   :  { %2858 = vmatpush3.bf16.xpose.msra.mxu0 %v4994_v33  ;;  %2873 = vmatprep.subr.bf16.mxu1 %v4944_v24 }
 0x7b9   :  { %2859 = vmatprep.subr.bf16.mxu0 %v4944_v24 }
 0x7bb   :  { %2874 = vmatpush3.bf16.msra.mxu1 %v4996_v36 }
 0x7bc   :  { %2875 = vmatprep.subr.bf16.mxu1 %v4944_v24 }
 0x7bf   :  { %2876 = vmatpush3.bf16.msra.mxu1 %v4997_v2 }
 0x7c0   :  { %2860 = vmatpush3.bf16.xpose.msra.mxu0 %v4995_v35 }
 0x7c1   :  { %2861 = vmatprep.subr.bf16.mxu0 %v4944_v24 }
 0x7c8   :  { %2862 = vmatpush3.bf16.xpose.msra.mxu0 %v4996_v36 }
 0x7c9   :  { %2863 = vmatprep.subr.bf16.mxu0 %v4944_v24 }
 0x7d0   :  { %2864 = vmatpush3.bf16.xpose.msra.mxu0 %v4997_v2 }
 0x7d1   :  { %2760 = vmatprep.subr.bf16.mxu0 %v3094_v29  ;;  %v3097_v29 = vld [vmem:[%s4820_s7 + $0x88] sm:$0xff]  }
 0x845   :  { %v1500_v31 = vpop.f32.mrb[32].mxu0  ;;  %v1541_v33 = vpop.f32.mrb[32].mxu1 }
 0x846   :  { %v1502_v6 = vpop.f32.mrb[33].mxu0  ;;  %v1543_v32 = vpop.f32.mrb[33].mxu1 }
 0x847   :  { %v1504_v34 = vpop.f32.mrb[34].mxu0  ;;  %v1545_v0 = vpop.f32.mrb[34].mxu1 }
 0x848   :  { %v1505_v35 = vpop.f32.mrb[35].mxu0  ;;  %v1546_v55 = vpop.f32.mrb[35].mxu1  ;;  %v3102_v34 = vld [vmem:[%s4820_s7 + $0xe0] sm:$0xff]  }
 0x849   :  { %v3103_v0 = vld [vmem:[%s4820_s7 + $0xa0] sm:$0xff]   ;;  %v3104_v35 = vld [vmem:[%s4820_s7 + $0xe8] sm:$0xff]  }
 0x84a   :  { %v3105_v55 = vld [vmem:[%s4820_s7 + $0xa8] sm:$0xff]  }
 0x865   :  { %v1582_v49 = vpop.f32.mrb[36].mxu0  ;;  %v1623_v3 = vpop.f32.mrb[36].mxu1 }
 0x866   :  { %v1583_v36 = vadd.f32 %v1582_v49, %v1500_v31  ;;  %v1624_v19 = vadd.f32 %v1623_v3, %v1541_v33  ;;  %v1584_v53 = vpop.f32.mrb[37].mxu0  ;;  %v1625_v21 = vpop.f32.mrb[37].mxu1  ;;  %v3098_v31 = vld [vmem:[%s4820_s7 + $0xd0] sm:$0xff]  }
 0x867   :  { %v1585_v2 = vadd.f32 %v1584_v53, %v1502_v6  ;;  %v1626_v48 = vadd.f32 %v1625_v21, %v1543_v32  ;;  %v1586_v23 = vpop.f32.mrb[38].mxu0  ;;  %v1627_v25 = vpop.f32.mrb[38].mxu1  ;;  %v3099_v33 = vld [vmem:[%s4820_s7 + $0x90] sm:$0xff]   ;;  %v3100_v6 = vld [vmem:[%s4820_s7 + $0xd8] sm:$0xff]   ;;  %v2649_v53 = vcombine.low %v1844_v16, %v1844_v16  ;;  %v3112_v21 = vld [vmem:[%s4822_s9] sm:$0xff]  }
 0x868   :  { %v1587_v27 = vpop.f32.mrb[39].mxu0  ;;  %v1628_v37 = vpop.f32.mrb[39].mxu1  ;;  %v3101_v32 = vld [vmem:[%s4820_s7 + $0x98] sm:$0xff]   ;;  %v3106_v49 = vld [vmem:[%s4820_s7 + $0xf0] sm:$0xff]   ;;  %v3116_v25 = vld [vmem:[%s4822_s9 + $0x20] sm:$0xff]  }
 0x869   :  { %v3107_v3 = vld [vmem:[%s4820_s7 + $0xb0] sm:$0xff]   ;;  %v3115_v23 = vld [vmem:[%s4822_s9 + $0x18] sm:$0xff]   ;;  %v3117_v27 = vld [vmem:[%s4822_s9 + $0x28] sm:$0xff]  }
 0x86a   :  { %v3118_v37 = vld [vmem:[%s4822_s9 + $0x30] sm:$0xff]   ;;  %v3130_v16 = vld [vmem:[%s4820_s7 + $0x68] sm:$0xff]  }
 0x885   :  { %v1664_v38 = vpop.f32.mrb[40].mxu0  ;;  %v1705_v39 = vpop.f32.mrb[40].mxu1 }
 0x886   :  { %v1712_v40 = vadd.f32 %v1664_v38, %v1583_v36  ;;  %v1714_v41 = vadd.f32 %v1705_v39, %v1624_v19  ;;  %v1666_v9 = vpop.f32.mrb[41].mxu0  ;;  %v1707_v59 = vpop.f32.mrb[41].mxu1  ;;  %v3108_v36 = vld [vmem:[%s4820_s7 + $0xf8] sm:$0xff]  }
 0x887   :  { %v1713_v56 = vadd.f32 %v1666_v9, %v1585_v2  ;;  %v1715_v1 = vadd.f32 %v1707_v59, %v1626_v48  ;;  %v1668_v11 = vpop.f32.mrb[42].mxu0  ;;  %v1709_v58 = vpop.f32.mrb[42].mxu1  ;;  %v3109_v19 = vld [vmem:[%s4820_s7 + $0xb8] sm:$0xff]   ;;  %v3113_v2 = vld [vmem:[%s4822_s9 + $0x8] sm:$0xff]   ;;  %v3114_v48 = vld [vmem:[%s4822_s9 + $0x10] sm:$0xff]  }
 0x888   :  { %v1716_v51 = vadd.f32 %v1712_v40, %v4068_v61  ;;  %v1669_v50 = vpop.f32.mrb[43].mxu0  ;;  %v1710_v42 = vpop.f32.mrb[43].mxu1  ;;  %v1718_v47 = vadd.f32 %v1714_v41, %v4079_v60  ;;  %v3119_v38 = vld [vmem:[%s4822_s9 + $0x38] sm:$0xff]  }
 0x889   :  { %v1717_v43 = vadd.f32 %v1713_v56, %v4070_v57  ;;  %v1719_v45 = vadd.f32 %v1715_v1, %v4075_v5  ;;  %v3120_v1 = vld [vmem:[%s4820_s7 + $0x40] sm:$0xff]  }
 0x88a   :  { %v2642_v62 = vmul.f32 -1.442695, %v1716_v51  ;;  %2738 = vmatprep.subr.bf16.mxu1 %v3120_v1 }
 0x88b   :  { %v2643_v44 = vmul.f32 -1.442695, %v1717_v43  ;;  %v2644_v46 = vmul.f32 -1.442695, %v1719_v45 }
 0x88c   :  { %3194 = vpow2.f32 %v2642_v62 }
 0x88d   :  { %3196 = vpow2.f32 %v2643_v44 }
 0x88e   :  { %3198 = vpow2.f32 %v2644_v46 }
 0x88f   :  { %3200 = vtanh.f32 %v1718_v47  ;;  %v1843_v47 = vld [vmem:[%s4815_s2] sm:$0xff] }
 0x896   :  { %v3195_v13 = vpop.eup %3194 }
 0x897   :  { %v3197_v54 = vpop.eup %3196  ;;  %v1723_v15 = vadd.f32 1.0, %v3195_v13 }
 0x898   :  { %v1729_v17 = vadd.f32 1.0, %v3197_v54  ;;  %v3199_v61 = vpop.eup %3198 }
 0x899   :  { %3202 = vrcp.f32 %v1723_v15  ;;  %v3201_v8 = vpop.eup %3200  ;;  %v1736_v12 = vadd.f32 1.0, %v3199_v61  ;;  %v3121_v15 = vld [vmem:[%s4820_s7] sm:$0xff]  }
 0x89a   :  { %3204 = vrcp.f32 %v1729_v17  ;;  %v2648_v17 = vcombine.high %v1843_v47, %v1843_v47 }
 0x89b   :  { %3206 = vrcp.f32 %v1736_v12  ;;  %v3126_v12 = vld [vmem:[%s4820_s7 + $0x58] sm:$0xff]  }
 0x8a3   :  { %v3203_v57 = vpop.eup %3202 }
 0x8a4   :  { %v3205_v63 = vpop.eup %3204  ;;  %v1740_v10 = vmul.f32 %v3203_v57, %v3201_v8  ;;  %v3122_v57 = vld [vmem:[%s4820_s7 + $0x48] sm:$0xff]  }
 0x8a5   :  { %v1739_v14 = vmul.f32 %v3205_v63, %v4283_v7  ;;  %v3207_v60 = vpop.eup %3206  ;;  %v3096_v7 = vld [vmem:[%s4820_s7 + $0xc8] sm:$0xff]   ;;  %v3124_v63 = vld [vmem:[%s4820_s7 + $0x50] sm:$0xff]  }
 0x8a7   :  { %v1741_v5 = vadd.f32 %v1740_v10, %v1739_v14  ;;  %v3125_v10 = vld [vmem:[%s4820_s7 + $0x10] sm:$0xff]   ;;  %v3127_v14 = vld [vmem:[%s4820_s7 + $0x18] sm:$0xff]  }
 0x8a9   :  { %3208 = vtanh.f32 %v1741_v5  ;;  %v3128_v5 = vld [vmem:[%s4820_s7 + $0x60] sm:$0xff]  }
 0x8b3   :  { %v3209_v18 = vpop.eup %3208 }
 0x8b4   :  { %v1743_v20 = vmul.f32 %v3209_v18, %v3207_v60  ;;  %v3129_v60 = vld [vmem:[%s4820_s7 + $0x20] sm:$0xff]   ;;  %v3131_v18 = vld [vmem:[%s4820_s7 + $0x28] sm:$0xff]  }
 0x8b6   :  { %v1744_v30 = vpack.c.bf16 %v1743_v20, %v1743_v20  ;;  %v3132_v20 = vld [vmem:[%s4820_s7 + $0x70] sm:$0xff]  }
 0x8b8   :  { %2866 = vmatmul.mubr.bf16.vlgmr.msra.gmra.mrb[44].mxu0 %v1744_v30 }
 0x8b9   :  { %2761 = vmatpush3.bf16.msra.mxu0 %v3095_v22  ;;  %2194 = vmatprep.mubr.bf16.mxu0 %v2650_v28  ;;  %v3133_v22 = vld [vmem:[%s4820_s7 + $0x30] sm:$0xff]   ;;  %v3134_v28 = vld [vmem:[%s4820_s7 + $0x78] sm:$0xff]  }
 0x8ba   :  { %2762 = vmatprep.subr.bf16.mxu0 %v3096_v7  ;;  %v2647_v7 = vcombine.low %v1843_v47, %v1843_v47 }
 0x8bd   :  { %2763 = vmatpush3.bf16.msra.mxu0 %v3097_v29  ;;  %v3138_v29 = vld [vmem:[%s4823_s10] sm:$0xff]  }
 0x8be   :  { %2764 = vmatprep.subr.bf16.mxu0 %v3098_v31  ;;  %v3139_v31 = vld [vmem:[%s4823_s10 + $0x8] sm:$0xff]  }
 0x8c1   :  { %2765 = vmatpush3.bf16.msra.mxu0 %v3099_v33  ;;  %v3140_v33 = vld [vmem:[%s4823_s10 + $0x10] sm:$0xff]  }
 0x8c2   :  { %2766 = vmatprep.subr.bf16.mxu0 %v3100_v6  ;;  %v3141_v6 = vld [vmem:[%s4823_s10 + $0x18] sm:$0xff]  }
 0x8c5   :  { %2767 = vmatpush3.bf16.msra.mxu0 %v3101_v32  ;;  %v3142_v32 = vld [vmem:[%s4823_s10 + $0x20] sm:$0xff]  }
 0x8c6   :  { %2768 = vmatprep.subr.bf16.mxu0 %v3102_v34  ;;  %v3143_v34 = vld [vmem:[%s4823_s10 + $0x28] sm:$0xff]  }
 0x8c9   :  { %2769 = vmatpush3.bf16.msra.mxu0 %v3103_v0  ;;  %v3144_v0 = vld [vmem:[%s4823_s10 + $0x30] sm:$0xff]  }
 0x8ca   :  { %2770 = vmatprep.subr.bf16.mxu0 %v3104_v35  ;;  %v3145_v35 = vld [vmem:[%s4823_s10 + $0x38] sm:$0xff]  }
 0x8cd   :  { %2771 = vmatpush3.bf16.msra.mxu0 %v3105_v55 }
 0x8ce   :  { %2772 = vmatprep.subr.bf16.mxu0 %v3106_v49 }
 0x8d1   :  { %2773 = vmatpush3.bf16.msra.mxu0 %v3107_v3 }
 0x8d2   :  { %2774 = vmatprep.subr.bf16.mxu0 %v3108_v36 }
 0x8d5   :  { %2775 = vmatpush3.bf16.msra.mxu0 %v3109_v19 }
 0x8d6   :  { %2901 = vmatprep.subr.bf16.mxu0 %v4944_v24 }
 0x8d8   :  { %2195 = vmatmul.mubr.bf16.vlgmr.msra.gmra.mrb[48].mxu0 %v2649_v53 }
 0x8d9   :  { %2902 = vmatpush3.bf16.msra.mxu0 %v3112_v21  ;;  %2917 = vmatprep.mubr.msk.bf16.mxu0 %vm3360_vm0, %v4944_v24 }
 0x8da   :  { %2903 = vmatprep.subr.bf16.mxu0 %v4944_v24 }
 0x8dd   :  { %2904 = vmatpush3.bf16.msra.mxu0 %v3113_v2  ;;  %v3146_v2 = vld [vmem:[%s4824_s11] sm:$0xff]  }
 0x8de   :  { %2905 = vmatprep.subr.bf16.mxu0 %v4944_v24 }
 0x8e1   :  { %2906 = vmatpush3.bf16.msra.mxu0 %v3114_v48 }
 0x8e2   :  { %2907 = vmatprep.subr.bf16.mxu0 %v4944_v24 }
 0x8e5   :  { %2908 = vmatpush3.bf16.msra.mxu0 %v3115_v23 }
 0x8e6   :  { %2909 = vmatprep.subr.bf16.mxu0 %v4944_v24 }
 0x8e9   :  { %2910 = vmatpush3.bf16.msra.mxu0 %v3116_v25  ;;  %v3147_v25 = vld [vmem:[%s4824_s11 + $0x8] sm:$0xff]  }
 0x8ea   :  { %2911 = vmatprep.subr.bf16.mxu0 %v4944_v24 }
 0x8ed   :  { %2912 = vmatpush3.bf16.msra.mxu0 %v3117_v27  ;;  %v3148_v27 = vld [vmem:[%s4824_s11 + $0x10] sm:$0xff]  }
 0x8ee   :  { %2913 = vmatprep.subr.bf16.mxu0 %v4944_v24 }
 0x8f1   :  { %2914 = vmatpush3.bf16.msra.mxu0 %v3118_v37  ;;  %v3149_v37 = vld [vmem:[%s4824_s11 + $0x18] sm:$0xff]  }
 0x8f2   :  { %2915 = vmatprep.subr.bf16.mxu0 %v4944_v24 }
 0x8f5   :  { %2916 = vmatpush3.bf16.msra.mxu0 %v3119_v38  ;;  %v3150_v38 = vld [vmem:[%s4824_s11 + $0x20] sm:$0xff]  }
 0x8f8   :  { %2918 = vmatmul.mubr.bf16.vlgmr.msra.gmra.mrb[52].mxu0 %v1744_v30  ;;  %v3135_v30 = vld [vmem:[%s4820_s7 + $0x38] sm:$0xff]  }
 0x98b   :  { %v1779_v39 = vpop.f32.mrb[44].mxu0 }
 0x98c   :  { %v1785_v40 = vsel %vm84_vm1, %v1779_v39, -1e+30  ;;  %v2867_v41 = vpop.f32.mrb[45].mxu0  ;;  %v3151_v39 = vld [vmem:[%s4824_s11 + $0x28] sm:$0xff]  }
 0x98d   :  { %v1782_v9 = vpop.f32.mrb[46].mxu0  ;;  %v1786_v59 = vsel %vm1029_vm2, %v1785_v40, -inf  ;;  %v3153_v41 = vld [vmem:[%s4824_s11 + $0x38] sm:$0xff]  }
 0x98e   :  { %1787 = vmax.xlane.f32.xlu0 %v1786_v59  ;;  %v2868_v56 = vpop.f32.mrb[47].mxu0  ;;  %v2646_v59 = vld [vmem:[#allocation2] ss:$0 sm:$0xff] }
 0x9ab   :  { %v2776_v11 = vpop.f32.mrb[48].mxu0 }
 0x9ac   :  { %v2777_v58 = vpop.f32.mrb[49].mxu0 }
 0x9ad   :  { %v4685_v51 = vadd.f32 %v2777_v58, %v2776_v11  ;;  %v2779_v50 = vpop.f32.mrb[50].mxu0 }
 0x9ae   :  { %v2780_v42 = vpop.f32.mrb[51].mxu0 }
 0x9cb   :  { %v4687_v43 = vpop.f32.mrb[52].mxu0 }
 0x9cc   :  { %v2919_v52 = vpop.f32.mrb[53].mxu0 }
 0x9cd   :  { %v2408_v4 = vpop.f32.mrb[54].mxu0 }
 0x9ce   :  { %v2920_v62 = vpop.f32.mrb[55].mxu0 }
 0xa1b   :  { %v1788_v44 = vpop.xlane.xlu0 %1787 }
 0xa1c   :  { %v1789_v45 = vsub.f32 %v1785_v40, %v1788_v44  ;;  %v3152_v40 = vld [vmem:[%s4824_s11 + $0x30] sm:$0xff]  }
 0xa1e   :  { %v1790_v46 = vmul.f32 1.442695, %v1789_v45 }
 0xa20   :  { %3210 = vpow2.f32 %v1790_v46 }
 0xa2a   :  { %v3211_v13 = vpop.eup %3210 }
 0xa2b   :  { %v1792_v54 = vmul.f32 %v3211_v13, %v4120_v26  ;;  %v3123_v26 = vld [vmem:[%s4820_s7 + $0x8] sm:$0xff]  }
 0xa2d   :  { %v1793_v61 = vsel %vm1029_vm2, %v1792_v54, 0.0  ;;  %v1796_v8 = vpack.c.bf16 %v1792_v54, %v1792_v54 }
 0xa2e   :  { %1794 = vadd.xlane.f32.xlu1 %v1793_v61 }
 0xa2f   :  { %2878 = vmatmul.mubr.msk.bf16.vlgmr.msra.gmra.mrb[44].mxu1 %vm1029_vm2, %v1796_v8 }
 0xa30   :  { %2739 = vmatpush3.bf16.msra.mxu1 %v3121_v15  ;;  %2154 = vmatprep.mubr.bf16.mxu1 %v2648_v17 }
 0xa31   :  { %2740 = vmatprep.subr.bf16.mxu1 %v3122_v57 }
 0xa34   :  { %2741 = vmatpush3.bf16.msra.mxu1 %v3123_v26 }
 0xa35   :  { %2742 = vmatprep.subr.bf16.mxu1 %v3124_v63 }
 0xa38   :  { %2743 = vmatpush3.bf16.msra.mxu1 %v3125_v10 }
 0xa39   :  { %2744 = vmatprep.subr.bf16.mxu1 %v3126_v12 }
 0xa3c   :  { %2745 = vmatpush3.bf16.msra.mxu1 %v3127_v14 }
 0xa3d   :  { %2746 = vmatprep.subr.bf16.mxu1 %v3128_v5 }
 0xa40   :  { %2747 = vmatpush3.bf16.msra.mxu1 %v3129_v60 }
 0xa41   :  { %2748 = vmatprep.subr.bf16.mxu1 %v3130_v16 }
 0xa44   :  { %2749 = vmatpush3.bf16.msra.mxu1 %v3131_v18 }
 0xa45   :  { %2750 = vmatprep.subr.bf16.mxu1 %v3132_v20 }
 0xa48   :  { %2751 = vmatpush3.bf16.msra.mxu1 %v3133_v22 }
 0xa49   :  { %2752 = vmatprep.subr.bf16.mxu1 %v3134_v28 }
 0xa4c   :  { %2753 = vmatpush3.bf16.msra.mxu1 %v3135_v30 }
 0xa4d   :  { %2881 = vmatprep.subr.bf16.mxu1 %v4944_v24 }
 0xa4f   :  { %2155 = vmatmul.mubr.bf16.vlgmr.msra.gmra.mrb[48].mxu1 %v2647_v7 }
 0xa50   :  { %2882 = vmatpush3.bf16.msra.mxu1 %v3138_v29  ;;  %2897 = vmatprep.mubr.msk.bf16.mxu1 %vm3360_vm0, %v4944_v24 }
 0xa51   :  { %2883 = vmatprep.subr.bf16.mxu1 %v4944_v24 }
 0xa54   :  { %2884 = vmatpush3.bf16.msra.mxu1 %v3139_v31 }
 0xa55   :  { %2885 = vmatprep.subr.bf16.mxu1 %v4944_v24 }
 0xa58   :  { %2886 = vmatpush3.bf16.msra.mxu1 %v3140_v33 }
 0xa59   :  { %2887 = vmatprep.subr.bf16.mxu1 %v4944_v24 }
 0xa5c   :  { %2888 = vmatpush3.bf16.msra.mxu1 %v3141_v6 }
 0xa5d   :  { %2889 = vmatprep.subr.bf16.mxu1 %v4944_v24 }
 0xa60   :  { %2890 = vmatpush3.bf16.msra.mxu1 %v3142_v32 }
 0xa61   :  { %2891 = vmatprep.subr.bf16.mxu1 %v4944_v24 }
 0xa64   :  { %2892 = vmatpush3.bf16.msra.mxu1 %v3143_v34 }
 0xa65   :  { %2893 = vmatprep.subr.bf16.mxu1 %v4944_v24 }
 0xa68   :  { %2894 = vmatpush3.bf16.msra.mxu1 %v3144_v0 }
 0xa69   :  { %2895 = vmatprep.subr.bf16.mxu1 %v4944_v24 }
 0xa6c   :  { %2896 = vmatpush3.bf16.msra.mxu1 %v3145_v35 }
 0xa6d   :  { %2921 = vmatprep.subr.bf16.mxu1 %v4944_v24 }
 0xabb   :  { %v1795_v55 = vpop.xlane.xlu1 %1794 }
 0xabc   :  { %v1840_v49 = vmax.f32 %v1795_v55, 1e-20 }
 0xabe   :  { %3212 = vrcp.f32 %v1840_v49 }
 0xac8   :  { %v3213_v3 = vpop.eup %3212 }
 0xb02   :  { %v1834_v36 = vpop.f32.mrb[44].mxu1 }
 0xb03   :  { %v1842_v19 = vmul.f32 %v3213_v3, %v1834_v36  ;;  %v2879_v53 = vpop.f32.mrb[45].mxu1 }
 0xb04   :  { %v1837_v21 = vpop.f32.mrb[46].mxu1 }
 0xb05   :  { %v2218_v48 = vpack.c.bf16 %v1842_v19, %v1842_v19  ;;  %v2880_v23 = vpop.f32.mrb[47].mxu1 }
 0xb07   :  { %2898 = vmatmul.mubr.bf16.vlgmr.msra.gmra.mrb[52].mxu1 %v2218_v48 }
 0xb08   :  { %2922 = vmatpush3.bf16.msra.mxu1 %v3146_v2  ;;  %2937 = vmatprep.mubr.msk.bf16.mxu1 %vm3360_vm0, %v4944_v24 }
 0xb09   :  { %2923 = vmatprep.subr.bf16.mxu1 %v4944_v24 }
 0xb0c   :  { %2924 = vmatpush3.bf16.msra.mxu1 %v3147_v25 }
 0xb0d   :  { %2925 = vmatprep.subr.bf16.mxu1 %v4944_v24 }
 0xb10   :  { %2926 = vmatpush3.bf16.msra.mxu1 %v3148_v27 }
 0xb11   :  { %2927 = vmatprep.subr.bf16.mxu1 %v4944_v24 }
 0xb14   :  { %2928 = vmatpush3.bf16.msra.mxu1 %v3149_v37 }
 0xb15   :  { %2929 = vmatprep.subr.bf16.mxu1 %v4944_v24 }
 0xb18   :  { %2930 = vmatpush3.bf16.msra.mxu1 %v3150_v38 }
 0xb19   :  { %2931 = vmatprep.subr.bf16.mxu1 %v4944_v24 }
 0xb1c   :  { %2932 = vmatpush3.bf16.msra.mxu1 %v3151_v39 }
 0xb1d   :  { %2933 = vmatprep.subr.bf16.mxu1 %v4944_v24 }
 0xb20   :  { %2934 = vmatpush3.bf16.msra.mxu1 %v3152_v40 }
 0xb21   :  { %2935 = vmatprep.subr.bf16.mxu1 %v4944_v24  ;;  %v2707_v24 = vld [vmem:[#allocation4] ss:$0 sm:$0xff] }
 0xb22   :  { %v2754_v9 = vpop.f32.mrb[48].mxu1 }
 0xb23   :  { %v2755_v56 = vpop.f32.mrb[49].mxu1 }
 0xb24   :  { %v2756_v1 = vadd.f32 %v2755_v56, %v2754_v9  ;;  %v2757_v11 = vpop.f32.mrb[50].mxu1  ;;  %2936 = vmatpush3.bf16.msra.mxu1 %v3153_v41 }
 0xb25   :  { %v2758_v58 = vpop.f32.mrb[51].mxu1 }
 0xb26   :  { %v2157_v50 = vadd.f32 %v2756_v1, %v2646_v59 }
 0xb28   :  { %v2197_v42 = vadd.f32 %v4685_v51, %v2157_v50 }
 0xb2a   :  { %v2411_v52 = vpack.c.bf16 %v2197_v42, %v2197_v42 }
 0xb2c   :  { %2938 = vmatmul.mubr.bf16.vlgmr.msra.gmra.mrb[56].mxu1 %v2411_v52 }
 0xbda   :  { %v2317_v4 = vpop.f32.mrb[52].mxu1 }
 0xbdb   :  { %v2406_v62 = vadd.f32 %v4687_v43, %v2317_v4  ;;  %v2899_v44 = vpop.f32.mrb[53].mxu1 }
 0xbdc   :  { %v2320_v45 = vpop.f32.mrb[54].mxu1 }
 0xbdd   :  { %v2900_v46 = vpop.f32.mrb[55].mxu1 }
 0xbff   :  { %v2510_v47 = vpop.f32.mrb[56].mxu1 }
 0xc00   :  { %v2516_v13 = vadd.f32 %v2510_v47, %v2406_v62  ;;  %v2939_v54 = vpop.f32.mrb[57].mxu1 }
 0xc01   :  { %v2513_v15 = vpop.f32.mrb[58].mxu1 }
 0xc02   :  { %v2524_v17 = vadd.f32 %v2707_v24, %v2516_v13  ;;  %v2940_v61 = vpop.f32.mrb[59].mxu1 }
 0xc04   :  { %2525 = vst [vmem:[%s4826_s13] sm:$0xff] %v2524_v17 }
 0xc05   :  { %2530 = vsyncpa [#allocation3], 1 }
 0xc06   :  { %2531 = vsyncpa [#allocation5], 1 }

</bundles_post_ra>
